<compile_context>
chip_gen: v7x
topology: tpu7x:2x2x1
jax: 0.10.0
libtpu: 0.0.40
codegen_flags: <defaults>
</compile_context>

<pallas_src>
import functools

import numpy as np
import jax
import jax.numpy as jnp
from jax import lax
from jax.experimental import pallas as pl
from jax.experimental.pallas import tpu as pltpu


# ----------------------------------------------------------------------------
# Fused Block kernel: x -> x + LWMSA(BN(x)) -> (+ Mlp)  (one grid step = image)
# ----------------------------------------------------------------------------

def _block_kernel(x_ref, mask_ref, wq_ref, bq_ref, wk_ref, bk_ref,
                  wv_ref, bv_ref, w1_ref, b1_ref, w2_ref, b2_ref,
                  w3_ref, b3_ref, o_ref,
                  x1_ref, qn_ref, kn_ref, v_ref, hp_ref,
                  *, H, W, C, ws, eps):
    n = ws * ws
    P = H * W
    hid = w1_ref.shape[1]

    mask = mask_ref[...]                      # (C, C) block-diagonal head mask

    # ------------- qkv 1x1 conv (norm1 folded) for the whole image ----------
    xflat = x_ref[0].reshape(P, C)            # NHWC -> (H*W, C), layout-free
    xb = xflat.astype(jnp.bfloat16)
    q = jnp.dot(xb, wq_ref[...], preferred_element_type=jnp.float32) + bq_ref[...]
    k = jnp.dot(xb, wk_ref[...], preferred_element_type=jnp.float32) + bk_ref[...]
    v = jnp.dot(xb, wv_ref[...], preferred_element_type=jnp.float32) + bv_ref[...]

    # per-(token, head) L2 norm, broadcast back to the head's channels via the
    # block-diagonal mask (MXU instead of tiny per-head reductions)
    qn = q * lax.rsqrt(jnp.dot(q * q, mask, preferred_element_type=jnp.float32))
    kn = k * lax.rsqrt(jnp.dot(k * k, mask, preferred_element_type=jnp.float32))

    # stash in spatial layout so windows can be sliced cheaply
    qn_ref[...] = qn.reshape(H, W, C)
    kn_ref[...] = kn.reshape(H, W, C)
    v_ref[...] = v.reshape(H, W, C)

    # ------------- windowed linear attention + residual 1 -------------------
    for wi in range(H // ws):
        for wj in range(W // ws):
            r0, c0 = wi * ws, wj * ws
            qw = qn_ref[r0:r0 + ws, c0:c0 + ws, :].reshape(n, C)
            kw = kn_ref[r0:r0 + ws, c0:c0 + ws, :].reshape(n, C)
            vw = v_ref[r0:r0 + ws, c0:c0 + ws, :].reshape(n, C)

            ksum = jnp.sum(kw, axis=0, keepdims=True) + eps          # (1, C)
            denom = float(n) + jnp.dot(qw * ksum, mask,
                                       preferred_element_type=jnp.float32)
            # per-head kv = K^T V, done full-width then masked cross-head
            kv = jnp.dot(kw.T, vw, preferred_element_type=jnp.float32)  # (C, C)
            out = jnp.dot(qw, kv * mask, preferred_element_type=jnp.float32)
            vsum = jnp.sum(vw, axis=0, keepdims=True)                # (1, C)
            attn = (out + vsum) * pl.reciprocal(denom, approx=True)

            # residual 1, written straight back into NHWC layout (no XLA
            # un-partition transpose)
            xw = x_ref[0, r0:r0 + ws, c0:c0 + ws, :].reshape(n, C)
            x1_ref[r0:r0 + ws, c0:c0 + ws, :] = (xw + attn).reshape(ws, ws, C)

    # ------------- Mlp: fc1 -> 3x3 dwconv -> fc3 (+ residual 2) -------------
    x1 = x1_ref[...].reshape(P, C)
    h1 = jnp.dot(x1.astype(jnp.bfloat16), w1_ref[...],
                 preferred_element_type=jnp.float32) + b1_ref[...]
    h1 = jnp.clip(h1, 0.0, 6.0)                                      # ReLU6

    # zero-padded halo kept in a VMEM scratch (no HBM pad round trip)
    zrow = jnp.zeros((1, W + 2, hid), jnp.float32)
    zcol = jnp.zeros((H + 2, 1, hid), jnp.float32)
    hp_ref[0:1, :, :] = zrow
    hp_ref[H + 1:H + 2, :, :] = zrow
    hp_ref[:, 0:1, :] = zcol
    hp_ref[:, W + 1:W + 2, :] = zcol
    hp_ref[1:H + 1, 1:W + 1, :] = h1.reshape(H, W, hid)

    acc = jnp.zeros((H, W, hid), jnp.float32)
    for dj in range(3):
        # one (possibly sublane-shifted) load per column offset, hoisted out
        # of the row-tap loop (3 shifted slices instead of 9)
        hpj = hp_ref[:, dj:dj + W, :]                                 # (H+2, W, hid)
        for di in range(3):
            tap = w2_ref[di:di + 1, dj:dj + 1, :]                     # (1, 1, hid)
            acc = acc + tap * hpj[di:di + H]
    h2 = jnp.clip(acc + b2_ref[...][None], 0.0, 6.0)                 # ReLU6
    h2 = h2.reshape(P, hid)

    y = jnp.dot(h2.astype(jnp.bfloat16), w3_ref[...],
                preferred_element_type=jnp.float32) + b3_ref[...] + x1
    o_ref[0] = y.reshape(H, W, C)


def _const_spec(a):
    zeros = (0,) * a.ndim
    return pl.BlockSpec(a.shape, lambda b, _z=zeros: _z)


def _block_call(x, f, mask, *, ws):
    B, H, W, C = x.shape
    hid = f['w1'].shape[1]
    if H % ws != 0 or W % ws != 0:
        # TODO(synk): non-window-aligned spatial sizes need the F.pad path.
        raise NotImplementedError("fused Block kernel needs H, W % ws == 0")

    operands = (x, mask, f['wq'], f['bq'], f['wk'], f['bk'], f['wv'], f['bv'],
                f['w1'], f['b1'], f['w2'], f['b2'], f['w3'], f['b3'])
    in_specs = [pl.BlockSpec((1, H, W, C), lambda b: (b, 0, 0, 0))]
    in_specs += [_const_spec(a) for a in operands[1:]]

    kernel = functools.partial(_block_kernel, H=H, W=W, C=C, ws=ws, eps=1e-6)
    return pl.pallas_call(
        kernel,
        out_shape=jax.ShapeDtypeStruct((B, H, W, C), jnp.float32),
        grid=(B,),
        in_specs=in_specs,
        out_specs=pl.BlockSpec((1, H, W, C), lambda b: (b, 0, 0, 0)),
        scratch_shapes=[pltpu.VMEM((H, W, C), jnp.float32),        # x1 (resid 1)
                        pltpu.VMEM((H, W, C), jnp.float32),        # qn
                        pltpu.VMEM((H, W, C), jnp.float32),        # kn
                        pltpu.VMEM((H, W, C), jnp.float32),        # v
                        pltpu.VMEM((H + 2, W + 2, hid), jnp.float32)],  # halo'd hid
        input_output_aliases={0: 0},
        compiler_params=pltpu.CompilerParams(
            dimension_semantics=("parallel",)),
    )(*operands)


# ----------------------------------------------------------------------------
# StageModule forward (Pallas path, NHWC internally)
# ----------------------------------------------------------------------------

@functools.partial(jax.jit, static_argnames=('num_heads', 'ws'))
def stage_module_forward(x_nchw, folded_blocks, *, num_heads, ws):
    x = jnp.transpose(x_nchw, (0, 2, 3, 1)).astype(jnp.float32)      # -> NHWC
    C = x.shape[-1]
    d = C // num_heads
    head_id = jnp.arange(C) // d
    mask = (head_id[:, None] == head_id[None, :]).astype(jnp.float32)  # (C, C)
    for f in folded_blocks:
        x = _block_call(x, f, mask, ws=ws)
    return jnp.transpose(x, (0, 3, 1, 2))                            # -> NCHW


# ----------------------------------------------------------------------------
# Parameter init (deterministic) + BN folding
# ----------------------------------------------------------------------------

def _bn_params(key, c):
    k1, k2, k3, k4 = jax.random.split(key, 4)
    gamma = 1.0 + 0.1 * jax.random.normal(k1, (c,), jnp.float32)
    beta = 0.05 * jax.random.normal(k2, (c,), jnp.float32)
    mean = 0.05 * jax.random.normal(k3, (c,), jnp.float32)
    var = 1.0 + 0.1 * jax.random.uniform(k4, (c,), jnp.float32)
    return gamma, beta, mean, var


def _bn_fold(gamma, beta, mean, var, eps=1e-5):
    s = gamma / jnp.sqrt(var + eps)
    return s, beta - mean * s


def _init_block(key, dim, num_heads, mlp_ratio):
    hid = int(dim * mlp_ratio)
    ks = jax.random.split(key, 9)
    p = {}
    p['bn1'] = _bn_params(ks[0], dim)
    p['w_qkv'] = 0.1 * jax.random.normal(ks[1], (3 * dim, dim), jnp.float32)
    p['w1'] = 0.1 * jax.random.normal(ks[2], (hid, dim), jnp.float32)
    p['bn_fc1'] = _bn_params(ks[3], hid)
    p['w2'] = 0.2 * jax.random.normal(ks[4], (hid, 1, 3, 3), jnp.float32)
    p['b2'] = 0.05 * jax.random.normal(ks[5], (hid,), jnp.float32)
    p['bn_fc2'] = _bn_params(ks[6], hid)
    p['w3'] = 0.1 * jax.random.normal(ks[7], (dim, hid), jnp.float32)
    p['bn_fc3'] = _bn_params(ks[8], dim)
    return p


def _fold_block(p):
    """Fold BN layers into adjacent convs; split qkv; bf16 MXU weights."""
    f = {}
    s1, t1 = _bn_fold(*p['bn1'])
    wqkv = p['w_qkv'].T * s1[:, None]                  # (C, 3C): qkv(BN(x))
    bqkv = (p['w_qkv'] @ t1)[None, :]                  # (1, 3C)
    C = wqkv.shape[0]
    f['wq'] = wqkv[:, :C].astype(jnp.bfloat16)
    f['wk'] = wqkv[:, C:2 * C].astype(jnp.bfloat16)
    f['wv'] = wqkv[:, 2 * C:].astype(jnp.bfloat16)
    f['bq'] = bqkv[:, :C]
    f['bk'] = bqkv[:, C:2 * C]
    f['bv'] = bqkv[:, 2 * C:]
    s, t = _bn_fold(*p['bn_fc1'])
    f['w1'] = (p['w1'].T * s[None, :]).astype(jnp.bfloat16)          # (C, hid)
    f['b1'] = t[None, :]
    s, t = _bn_fold(*p['bn_fc2'])
    f['w2'] = jnp.transpose(p['w2'][:, 0], (1, 2, 0)) * s[None, None, :]  # (3,3,hid)
    f['b2'] = (p['b2'] * s + t)[None, :]
    s, t = _bn_fold(*p['bn_fc3'])
    f['w3'] = (p['w3'].T * s[None, :]).astype(jnp.bfloat16)          # (hid, C)
    f['b3'] = t[None, :]
    return f


# ----------------------------------------------------------------------------
# Pure-JAX reference (mirrors the PyTorch forward, NCHW, f32)
# ----------------------------------------------------------------------------

def _bn_ref(x, bn, eps=1e-5):
    g, b, m, v = bn
    s = g / jnp.sqrt(v + eps)
    return x * s[None, :, None, None] + (b - m * s)[None, :, None, None]


def _conv1x1_ref(x, w):
    return jnp.einsum('bchw,oc->bohw', x, w)


def _relu6(x):
    return jnp.clip(x, 0.0, 6.0)


def _lwmsa_ref(x, w_qkv, num_heads, ws):
    B, C, H, W = x.shape
    Hp = ((H + ws - 1) // ws) * ws
    Wp = ((W + ws - 1) // ws) * ws
    if Wp != W:
        x = jnp.pad(x, ((0, 0), (0, 0), (0, 0), (0, Wp - W)))
    if Hp != H:
        x = jnp.pad(x, ((0, 0), (0, 0), (0, Hp - H), (0, 0)))
    qkv = _conv1x1_ref(x, w_qkv)
    hh, ww = Hp // ws, Wp // ws
    d = C // num_heads
    t = qkv.reshape(B, 3, num_heads, d, hh, ws, ww, ws)
    t = t.transpose(1, 0, 4, 6, 2, 3, 5, 7).reshape(3, B * hh * ww, num_heads, d, ws * ws)
    q, k, v = t[0], t[1], t[2]
    l2n = lambda z: z / jnp.linalg.norm(z, axis=-2, keepdims=True)
    qn = jnp.transpose(l2n(q), (0, 1, 3, 2))
    kn = l2n(k)
    tailor = 1.0 / (ws * ws + jnp.einsum('bhnc,bhc->bhn', qn,
                                         jnp.sum(kn, axis=-1) + 1e-6))
    attn = jnp.einsum('bhmn,bhcn->bhmc', kn, v)
    attn = jnp.einsum('bhnm,bhmc->bhcn', qn, attn)
    vs = jnp.sum(v, axis=-1)[..., None]
    attn = (attn + vs) * tailor[:, :, None, :]
    out = attn.reshape(B, hh, ww, num_heads, d, ws, ws).transpose(0, 3, 4, 1, 5, 2, 6)
    return out.reshape(B, C, Hp, Wp)[:, :, :H, :W]


def _dwconv_ref(x, w, b):
    C = x.shape[1]
    y = lax.conv_general_dilated(x, w, (1, 1), ((1, 1), (1, 1)),
                                 dimension_numbers=('NCHW', 'OIHW', 'NCHW'),
                                 feature_group_count=C)
    return y + b[None, :, None, None]


def _block_ref(x, p, num_heads, ws):
    a = _lwmsa_ref(_bn_ref(x, p['bn1']), p['w_qkv'], num_heads, ws)
    x = x + a
    h = _relu6(_bn_ref(_conv1x1_ref(x, p['w1']), p['bn_fc1']))
    h = _relu6(_bn_ref(_dwconv_ref(h, p['w2'], p['b2']), p['bn_fc2']))
    h = _bn_ref(_conv1x1_ref(h, p['w3']), p['bn_fc3'])
    return x + h


def stage_ref(x, params, num_heads, ws):
    for p in params:
        x = _block_ref(x, p, num_heads, ws)
    return x


# ----------------------------------------------------------------------------

if __name__ == "__main__":
    B, C, H, W = 2, 32, 16, 16
    num_heads, ws, mlp_ratio, num_layers = 8, 8, 4.0, 2

    key = jax.random.PRNGKey(0)
    kx, kp = jax.random.split(key)
    x = jax.random.normal(kx, (B, C, H, W), jnp.float32)

    block_keys = jax.random.split(kp, num_layers)
    raw_params = [_init_block(block_keys[i], C, num_heads, mlp_ratio)
                  for i in range(num_layers)]
    folded_params = [_fold_block(p) for p in raw_params]

    out = stage_module_forward(x, folded_params, num_heads=num_heads, ws=ws)
    out = jax.block_until_ready(out)
    assert out.shape == (B, C, H, W)

    # Tolerance accounts for bf16 MXU operands (f32 accumulation) in the kernel.
    ref = stage_ref(x, raw_params, num_heads, ws)
    np.testing.assert_allclose(np.asarray(out), np.asarray(ref), rtol=3e-2, atol=3e-2)

    print("KERNEL_OK")
</pallas_src>

<mosaic_0001>
module attributes {stable_mosaic.version = 11 : i64} {
  func.func @_block_kernel(%arg0: i32, %arg1: memref<1x16x16x32xf32, #tpu.memory_space<vmem>>, %arg2: memref<32x32xf32, #tpu.memory_space<vmem>>, %arg3: memref<32x32xbf16, #tpu.memory_space<vmem>>, %arg4: memref<1x32xf32, #tpu.memory_space<vmem>>, %arg5: memref<32x32xbf16, #tpu.memory_space<vmem>>, %arg6: memref<1x32xf32, #tpu.memory_space<vmem>>, %arg7: memref<32x32xbf16, #tpu.memory_space<vmem>>, %arg8: memref<1x32xf32, #tpu.memory_space<vmem>>, %arg9: memref<32x128xbf16, #tpu.memory_space<vmem>>, %arg10: memref<1x128xf32, #tpu.memory_space<vmem>>, %arg11: memref<3x3x128xf32, #tpu.memory_space<vmem>>, %arg12: memref<1x128xf32, #tpu.memory_space<vmem>>, %arg13: memref<128x32xbf16, #tpu.memory_space<vmem>>, %arg14: memref<1x32xf32, #tpu.memory_space<vmem>>, %arg15: memref<1x16x16x32xf32, #tpu.memory_space<vmem>>, %arg16: memref<16x16x32xf32, #tpu.memory_space<vmem>>, %arg17: memref<16x16x32xf32, #tpu.memory_space<vmem>>, %arg18: memref<16x16x32xf32, #tpu.memory_space<vmem>>, %arg19: memref<16x16x32xf32, #tpu.memory_space<vmem>>, %arg20: memref<18x18x128xf32, #tpu.memory_space<vmem>>) attributes {dimension_semantics = [#tpu.dimension_semantics<parallel>], iteration_bounds = array<i64: 2>, scalar_prefetch = 0 : i64, scratch_operands = 5 : i64, tpu.core_type = #tpu.core_type<tc>, window_params = [{transform_indices = @transform_0, window_bounds = array<i64: 1, 16, 16, 32>}, {pipeline_mode = #tpu.pipeline_mode<synchronous>, transform_indices = @transform_1, window_bounds = array<i64: 32, 32>}, {pipeline_mode = #tpu.pipeline_mode<synchronous>, transform_indices = @transform_2, window_bounds = array<i64: 32, 32>}, {pipeline_mode = #tpu.pipeline_mode<synchronous>, transform_indices = @transform_3, window_bounds = array<i64: 1, 32>}, {pipeline_mode = #tpu.pipeline_mode<synchronous>, transform_indices = @transform_4, window_bounds = array<i64: 32, 32>}, {pipeline_mode = #tpu.pipeline_mode<synchronous>, transform_indices = @transform_5, window_bounds = array<i64: 1, 32>}, {pipeline_mode = #tpu.pipeline_mode<synchronous>, transform_indices = @transform_6, window_bounds = array<i64: 32, 32>}, {pipeline_mode = #tpu.pipeline_mode<synchronous>, transform_indices = @transform_7, window_bounds = array<i64: 1, 32>}, {pipeline_mode = #tpu.pipeline_mode<synchronous>, transform_indices = @transform_8, window_bounds = array<i64: 32, 128>}, {pipeline_mode = #tpu.pipeline_mode<synchronous>, transform_indices = @transform_9, window_bounds = array<i64: 1, 128>}, {pipeline_mode = #tpu.pipeline_mode<synchronous>, transform_indices = @transform_10, window_bounds = array<i64: 3, 3, 128>}, {pipeline_mode = #tpu.pipeline_mode<synchronous>, transform_indices = @transform_11, window_bounds = array<i64: 1, 128>}, {pipeline_mode = #tpu.pipeline_mode<synchronous>, transform_indices = @transform_12, window_bounds = array<i64: 128, 32>}, {pipeline_mode = #tpu.pipeline_mode<synchronous>, transform_indices = @transform_13, window_bounds = array<i64: 1, 32>}, {transform_indices = @transform_14, window_bounds = array<i64: 1, 16, 16, 32>}]} {
    %c0 = arith.constant 0 : index
    %c0_0 = arith.constant 0 : index
    %0 = vector.load %arg2[%c0, %c0_0] : memref<32x32xf32, #tpu.memory_space<vmem>>, vector<32x32xf32>
    %c0_1 = arith.constant 0 : index
    %c0_2 = arith.constant 0 : index
    %c0_3 = arith.constant 0 : index
    %c0_4 = arith.constant 0 : index
    %1 = vector.load %arg1[%c0_1, %c0_2, %c0_3, %c0_4] : memref<1x16x16x32xf32, #tpu.memory_space<vmem>>, vector<1x16x16x32xf32>
    %2 = vector.shape_cast %1 : vector<1x16x16x32xf32> to vector<16x16x32xf32>
    %3 = vector.shape_cast %2 : vector<16x16x32xf32> to vector<256x32xf32>
    %4 = arith.truncf %3 : vector<256x32xf32> to vector<256x32xbf16>
    %c0_5 = arith.constant 0 : index
    %c0_6 = arith.constant 0 : index
    %5 = vector.load %arg3[%c0_5, %c0_6] : memref<32x32xbf16, #tpu.memory_space<vmem>>, vector<32x32xbf16>
    %cst = arith.constant dense<0.000000e+00> : vector<256x32xf32>
    %6 = tpu.matmul %4, %5, %cst {dimension_numbers = #tpu.dot_dimension_numbers<[1], [0], [0], [1], [0, 0, 1, 1], [], []>} : vector<256x32xbf16>, vector<32x32xbf16>, vector<256x32xf32> -> vector<256x32xf32>
    %c0_7 = arith.constant 0 : index
    %c0_8 = arith.constant 0 : index
    %7 = vector.load %arg4[%c0_7, %c0_8] : memref<1x32xf32, #tpu.memory_space<vmem>>, vector<1x32xf32>
    %8 = vector.broadcast %7 : vector<1x32xf32> to vector<256x32xf32>
    %9 = arith.addf %6, %8 : vector<256x32xf32>
    %c0_9 = arith.constant 0 : index
    %c0_10 = arith.constant 0 : index
    %10 = vector.load %arg5[%c0_9, %c0_10] : memref<32x32xbf16, #tpu.memory_space<vmem>>, vector<32x32xbf16>
    %cst_11 = arith.constant dense<0.000000e+00> : vector<256x32xf32>
    %11 = tpu.matmul %4, %10, %cst_11 {dimension_numbers = #tpu.dot_dimension_numbers<[1], [0], [0], [1], [0, 0, 1, 1], [], []>} : vector<256x32xbf16>, vector<32x32xbf16>, vector<256x32xf32> -> vector<256x32xf32>
    %c0_12 = arith.constant 0 : index
    %c0_13 = arith.constant 0 : index
    %12 = vector.load %arg6[%c0_12, %c0_13] : memref<1x32xf32, #tpu.memory_space<vmem>>, vector<1x32xf32>
    %13 = vector.broadcast %12 : vector<1x32xf32> to vector<256x32xf32>
    %14 = arith.addf %11, %13 : vector<256x32xf32>
    %c0_14 = arith.constant 0 : index
    %c0_15 = arith.constant 0 : index
    %15 = vector.load %arg7[%c0_14, %c0_15] : memref<32x32xbf16, #tpu.memory_space<vmem>>, vector<32x32xbf16>
    %cst_16 = arith.constant dense<0.000000e+00> : vector<256x32xf32>
    %16 = tpu.matmul %4, %15, %cst_16 {dimension_numbers = #tpu.dot_dimension_numbers<[1], [0], [0], [1], [0, 0, 1, 1], [], []>} : vector<256x32xbf16>, vector<32x32xbf16>, vector<256x32xf32> -> vector<256x32xf32>
    %c0_17 = arith.constant 0 : index
    %c0_18 = arith.constant 0 : index
    %17 = vector.load %arg8[%c0_17, %c0_18] : memref<1x32xf32, #tpu.memory_space<vmem>>, vector<1x32xf32>
    %18 = vector.broadcast %17 : vector<1x32xf32> to vector<256x32xf32>
    %19 = arith.addf %16, %18 : vector<256x32xf32>
    %20 = arith.mulf %9, %9 : vector<256x32xf32>
    %cst_19 = arith.constant dense<0.000000e+00> : vector<256x32xf32>
    %21 = tpu.matmul %20, %0, %cst_19 {dimension_numbers = #tpu.dot_dimension_numbers<[1], [0], [0], [1], [0, 0, 1, 1], [], []>} : vector<256x32xf32>, vector<32x32xf32>, vector<256x32xf32> -> vector<256x32xf32>
    %22 = math.rsqrt %21 : vector<256x32xf32>
    %23 = arith.mulf %9, %22 : vector<256x32xf32>
    %24 = arith.mulf %14, %14 : vector<256x32xf32>
    %cst_20 = arith.constant dense<0.000000e+00> : vector<256x32xf32>
    %25 = tpu.matmul %24, %0, %cst_20 {dimension_numbers = #tpu.dot_dimension_numbers<[1], [0], [0], [1], [0, 0, 1, 1], [], []>} : vector<256x32xf32>, vector<32x32xf32>, vector<256x32xf32> -> vector<256x32xf32>
    %26 = math.rsqrt %25 : vector<256x32xf32>
    %27 = arith.mulf %14, %26 : vector<256x32xf32>
    %28 = vector.shape_cast %23 : vector<256x32xf32> to vector<16x16x32xf32>
    %c0_21 = arith.constant 0 : index
    %c0_22 = arith.constant 0 : index
    %c0_23 = arith.constant 0 : index
    %29 = vector.load %arg17[%c0_21, %c0_22, %c0_23] : memref<16x16x32xf32, #tpu.memory_space<vmem>>, vector<16x16x32xf32>
    tpu.vector_store %arg17[%c0_21, %c0_22, %c0_23], %28 {strides = array<i32>} : memref<16x16x32xf32, #tpu.memory_space<vmem>>, vector<16x16x32xf32>,
    %30 = vector.shape_cast %27 : vector<256x32xf32> to vector<16x16x32xf32>
    %c0_24 = arith.constant 0 : index
    %c0_25 = arith.constant 0 : index
    %c0_26 = arith.constant 0 : index
    %31 = vector.load %arg18[%c0_24, %c0_25, %c0_26] : memref<16x16x32xf32, #tpu.memory_space<vmem>>, vector<16x16x32xf32>
    tpu.vector_store %arg18[%c0_24, %c0_25, %c0_26], %30 {strides = array<i32>} : memref<16x16x32xf32, #tpu.memory_space<vmem>>, vector<16x16x32xf32>,
    %32 = vector.shape_cast %19 : vector<256x32xf32> to vector<16x16x32xf32>
    %c0_27 = arith.constant 0 : index
    %c0_28 = arith.constant 0 : index
    %c0_29 = arith.constant 0 : index
    %33 = vector.load %arg19[%c0_27, %c0_28, %c0_29] : memref<16x16x32xf32, #tpu.memory_space<vmem>>, vector<16x16x32xf32>
    tpu.vector_store %arg19[%c0_27, %c0_28, %c0_29], %32 {strides = array<i32>} : memref<16x16x32xf32, #tpu.memory_space<vmem>>, vector<16x16x32xf32>,
    %c0_30 = arith.constant 0 : index
    %c0_31 = arith.constant 0 : index
    %c0_32 = arith.constant 0 : index
    %34 = vector.load %arg17[%c0_30, %c0_31, %c0_32] : memref<16x16x32xf32, #tpu.memory_space<vmem>>, vector<8x8x32xf32>
    %35 = vector.shape_cast %34 : vector<8x8x32xf32> to vector<64x32xf32>
    %c0_33 = arith.constant 0 : index
    %c0_34 = arith.constant 0 : index
    %c0_35 = arith.constant 0 : index
    %36 = vector.load %arg18[%c0_33, %c0_34, %c0_35] : memref<16x16x32xf32, #tpu.memory_space<vmem>>, vector<8x8x32xf32>
    %37 = vector.shape_cast %36 : vector<8x8x32xf32> to vector<64x32xf32>
    %c0_36 = arith.constant 0 : index
    %c0_37 = arith.constant 0 : index
    %c0_38 = arith.constant 0 : index
    %38 = vector.load %arg19[%c0_36, %c0_37, %c0_38] : memref<16x16x32xf32, #tpu.memory_space<vmem>>, vector<8x8x32xf32>
    %39 = vector.shape_cast %38 : vector<8x8x32xf32> to vector<64x32xf32>
    %cst_39 = arith.constant dense<0.000000e+00> : vector<32xf32>
    %40 = vector.multi_reduction <add>, %37, %cst_39 [0] : vector<64x32xf32> to vector<32xf32>
    %41 = vector.shape_cast %40 : vector<32xf32> to vector<1x32xf32>
    %cst_40 = arith.constant 9.99999997E-7 : f32
    %42 = vector.broadcast %cst_40 : f32 to vector<1x32xf32>
    %43 = arith.addf %41, %42 : vector<1x32xf32>
    %44 = vector.broadcast %43 : vector<1x32xf32> to vector<64x32xf32>
    %45 = arith.mulf %35, %44 : vector<64x32xf32>
    %cst_41 = arith.constant dense<0.000000e+00> : vector<64x32xf32>
    %46 = tpu.matmul %45, %0, %cst_41 {dimension_numbers = #tpu.dot_dimension_numbers<[1], [0], [0], [1], [0, 0, 1, 1], [], []>} : vector<64x32xf32>, vector<32x32xf32>, vector<64x32xf32> -> vector<64x32xf32>
    %cst_42 = arith.constant 6.400000e+01 : f32
    %47 = vector.broadcast %cst_42 : f32 to vector<64x32xf32>
    %48 = arith.addf %47, %46 : vector<64x32xf32>
    %49 = tpu.transpose %37, [1, 0] : vector<64x32xf32> -> vector<32x64xf32>
    %cst_43 = arith.constant dense<0.000000e+00> : vector<32x32xf32>
    %50 = tpu.matmul %49, %39, %cst_43 {dimension_numbers = #tpu.dot_dimension_numbers<[1], [0], [0], [1], [0, 0, 1, 1], [], []>} : vector<32x64xf32>, vector<64x32xf32>, vector<32x32xf32> -> vector<32x32xf32>
    %51 = arith.mulf %50, %0 : vector<32x32xf32>
    %cst_44 = arith.constant dense<0.000000e+00> : vector<64x32xf32>
    %52 = tpu.matmul %35, %51, %cst_44 {dimension_numbers = #tpu.dot_dimension_numbers<[1], [0], [0], [1], [0, 0, 1, 1], [], []>} : vector<64x32xf32>, vector<32x32xf32>, vector<64x32xf32> -> vector<64x32xf32>
    %cst_45 = arith.constant dense<0.000000e+00> : vector<32xf32>
    %53 = vector.multi_reduction <add>, %39, %cst_45 [0] : vector<64x32xf32> to vector<32xf32>
    %54 = vector.shape_cast %53 : vector<32xf32> to vector<1x32xf32>
    %55 = vector.broadcast %54 : vector<1x32xf32> to vector<64x32xf32>
    %56 = arith.addf %52, %55 : vector<64x32xf32>
    %57 = tpu.reciprocal %48 {approx = true} : vector<64x32xf32> -> vector<64x32xf32>
    %58 = arith.mulf %56, %57 : vector<64x32xf32>
    %c0_46 = arith.constant 0 : index
    %c0_47 = arith.constant 0 : index
    %c0_48 = arith.constant 0 : index
    %c0_49 = arith.constant 0 : index
    %59 = vector.load %arg1[%c0_46, %c0_47, %c0_48, %c0_49] : memref<1x16x16x32xf32, #tpu.memory_space<vmem>>, vector<1x8x8x32xf32>
    %60 = vector.shape_cast %59 : vector<1x8x8x32xf32> to vector<8x8x32xf32>
    %61 = vector.shape_cast %60 : vector<8x8x32xf32> to vector<64x32xf32>
    %62 = arith.addf %61, %58 : vector<64x32xf32>
    %63 = vector.shape_cast %62 : vector<64x32xf32> to vector<8x8x32xf32>
    %c0_50 = arith.constant 0 : index
    %c0_51 = arith.constant 0 : index
    %c0_52 = arith.constant 0 : index
    %64 = vector.load %arg16[%c0_50, %c0_51, %c0_52] : memref<16x16x32xf32, #tpu.memory_space<vmem>>, vector<8x8x32xf32>
    tpu.vector_store %arg16[%c0_50, %c0_51, %c0_52], %63 {strides = array<i32>} : memref<16x16x32xf32, #tpu.memory_space<vmem>>, vector<8x8x32xf32>,
    %c0_53 = arith.constant 0 : index
    %c8 = arith.constant 8 : index
    %c0_54 = arith.constant 0 : index
    %65 = vector.load %arg17[%c0_53, %c8, %c0_54] : memref<16x16x32xf32, #tpu.memory_space<vmem>>, vector<8x8x32xf32>
    %66 = vector.shape_cast %65 : vector<8x8x32xf32> to vector<64x32xf32>
    %c0_55 = arith.constant 0 : index
    %c8_56 = arith.constant 8 : index
    %c0_57 = arith.constant 0 : index
    %67 = vector.load %arg18[%c0_55, %c8_56, %c0_57] : memref<16x16x32xf32, #tpu.memory_space<vmem>>, vector<8x8x32xf32>
    %68 = vector.shape_cast %67 : vector<8x8x32xf32> to vector<64x32xf32>
    %c0_58 = arith.constant 0 : index
    %c8_59 = arith.constant 8 : index
    %c0_60 = arith.constant 0 : index
    %69 = vector.load %arg19[%c0_58, %c8_59, %c0_60] : memref<16x16x32xf32, #tpu.memory_space<vmem>>, vector<8x8x32xf32>
    %70 = vector.shape_cast %69 : vector<8x8x32xf32> to vector<64x32xf32>
    %cst_61 = arith.constant dense<0.000000e+00> : vector<32xf32>
    %71 = vector.multi_reduction <add>, %68, %cst_61 [0] : vector<64x32xf32> to vector<32xf32>
    %72 = vector.shape_cast %71 : vector<32xf32> to vector<1x32xf32>
    %cst_62 = arith.constant 9.99999997E-7 : f32
    %73 = vector.broadcast %cst_62 : f32 to vector<1x32xf32>
    %74 = arith.addf %72, %73 : vector<1x32xf32>
    %75 = vector.broadcast %74 : vector<1x32xf32> to vector<64x32xf32>
    %76 = arith.mulf %66, %75 : vector<64x32xf32>
    %cst_63 = arith.constant dense<0.000000e+00> : vector<64x32xf32>
    %77 = tpu.matmul %76, %0, %cst_63 {dimension_numbers = #tpu.dot_dimension_numbers<[1], [0], [0], [1], [0, 0, 1, 1], [], []>} : vector<64x32xf32>, vector<32x32xf32>, vector<64x32xf32> -> vector<64x32xf32>
    %cst_64 = arith.constant 6.400000e+01 : f32
    %78 = vector.broadcast %cst_64 : f32 to vector<64x32xf32>
    %79 = arith.addf %78, %77 : vector<64x32xf32>
    %80 = tpu.transpose %68, [1, 0] : vector<64x32xf32> -> vector<32x64xf32>
    %cst_65 = arith.constant dense<0.000000e+00> : vector<32x32xf32>
    %81 = tpu.matmul %80, %70, %cst_65 {dimension_numbers = #tpu.dot_dimension_numbers<[1], [0], [0], [1], [0, 0, 1, 1], [], []>} : vector<32x64xf32>, vector<64x32xf32>, vector<32x32xf32> -> vector<32x32xf32>
    %82 = arith.mulf %81, %0 : vector<32x32xf32>
    %cst_66 = arith.constant dense<0.000000e+00> : vector<64x32xf32>
    %83 = tpu.matmul %66, %82, %cst_66 {dimension_numbers = #tpu.dot_dimension_numbers<[1], [0], [0], [1], [0, 0, 1, 1], [], []>} : vector<64x32xf32>, vector<32x32xf32>, vector<64x32xf32> -> vector<64x32xf32>
    %cst_67 = arith.constant dense<0.000000e+00> : vector<32xf32>
    %84 = vector.multi_reduction <add>, %70, %cst_67 [0] : vector<64x32xf32> to vector<32xf32>
    %85 = vector.shape_cast %84 : vector<32xf32> to vector<1x32xf32>
    %86 = vector.broadcast %85 : vector<1x32xf32> to vector<64x32xf32>
    %87 = arith.addf %83, %86 : vector<64x32xf32>
    %88 = tpu.reciprocal %79 {approx = true} : vector<64x32xf32> -> vector<64x32xf32>
    %89 = arith.mulf %87, %88 : vector<64x32xf32>
    %c0_68 = arith.constant 0 : index
    %c0_69 = arith.constant 0 : index
    %c8_70 = arith.constant 8 : index
    %c0_71 = arith.constant 0 : index
    %90 = vector.load %arg1[%c0_68, %c0_69, %c8_70, %c0_71] : memref<1x16x16x32xf32, #tpu.memory_space<vmem>>, vector<1x8x8x32xf32>
    %91 = vector.shape_cast %90 : vector<1x8x8x32xf32> to vector<8x8x32xf32>
    %92 = vector.shape_cast %91 : vector<8x8x32xf32> to vector<64x32xf32>
    %93 = arith.addf %92, %89 : vector<64x32xf32>
    %94 = vector.shape_cast %93 : vector<64x32xf32> to vector<8x8x32xf32>
    %c0_72 = arith.constant 0 : index
    %c8_73 = arith.constant 8 : index
    %c0_74 = arith.constant 0 : index
    %95 = vector.load %arg16[%c0_72, %c8_73, %c0_74] : memref<16x16x32xf32, #tpu.memory_space<vmem>>, vector<8x8x32xf32>
    tpu.vector_store %arg16[%c0_72, %c8_73, %c0_74], %94 {strides = array<i32>} : memref<16x16x32xf32, #tpu.memory_space<vmem>>, vector<8x8x32xf32>,
    %c8_75 = arith.constant 8 : index
    %c0_76 = arith.constant 0 : index
    %c0_77 = arith.constant 0 : index
    %96 = vector.load %arg17[%c8_75, %c0_76, %c0_77] : memref<16x16x32xf32, #tpu.memory_space<vmem>>, vector<8x8x32xf32>
    %97 = vector.shape_cast %96 : vector<8x8x32xf32> to vector<64x32xf32>
    %c8_78 = arith.constant 8 : index
    %c0_79 = arith.constant 0 : index
    %c0_80 = arith.constant 0 : index
    %98 = vector.load %arg18[%c8_78, %c0_79, %c0_80] : memref<16x16x32xf32, #tpu.memory_space<vmem>>, vector<8x8x32xf32>
    %99 = vector.shape_cast %98 : vector<8x8x32xf32> to vector<64x32xf32>
    %c8_81 = arith.constant 8 : index
    %c0_82 = arith.constant 0 : index
    %c0_83 = arith.constant 0 : index
    %100 = vector.load %arg19[%c8_81, %c0_82, %c0_83] : memref<16x16x32xf32, #tpu.memory_space<vmem>>, vector<8x8x32xf32>
    %101 = vector.shape_cast %100 : vector<8x8x32xf32> to vector<64x32xf32>
    %cst_84 = arith.constant dense<0.000000e+00> : vector<32xf32>
    %102 = vector.multi_reduction <add>, %99, %cst_84 [0] : vector<64x32xf32> to vector<32xf32>
    %103 = vector.shape_cast %102 : vector<32xf32> to vector<1x32xf32>
    %cst_85 = arith.constant 9.99999997E-7 : f32
    %104 = vector.broadcast %cst_85 : f32 to vector<1x32xf32>
    %105 = arith.addf %103, %104 : vector<1x32xf32>
    %106 = vector.broadcast %105 : vector<1x32xf32> to vector<64x32xf32>
    %107 = arith.mulf %97, %106 : vector<64x32xf32>
    %cst_86 = arith.constant dense<0.000000e+00> : vector<64x32xf32>
    %108 = tpu.matmul %107, %0, %cst_86 {dimension_numbers = #tpu.dot_dimension_numbers<[1], [0], [0], [1], [0, 0, 1, 1], [], []>} : vector<64x32xf32>, vector<32x32xf32>, vector<64x32xf32> -> vector<64x32xf32>
    %cst_87 = arith.constant 6.400000e+01 : f32
    %109 = vector.broadcast %cst_87 : f32 to vector<64x32xf32>
    %110 = arith.addf %109, %108 : vector<64x32xf32>
    %111 = tpu.transpose %99, [1, 0] : vector<64x32xf32> -> vector<32x64xf32>
    %cst_88 = arith.constant dense<0.000000e+00> : vector<32x32xf32>
    %112 = tpu.matmul %111, %101, %cst_88 {dimension_numbers = #tpu.dot_dimension_numbers<[1], [0], [0], [1], [0, 0, 1, 1], [], []>} : vector<32x64xf32>, vector<64x32xf32>, vector<32x32xf32> -> vector<32x32xf32>
    %113 = arith.mulf %112, %0 : vector<32x32xf32>
    %cst_89 = arith.constant dense<0.000000e+00> : vector<64x32xf32>
    %114 = tpu.matmul %97, %113, %cst_89 {dimension_numbers = #tpu.dot_dimension_numbers<[1], [0], [0], [1], [0, 0, 1, 1], [], []>} : vector<64x32xf32>, vector<32x32xf32>, vector<64x32xf32> -> vector<64x32xf32>
    %cst_90 = arith.constant dense<0.000000e+00> : vector<32xf32>
    %115 = vector.multi_reduction <add>, %101, %cst_90 [0] : vector<64x32xf32> to vector<32xf32>
    %116 = vector.shape_cast %115 : vector<32xf32> to vector<1x32xf32>
    %117 = vector.broadcast %116 : vector<1x32xf32> to vector<64x32xf32>
    %118 = arith.addf %114, %117 : vector<64x32xf32>
    %119 = tpu.reciprocal %110 {approx = true} : vector<64x32xf32> -> vector<64x32xf32>
    %120 = arith.mulf %118, %119 : vector<64x32xf32>
    %c0_91 = arith.constant 0 : index
    %c8_92 = arith.constant 8 : index
    %c0_93 = arith.constant 0 : index
    %c0_94 = arith.constant 0 : index
    %121 = vector.load %arg1[%c0_91, %c8_92, %c0_93, %c0_94] : memref<1x16x16x32xf32, #tpu.memory_space<vmem>>, vector<1x8x8x32xf32>
    %122 = vector.shape_cast %121 : vector<1x8x8x32xf32> to vector<8x8x32xf32>
    %123 = vector.shape_cast %122 : vector<8x8x32xf32> to vector<64x32xf32>
    %124 = arith.addf %123, %120 : vector<64x32xf32>
    %125 = vector.shape_cast %124 : vector<64x32xf32> to vector<8x8x32xf32>
    %c8_95 = arith.constant 8 : index
    %c0_96 = arith.constant 0 : index
    %c0_97 = arith.constant 0 : index
    %126 = vector.load %arg16[%c8_95, %c0_96, %c0_97] : memref<16x16x32xf32, #tpu.memory_space<vmem>>, vector<8x8x32xf32>
    tpu.vector_store %arg16[%c8_95, %c0_96, %c0_97], %125 {strides = array<i32>} : memref<16x16x32xf32, #tpu.memory_space<vmem>>, vector<8x8x32xf32>,
    %c8_98 = arith.constant 8 : index
    %c8_99 = arith.constant 8 : index
    %c0_100 = arith.constant 0 : index
    %127 = vector.load %arg17[%c8_98, %c8_99, %c0_100] : memref<16x16x32xf32, #tpu.memory_space<vmem>>, vector<8x8x32xf32>
    %128 = vector.shape_cast %127 : vector<8x8x32xf32> to vector<64x32xf32>
    %c8_101 = arith.constant 8 : index
    %c8_102 = arith.constant 8 : index
    %c0_103 = arith.constant 0 : index
    %129 = vector.load %arg18[%c8_101, %c8_102, %c0_103] : memref<16x16x32xf32, #tpu.memory_space<vmem>>, vector<8x8x32xf32>
    %130 = vector.shape_cast %129 : vector<8x8x32xf32> to vector<64x32xf32>
    %c8_104 = arith.constant 8 : index
    %c8_105 = arith.constant 8 : index
    %c0_106 = arith.constant 0 : index
    %131 = vector.load %arg19[%c8_104, %c8_105, %c0_106] : memref<16x16x32xf32, #tpu.memory_space<vmem>>, vector<8x8x32xf32>
    %132 = vector.shape_cast %131 : vector<8x8x32xf32> to vector<64x32xf32>
    %cst_107 = arith.constant dense<0.000000e+00> : vector<32xf32>
    %133 = vector.multi_reduction <add>, %130, %cst_107 [0] : vector<64x32xf32> to vector<32xf32>
    %134 = vector.shape_cast %133 : vector<32xf32> to vector<1x32xf32>
    %cst_108 = arith.constant 9.99999997E-7 : f32
    %135 = vector.broadcast %cst_108 : f32 to vector<1x32xf32>
    %136 = arith.addf %134, %135 : vector<1x32xf32>
    %137 = vector.broadcast %136 : vector<1x32xf32> to vector<64x32xf32>
    %138 = arith.mulf %128, %137 : vector<64x32xf32>
    %cst_109 = arith.constant dense<0.000000e+00> : vector<64x32xf32>
    %139 = tpu.matmul %138, %0, %cst_109 {dimension_numbers = #tpu.dot_dimension_numbers<[1], [0], [0], [1], [0, 0, 1, 1], [], []>} : vector<64x32xf32>, vector<32x32xf32>, vector<64x32xf32> -> vector<64x32xf32>
    %cst_110 = arith.constant 6.400000e+01 : f32
    %140 = vector.broadcast %cst_110 : f32 to vector<64x32xf32>
    %141 = arith.addf %140, %139 : vector<64x32xf32>
    %142 = tpu.transpose %130, [1, 0] : vector<64x32xf32> -> vector<32x64xf32>
    %cst_111 = arith.constant dense<0.000000e+00> : vector<32x32xf32>
    %143 = tpu.matmul %142, %132, %cst_111 {dimension_numbers = #tpu.dot_dimension_numbers<[1], [0], [0], [1], [0, 0, 1, 1], [], []>} : vector<32x64xf32>, vector<64x32xf32>, vector<32x32xf32> -> vector<32x32xf32>
    %144 = arith.mulf %143, %0 : vector<32x32xf32>
    %cst_112 = arith.constant dense<0.000000e+00> : vector<64x32xf32>
    %145 = tpu.matmul %128, %144, %cst_112 {dimension_numbers = #tpu.dot_dimension_numbers<[1], [0], [0], [1], [0, 0, 1, 1], [], []>} : vector<64x32xf32>, vector<32x32xf32>, vector<64x32xf32> -> vector<64x32xf32>
    %cst_113 = arith.constant dense<0.000000e+00> : vector<32xf32>
    %146 = vector.multi_reduction <add>, %132, %cst_113 [0] : vector<64x32xf32> to vector<32xf32>
    %147 = vector.shape_cast %146 : vector<32xf32> to vector<1x32xf32>
    %148 = vector.broadcast %147 : vector<1x32xf32> to vector<64x32xf32>
    %149 = arith.addf %145, %148 : vector<64x32xf32>
    %150 = tpu.reciprocal %141 {approx = true} : vector<64x32xf32> -> vector<64x32xf32>
    %151 = arith.mulf %149, %150 : vector<64x32xf32>
    %c0_114 = arith.constant 0 : index
    %c8_115 = arith.constant 8 : index
    %c8_116 = arith.constant 8 : index
    %c0_117 = arith.constant 0 : index
    %152 = vector.load %arg1[%c0_114, %c8_115, %c8_116, %c0_117] : memref<1x16x16x32xf32, #tpu.memory_space<vmem>>, vector<1x8x8x32xf32>
    %153 = vector.shape_cast %152 : vector<1x8x8x32xf32> to vector<8x8x32xf32>
    %154 = vector.shape_cast %153 : vector<8x8x32xf32> to vector<64x32xf32>
    %155 = arith.addf %154, %151 : vector<64x32xf32>
    %156 = vector.shape_cast %155 : vector<64x32xf32> to vector<8x8x32xf32>
    %c8_118 = arith.constant 8 : index
    %c8_119 = arith.constant 8 : index
    %c0_120 = arith.constant 0 : index
    %157 = vector.load %arg16[%c8_118, %c8_119, %c0_120] : memref<16x16x32xf32, #tpu.memory_space<vmem>>, vector<8x8x32xf32>
    tpu.vector_store %arg16[%c8_118, %c8_119, %c0_120], %156 {strides = array<i32>} : memref<16x16x32xf32, #tpu.memory_space<vmem>>, vector<8x8x32xf32>,
    %c0_121 = arith.constant 0 : index
    %c0_122 = arith.constant 0 : index
    %c0_123 = arith.constant 0 : index
    %158 = vector.load %arg16[%c0_121, %c0_122, %c0_123] : memref<16x16x32xf32, #tpu.memory_space<vmem>>, vector<16x16x32xf32>
    %159 = vector.shape_cast %158 : vector<16x16x32xf32> to vector<256x32xf32>
    %160 = arith.truncf %159 : vector<256x32xf32> to vector<256x32xbf16>
    %c0_124 = arith.constant 0 : index
    %c0_125 = arith.constant 0 : index
    %161 = vector.load %arg9[%c0_124, %c0_125] : memref<32x128xbf16, #tpu.memory_space<vmem>>, vector<32x128xbf16>
    %cst_126 = arith.constant dense<0.000000e+00> : vector<256x128xf32>
    %162 = tpu.matmul %160, %161, %cst_126 {dimension_numbers = #tpu.dot_dimension_numbers<[1], [0], [0], [1], [0, 0, 1, 1], [], []>} : vector<256x32xbf16>, vector<32x128xbf16>, vector<256x128xf32> -> vector<256x128xf32>
    %c0_127 = arith.constant 0 : index
    %c0_128 = arith.constant 0 : index
    %163 = vector.load %arg10[%c0_127, %c0_128] : memref<1x128xf32, #tpu.memory_space<vmem>>, vector<1x128xf32>
    %164 = vector.broadcast %163 : vector<1x128xf32> to vector<256x128xf32>
    %165 = arith.addf %162, %164 : vector<256x128xf32>
    %cst_129 = arith.constant 0.000000e+00 : f32
    %cst_130 = arith.constant 6.000000e+00 : f32
    %166 = vector.broadcast %cst_129 : f32 to vector<256x128xf32>
    %167 = arith.maximumf %166, %165 : vector<256x128xf32>
    %168 = vector.broadcast %cst_130 : f32 to vector<256x128xf32>
    %169 = arith.minimumf %168, %167 : vector<256x128xf32>
    %cst_131 = arith.constant 0.000000e+00 : f32
    %170 = vector.broadcast %cst_131 : f32 to vector<1x18x128xf32>
    %cst_132 = arith.constant 0.000000e+00 : f32
    %171 = vector.broadcast %cst_132 : f32 to vector<18x1x128xf32>
    %c0_133 = arith.constant 0 : index
    %c0_134 = arith.constant 0 : index
    %c0_135 = arith.constant 0 : index
    %172 = vector.load %arg20[%c0_133, %c0_134, %c0_135] : memref<18x18x128xf32, #tpu.memory_space<vmem>>, vector<1x18x128xf32>
    tpu.vector_store %arg20[%c0_133, %c0_134, %c0_135], %170 {strides = array<i32>} : memref<18x18x128xf32, #tpu.memory_space<vmem>>, vector<1x18x128xf32>,
    %c17 = arith.constant 17 : index
    %c0_136 = arith.constant 0 : index
    %c0_137 = arith.constant 0 : index
    %173 = vector.load %arg20[%c17, %c0_136, %c0_137] : memref<18x18x128xf32, #tpu.memory_space<vmem>>, vector<1x18x128xf32>
    tpu.vector_store %arg20[%c17, %c0_136, %c0_137], %170 {strides = array<i32>} : memref<18x18x128xf32, #tpu.memory_space<vmem>>, vector<1x18x128xf32>,
    %c0_138 = arith.constant 0 : index
    %c0_139 = arith.constant 0 : index
    %c0_140 = arith.constant 0 : index
    %174 = vector.load %arg20[%c0_138, %c0_139, %c0_140] : memref<18x18x128xf32, #tpu.memory_space<vmem>>, vector<18x1x128xf32>
    tpu.vector_store %arg20[%c0_138, %c0_139, %c0_140], %171 {strides = array<i32>} : memref<18x18x128xf32, #tpu.memory_space<vmem>>, vector<18x1x128xf32>,
    %c0_141 = arith.constant 0 : index
    %c17_142 = arith.constant 17 : index
    %c0_143 = arith.constant 0 : index
    %175 = vector.load %arg20[%c0_141, %c17_142, %c0_143] : memref<18x18x128xf32, #tpu.memory_space<vmem>>, vector<18x1x128xf32>
    tpu.vector_store %arg20[%c0_141, %c17_142, %c0_143], %171 {strides = array<i32>} : memref<18x18x128xf32, #tpu.memory_space<vmem>>, vector<18x1x128xf32>,
    %176 = vector.shape_cast %169 : vector<256x128xf32> to vector<16x16x128xf32>
    %c1 = arith.constant 1 : index
    %c1_144 = arith.constant 1 : index
    %c0_145 = arith.constant 0 : index
    %177 = vector.load %arg20[%c1, %c1_144, %c0_145] : memref<18x18x128xf32, #tpu.memory_space<vmem>>, vector<16x16x128xf32>
    tpu.vector_store %arg20[%c1, %c1_144, %c0_145], %176 {strides = array<i32>} : memref<18x18x128xf32, #tpu.memory_space<vmem>>, vector<16x16x128xf32>,
    %cst_146 = arith.constant 0.000000e+00 : f32
    %178 = vector.broadcast %cst_146 : f32 to vector<16x16x128xf32>
    %c0_147 = arith.constant 0 : index
    %c0_148 = arith.constant 0 : index
    %c0_149 = arith.constant 0 : index
    %179 = vector.load %arg20[%c0_147, %c0_148, %c0_149] : memref<18x18x128xf32, #tpu.memory_space<vmem>>, vector<18x16x128xf32>
    %c0_150 = arith.constant 0 : index
    %c0_151 = arith.constant 0 : index
    %c0_152 = arith.constant 0 : index
    %180 = vector.load %arg11[%c0_150, %c0_151, %c0_152] : memref<3x3x128xf32, #tpu.memory_space<vmem>>, vector<1x1x128xf32>
    %181 = vector.extract_strided_slice %179 {offsets = [0, 0, 0], sizes = [16, 16, 128], strides = [1, 1, 1]} : vector<18x16x128xf32> to vector<16x16x128xf32>
    %182 = vector.broadcast %180 : vector<1x1x128xf32> to vector<16x16x128xf32>
    %183 = arith.mulf %182, %181 : vector<16x16x128xf32>
    %184 = arith.addf %178, %183 : vector<16x16x128xf32>
    %c1_153 = arith.constant 1 : index
    %c0_154 = arith.constant 0 : index
    %c0_155 = arith.constant 0 : index
    %185 = vector.load %arg11[%c1_153, %c0_154, %c0_155] : memref<3x3x128xf32, #tpu.memory_space<vmem>>, vector<1x1x128xf32>
    %186 = vector.extract_strided_slice %179 {offsets = [1, 0, 0], sizes = [16, 16, 128], strides = [1, 1, 1]} : vector<18x16x128xf32> to vector<16x16x128xf32>
    %187 = vector.broadcast %185 : vector<1x1x128xf32> to vector<16x16x128xf32>
    %188 = arith.mulf %187, %186 : vector<16x16x128xf32>
    %189 = arith.addf %184, %188 : vector<16x16x128xf32>
    %c2 = arith.constant 2 : index
    %c0_156 = arith.constant 0 : index
    %c0_157 = arith.constant 0 : index
    %190 = vector.load %arg11[%c2, %c0_156, %c0_157] : memref<3x3x128xf32, #tpu.memory_space<vmem>>, vector<1x1x128xf32>
    %191 = vector.extract_strided_slice %179 {offsets = [2, 0, 0], sizes = [16, 16, 128], strides = [1, 1, 1]} : vector<18x16x128xf32> to vector<16x16x128xf32>
    %192 = vector.broadcast %190 : vector<1x1x128xf32> to vector<16x16x128xf32>
    %193 = arith.mulf %192, %191 : vector<16x16x128xf32>
    %194 = arith.addf %189, %193 : vector<16x16x128xf32>
    %c0_158 = arith.constant 0 : index
    %c1_159 = arith.constant 1 : index
    %c0_160 = arith.constant 0 : index
    %195 = vector.load %arg20[%c0_158, %c1_159, %c0_160] : memref<18x18x128xf32, #tpu.memory_space<vmem>>, vector<18x16x128xf32>
    %c0_161 = arith.constant 0 : index
    %c1_162 = arith.constant 1 : index
    %c0_163 = arith.constant 0 : index
    %196 = vector.load %arg11[%c0_161, %c1_162, %c0_163] : memref<3x3x128xf32, #tpu.memory_space<vmem>>, vector<1x1x128xf32>
    %197 = vector.extract_strided_slice %195 {offsets = [0, 0, 0], sizes = [16, 16, 128], strides = [1, 1, 1]} : vector<18x16x128xf32> to vector<16x16x128xf32>
    %198 = vector.broadcast %196 : vector<1x1x128xf32> to vector<16x16x128xf32>
    %199 = arith.mulf %198, %197 : vector<16x16x128xf32>
    %200 = arith.addf %194, %199 : vector<16x16x128xf32>
    %c1_164 = arith.constant 1 : index
    %c1_165 = arith.constant 1 : index
    %c0_166 = arith.constant 0 : index
    %201 = vector.load %arg11[%c1_164, %c1_165, %c0_166] : memref<3x3x128xf32, #tpu.memory_space<vmem>>, vector<1x1x128xf32>
    %202 = vector.extract_strided_slice %195 {offsets = [1, 0, 0], sizes = [16, 16, 128], strides = [1, 1, 1]} : vector<18x16x128xf32> to vector<16x16x128xf32>
    %203 = vector.broadcast %201 : vector<1x1x128xf32> to vector<16x16x128xf32>
    %204 = arith.mulf %203, %202 : vector<16x16x128xf32>
    %205 = arith.addf %200, %204 : vector<16x16x128xf32>
    %c2_167 = arith.constant 2 : index
    %c1_168 = arith.constant 1 : index
    %c0_169 = arith.constant 0 : index
    %206 = vector.load %arg11[%c2_167, %c1_168, %c0_169] : memref<3x3x128xf32, #tpu.memory_space<vmem>>, vector<1x1x128xf32>
    %207 = vector.extract_strided_slice %195 {offsets = [2, 0, 0], sizes = [16, 16, 128], strides = [1, 1, 1]} : vector<18x16x128xf32> to vector<16x16x128xf32>
    %208 = vector.broadcast %206 : vector<1x1x128xf32> to vector<16x16x128xf32>
    %209 = arith.mulf %208, %207 : vector<16x16x128xf32>
    %210 = arith.addf %205, %209 : vector<16x16x128xf32>
    %c0_170 = arith.constant 0 : index
    %c2_171 = arith.constant 2 : index
    %c0_172 = arith.constant 0 : index
    %211 = vector.load %arg20[%c0_170, %c2_171, %c0_172] : memref<18x18x128xf32, #tpu.memory_space<vmem>>, vector<18x16x128xf32>
    %c0_173 = arith.constant 0 : index
    %c2_174 = arith.constant 2 : index
    %c0_175 = arith.constant 0 : index
    %212 = vector.load %arg11[%c0_173, %c2_174, %c0_175] : memref<3x3x128xf32, #tpu.memory_space<vmem>>, vector<1x1x128xf32>
    %213 = vector.extract_strided_slice %211 {offsets = [0, 0, 0], sizes = [16, 16, 128], strides = [1, 1, 1]} : vector<18x16x128xf32> to vector<16x16x128xf32>
    %214 = vector.broadcast %212 : vector<1x1x128xf32> to vector<16x16x128xf32>
    %215 = arith.mulf %214, %213 : vector<16x16x128xf32>
    %216 = arith.addf %210, %215 : vector<16x16x128xf32>
    %c1_176 = arith.constant 1 : index
    %c2_177 = arith.constant 2 : index
    %c0_178 = arith.constant 0 : index
    %217 = vector.load %arg11[%c1_176, %c2_177, %c0_178] : memref<3x3x128xf32, #tpu.memory_space<vmem>>, vector<1x1x128xf32>
    %218 = vector.extract_strided_slice %211 {offsets = [1, 0, 0], sizes = [16, 16, 128], strides = [1, 1, 1]} : vector<18x16x128xf32> to vector<16x16x128xf32>
    %219 = vector.broadcast %217 : vector<1x1x128xf32> to vector<16x16x128xf32>
    %220 = arith.mulf %219, %218 : vector<16x16x128xf32>
    %221 = arith.addf %216, %220 : vector<16x16x128xf32>
    %c2_179 = arith.constant 2 : index
    %c2_180 = arith.constant 2 : index
    %c0_181 = arith.constant 0 : index
    %222 = vector.load %arg11[%c2_179, %c2_180, %c0_181] : memref<3x3x128xf32, #tpu.memory_space<vmem>>, vector<1x1x128xf32>
    %223 = vector.extract_strided_slice %211 {offsets = [2, 0, 0], sizes = [16, 16, 128], strides = [1, 1, 1]} : vector<18x16x128xf32> to vector<16x16x128xf32>
    %224 = vector.broadcast %222 : vector<1x1x128xf32> to vector<16x16x128xf32>
    %225 = arith.mulf %224, %223 : vector<16x16x128xf32>
    %226 = arith.addf %221, %225 : vector<16x16x128xf32>
    %c0_182 = arith.constant 0 : index
    %c0_183 = arith.constant 0 : index
    %227 = vector.load %arg12[%c0_182, %c0_183] : memref<1x128xf32, #tpu.memory_space<vmem>>, vector<1x128xf32>
    %228 = vector.shape_cast %227 : vector<1x128xf32> to vector<1x1x128xf32>
    %229 = vector.broadcast %228 : vector<1x1x128xf32> to vector<16x16x128xf32>
    %230 = arith.addf %226, %229 : vector<16x16x128xf32>
    %cst_184 = arith.constant 0.000000e+00 : f32
    %cst_185 = arith.constant 6.000000e+00 : f32
    %231 = vector.broadcast %cst_184 : f32 to vector<16x16x128xf32>
    %232 = arith.maximumf %231, %230 : vector<16x16x128xf32>
    %233 = vector.broadcast %cst_185 : f32 to vector<16x16x128xf32>
    %234 = arith.minimumf %233, %232 : vector<16x16x128xf32>
    %235 = vector.shape_cast %234 : vector<16x16x128xf32> to vector<256x128xf32>
    %236 = arith.truncf %235 : vector<256x128xf32> to vector<256x128xbf16>
    %c0_186 = arith.constant 0 : index
    %c0_187 = arith.constant 0 : index
    %237 = vector.load %arg13[%c0_186, %c0_187] : memref<128x32xbf16, #tpu.memory_space<vmem>>, vector<128x32xbf16>
    %cst_188 = arith.constant dense<0.000000e+00> : vector<256x32xf32>
    %238 = tpu.matmul %236, %237, %cst_188 {dimension_numbers = #tpu.dot_dimension_numbers<[1], [0], [0], [1], [0, 0, 1, 1], [], []>} : vector<256x128xbf16>, vector<128x32xbf16>, vector<256x32xf32> -> vector<256x32xf32>
    %c0_189 = arith.constant 0 : index
    %c0_190 = arith.constant 0 : index
    %239 = vector.load %arg14[%c0_189, %c0_190] : memref<1x32xf32, #tpu.memory_space<vmem>>, vector<1x32xf32>
    %240 = vector.broadcast %239 : vector<1x32xf32> to vector<256x32xf32>
    %241 = arith.addf %238, %240 : vector<256x32xf32>
    %242 = arith.addf %241, %159 : vector<256x32xf32>
    %243 = vector.shape_cast %242 : vector<256x32xf32> to vector<16x16x32xf32>
    %c0_191 = arith.constant 0 : index
    %c0_192 = arith.constant 0 : index
    %c0_193 = arith.constant 0 : index
    %c0_194 = arith.constant 0 : index
    %244 = vector.load %arg15[%c0_191, %c0_192, %c0_193, %c0_194] : memref<1x16x16x32xf32, #tpu.memory_space<vmem>>, vector<1x16x16x32xf32>
    %245 = vector.shape_cast %244 : vector<1x16x16x32xf32> to vector<16x16x32xf32>
    %246 = vector.shape_cast %243 : vector<16x16x32xf32> to vector<1x16x16x32xf32>
    tpu.vector_store %arg15[%c0_191, %c0_192, %c0_193, %c0_194], %246 {strides = array<i32>} : memref<1x16x16x32xf32, #tpu.memory_space<vmem>>, vector<1x16x16x32xf32>,
    return
  }
  func.func @transform_0(%arg0: i32) -> (i32, i32, i32, i32) {
    %c0_i32 = arith.constant 0 : i32
    %c0_i32_0 = arith.constant 0 : i32
    %c0_i32_1 = arith.constant 0 : i32
    %c0_i32_2 = arith.constant 0 : i32
    return %arg0, %c0_i32, %c0_i32_0, %c0_i32_1 : i32, i32, i32, i32
  }
  func.func @transform_1(%arg0: i32) -> (i32, i32) {
    %c0_i32 = arith.constant 0 : i32
    %c0_i32_0 = arith.constant 0 : i32
    %c0_i32_1 = arith.constant 0 : i32
    return %c0_i32, %c0_i32_0 : i32, i32
  }
  func.func @transform_2(%arg0: i32) -> (i32, i32) {
    %c0_i32 = arith.constant 0 : i32
    %c0_i32_0 = arith.constant 0 : i32
    %c0_i32_1 = arith.constant 0 : i32
    return %c0_i32, %c0_i32_0 : i32, i32
  }
  func.func @transform_3(%arg0: i32) -> (i32, i32) {
    %c0_i32 = arith.constant 0 : i32
    %c0_i32_0 = arith.constant 0 : i32
    %c0_i32_1 = arith.constant 0 : i32
    return %c0_i32, %c0_i32_0 : i32, i32
  }
  func.func @transform_4(%arg0: i32) -> (i32, i32) {
    %c0_i32 = arith.constant 0 : i32
    %c0_i32_0 = arith.constant 0 : i32
    %c0_i32_1 = arith.constant 0 : i32
    return %c0_i32, %c0_i32_0 : i32, i32
  }
  func.func @transform_5(%arg0: i32) -> (i32, i32) {
    %c0_i32 = arith.constant 0 : i32
    %c0_i32_0 = arith.constant 0 : i32
    %c0_i32_1 = arith.constant 0 : i32
    return %c0_i32, %c0_i32_0 : i32, i32
  }
  func.func @transform_6(%arg0: i32) -> (i32, i32) {
    %c0_i32 = arith.constant 0 : i32
    %c0_i32_0 = arith.constant 0 : i32
    %c0_i32_1 = arith.constant 0 : i32
    return %c0_i32, %c0_i32_0 : i32, i32
  }
  func.func @transform_7(%arg0: i32) -> (i32, i32) {
    %c0_i32 = arith.constant 0 : i32
    %c0_i32_0 = arith.constant 0 : i32
    %c0_i32_1 = arith.constant 0 : i32
    return %c0_i32, %c0_i32_0 : i32, i32
  }
  func.func @transform_8(%arg0: i32) -> (i32, i32) {
    %c0_i32 = arith.constant 0 : i32
    %c0_i32_0 = arith.constant 0 : i32
    %c0_i32_1 = arith.constant 0 : i32
    return %c0_i32, %c0_i32_0 : i32, i32
  }
  func.func @transform_9(%arg0: i32) -> (i32, i32) {
    %c0_i32 = arith.constant 0 : i32
    %c0_i32_0 = arith.constant 0 : i32
    %c0_i32_1 = arith.constant 0 : i32
    return %c0_i32, %c0_i32_0 : i32, i32
  }
  func.func @transform_10(%arg0: i32) -> (i32, i32, i32) {
    %c0_i32 = arith.constant 0 : i32
    %c0_i32_0 = arith.constant 0 : i32
    %c0_i32_1 = arith.constant 0 : i32
    %c0_i32_2 = arith.constant 0 : i32
    return %c0_i32, %c0_i32_0, %c0_i32_1 : i32, i32, i32
  }
  func.func @transform_11(%arg0: i32) -> (i32, i32) {
    %c0_i32 = arith.constant 0 : i32
    %c0_i32_0 = arith.constant 0 : i32
    %c0_i32_1 = arith.constant 0 : i32
    return %c0_i32, %c0_i32_0 : i32, i32
  }
  func.func @transform_12(%arg0: i32) -> (i32, i32) {
    %c0_i32 = arith.constant 0 : i32
    %c0_i32_0 = arith.constant 0 : i32
    %c0_i32_1 = arith.constant 0 : i32
    return %c0_i32, %c0_i32_0 : i32, i32
  }
  func.func @transform_13(%arg0: i32) -> (i32, i32) {
    %c0_i32 = arith.constant 0 : i32
    %c0_i32_0 = arith.constant 0 : i32
    %c0_i32_1 = arith.constant 0 : i32
    return %c0_i32, %c0_i32_0 : i32, i32
  }
  func.func @transform_14(%arg0: i32) -> (i32, i32, i32, i32) {
    %c0_i32 = arith.constant 0 : i32
    %c0_i32_0 = arith.constant 0 : i32
    %c0_i32_1 = arith.constant 0 : i32
    %c0_i32_2 = arith.constant 0 : i32
    return %arg0, %c0_i32, %c0_i32_0, %c0_i32_1 : i32, i32, i32, i32
  }
}

</mosaic_0001>

<bundles_post_ra>
// kernel: stage_module_forward.2
= control target key start
LH: loop header
LB: loop body
LE: loop exit
PB: predicated region body
PF: predicated region fallthrough
CT: control target
= control target key end

     0   :  { %s7373_s29 = smov 0   ;;  %s9890_s0 = inlined_call_operand.vmem [shape: f32[2,16,16,32], index: 0, kind: input, shape index: {}, may-alias: {0,14}]   ;;  %s9891_s1 = inlined_call_operand.vmem [shape: f32[32,32], index: 1, kind: input, shape index: {}]   ;;  %s9892_s2 = inlined_call_operand.vmem [shape: bf16[32,32], index: 2, kind: input, shape index: {}]   ;;  %s9893_s3 = inlined_call_operand.vmem [shape: f32[1,32], index: 3, kind: input, shape index: {}]   ;;  %s9894_s4 = inlined_call_operand.vmem [shape: bf16[32,32], index: 4, kind: input, shape index: {}]   ;;  %s9895_s5 = inlined_call_operand.vmem [shape: f32[1,32], index: 5, kind: input, shape index: {}]   ;;  %s9896_s6 = inlined_call_operand.vmem [shape: bf16[32,32], index: 6, kind: input, shape index: {}]   ;;  %s9897_s7 = inlined_call_operand.vmem [shape: f32[1,32], index: 7, kind: input, shape index: {}]   ;;  %s9898_s8 = inlined_call_operand.vmem [shape: bf16[32,128], index: 8, kind: input, shape index: {}]   ;;  %s9899_s9 = inlined_call_operand.vmem [shape: f32[1,128], index: 9, kind: input, shape index: {}]   ;;  %s9900_s10 = inlined_call_operand.vmem [shape: f32[3,3,128], index: 10, kind: input, shape index: {}]   ;;  %s9901_s11 = inlined_call_operand.vmem [shape: f32[1,128], index: 11, kind: input, shape index: {}]   ;;  %s9902_s12 = inlined_call_operand.vmem [shape: bf16[128,32], index: 12, kind: input, shape index: {}]   ;;  %s9903_s13 = inlined_call_operand.vmem [shape: f32[1,32], index: 13, kind: input, shape index: {}]   ;;  %s9904_s14 = inlined_call_operand.vmem [shape: f32[2,16,16,32], index: 14, kind: output, shape index: {}, may-alias: {0,14}]  }
   0x1 LB: > { %s5703_s30 = sadd.s32 4294967295, %s7295_s29   ;;  %p5707_p0 = scmp.ge.s32.totalorder %s7295_s29, 1  ;;  %s7295_s29 = sphi %s7373_s29, %s24_s29  }
   0x2   : > { %p412_p1 = scmp.lt.s32.totalorder %s7295_s29, 3 }
   0x4   : > { %p413_p2 = pnand %p5707_p0, %p412_p1 }
   0x6   : > { %416 = sbr.rel (%p413_p2) target bundleno = 2374 (0x946), region = 76 }
   0xd   : > { %v6998_v0 = vld [vmem:[%s9892_s2] sm:$0xff]   ;;  %p458_p3 = scmp.lt.s32.totalorder %s5703_s30, 1  ;;  %v6999_v1 = vld [vmem:[%s9892_s2 + $0x8] sm:$0xff]   ;;  %vm544_vm0 = vcmask 261120   ;;  %v471_v57 = vld [vmem:[%s9891_s1 + $0x10] sm:$0xff]  ;;  %vm2267_vm1 = vcmask 523264  }
   0xe   : > { %6289 = vmatprep.subr.bf16.mxu0 %v6998_v0  ;;  %6985 = vmatprep.subr.bf16.mxu1 %v6998_v0  ;;  %v7000_v2 = vld [vmem:[%s9894_s4] sm:$0xff]   ;;  %v7003_v11 = vld [vmem:[%s9896_s6 + $0x8] sm:$0xff]   ;;  %v472_v58 = vld [vmem:[%s9891_s1 + $0x18] sm:$0xff] }
   0xf   : > { %s10049_s30 = smov (!%p458_p3, %s5703_s30), 1  ;;  %6290 = vmatpush3.bf16.msra.mxu0 %v6998_v0  ;;  %6987 = vmatpush3.bf16.msra.mxu1 %v6998_v0  ;;  %v7002_v3 = vld [vmem:[%s9896_s6] sm:$0xff]   ;;  %v7001_v23 = vld [vmem:[%s9894_s4 + $0x8] sm:$0xff]   ;;  %v7533_v59 = vpack.c.bf16 %v472_v58, %v471_v57 }
  0x10   : > { %6291 = vmatprep.subr.bf16.mxu0 %v6999_v1  ;;  %6986 = vmatprep.subr.bf16.mxu1 %v6999_v1  ;;  %s5975_s21 = sshll.u32 %s10049_s30, 8  ;;  %v469_v54 = vld [vmem:[%s9891_s1] sm:$0xff]  ;;  %v470_v55 = vld [vmem:[%s9891_s1 + $0x8] sm:$0xff] }
  0x11   : > { %s7401_s26 = scalar_lea.vmem %s9890_s0, %s5975_s21  ;;  %v7521_v56 = vpack.c.bf16 %v470_v55, %v469_v54  ;;  %9953 = vst [vmem:[#allocation8_spill] sm:$0xff] %v7533_v59  ;;  %v7552_v61 = vld [vmem:[%s9893_s3] ss:$0 sm:$0xff]  ;;  %s9237_s20 = scalar_lea.vmem %s9904_s14, %s5975_s21 }
  0x12   : > { %v473_v4 = vld [vmem:[%s7401_s26] sm:$0xff]  ;;  %v474_v5 = vld [vmem:[%s7401_s26 + $0x8] sm:$0xff]  ;;  %v475_v9 = vld [vmem:[%s7401_s26 + $0x10] sm:$0xff] }
  0x13   : > { %v497_v6 = vld [vmem:[%s7401_s26 + $0xc0] sm:$0xff]  ;;  %6292 = vmatpush3.bf16.msra.mxu0 %v6999_v1  ;;  %6988 = vmatpush3.bf16.msra.mxu1 %v6999_v1  ;;  %v7406_v7 = vpack.c.bf16 %v474_v5, %v473_v4  ;;  %v498_v8 = vld [vmem:[%s7401_s26 + $0xc8] sm:$0xff]  ;;  %v476_v10 = vld [vmem:[%s7401_s26 + $0x18] sm:$0xff]  ;;  %9952 = vst [vmem:[#allocation7_spill] sm:$0xff] %v7521_v56 }
  0x14   : > { %v7414_v12 = vpack.c.bf16 %v498_v8, %v497_v6  ;;  %v7416_v13 = vpack.c.bf16 %v476_v10, %v475_v9  ;;  %v499_v14 = vld [vmem:[%s7401_s26 + $0xd0] sm:$0xff]  ;;  %v500_v15 = vld [vmem:[%s7401_s26 + $0xd8] sm:$0xff]  ;;  %v477_v16 = vld [vmem:[%s7401_s26 + $0x20] sm:$0xff]  ;;  %6325 = vmatprep.subr.bf16.mxu1 %v7000_v2  ;;  %6361 = vmatprep.subr.bf16.mxu0 %v7002_v3 }
  0x15   : > { %6293 = vmatprep.mubr.msk.bf16.mxu0 %vm544_vm0, %v7406_v7  ;;  %v7423_v17 = vpack.c.bf16 %v500_v15, %v499_v14  ;;  %v478_v18 = vld [vmem:[%s7401_s26 + $0x28] sm:$0xff]  ;;  %v501_v19 = vld [vmem:[%s7401_s26 + $0xe0] sm:$0xff]  ;;  %v479_v24 = vld [vmem:[%s7401_s26 + $0x30] sm:$0xff] }
  0x16   : > { %v502_v20 = vld [vmem:[%s7401_s26 + $0xe8] sm:$0xff]  ;;  %6317 = vmatprep.mubr.msk.bf16.mxu1 %vm544_vm0, %v7414_v12  ;;  %6294 = vmatmul.mubr.msk.bf16.vlgmr.msra.gmra.mrb[0].mxu0 %vm544_vm0, %v7416_v13  ;;  %v7432_v21 = vpack.c.bf16 %v478_v18, %v477_v16  ;;  %v480_v25 = vld [vmem:[%s7401_s26 + $0x38] sm:$0xff]  ;;  %v503_v26 = vld [vmem:[%s7401_s26 + $0xf0] sm:$0xff] }
  0x17   : > { %v7434_v22 = vpack.c.bf16 %v502_v20, %v501_v19  ;;  %6318 = vmatmul.mubr.msk.bf16.vlgmr.msra.gmra.mrb[0].mxu1 %vm544_vm0, %v7423_v17  ;;  %6362 = vmatpush3.bf16.msra.mxu0 %v7002_v3  ;;  %v504_v27 = vld [vmem:[%s7401_s26 + $0xf8] sm:$0xff]  ;;  %v481_v28 = vld [vmem:[%s7401_s26 + $0x40] sm:$0xff]  ;;  %v482_v29 = vld [vmem:[%s7401_s26 + $0x48] sm:$0xff]  ;;  %v508_v30 = vpack.c.bf16 %v480_v25, %v479_v24 }
  0x18   : > { %6297 = vmatprep.mubr.msk.bf16.mxu0 %vm544_vm0, %v7432_v21  ;;  %6326 = vmatpush3.bf16.msra.mxu1 %v7000_v2  ;;  %v7451_v31 = vpack.c.bf16 %v504_v27, %v503_v26  ;;  %v509_v32 = vpack.c.bf16 %v482_v29, %v481_v28  ;;  %v483_v33 = vld [vmem:[%s7401_s26 + $0x50] sm:$0xff]  ;;  %v484_v34 = vld [vmem:[%s7401_s26 + $0x58] sm:$0xff]  ;;  %v485_v35 = vld [vmem:[%s7401_s26 + $0x60] sm:$0xff] }
  0x19   : > { %6321 = vmatprep.mubr.msk.bf16.mxu1 %vm544_vm0, %v7434_v22  ;;  %6363 = vmatprep.subr.bf16.mxu0 %v7003_v11  ;;  %v486_v36 = vld [vmem:[%s7401_s26 + $0x68] sm:$0xff]  ;;  %v510_v37 = vpack.c.bf16 %v484_v34, %v483_v33  ;;  %v487_v39 = vld [vmem:[%s7401_s26 + $0x70] sm:$0xff]  ;;  %v488_v40 = vld [vmem:[%s7401_s26 + $0x78] sm:$0xff] }
  0x1a   : > { %6327 = vmatprep.subr.bf16.mxu1 %v7001_v23  ;;  %v511_v38 = vpack.c.bf16 %v486_v36, %v485_v35  ;;  %v489_v41 = vld [vmem:[%s7401_s26 + $0x80] sm:$0xff]  ;;  %v490_v42 = vld [vmem:[%s7401_s26 + $0x88] sm:$0xff]  ;;  %v512_v43 = vpack.c.bf16 %v488_v40, %v487_v39  ;;  %v491_v45 = vld [vmem:[%s7401_s26 + $0x90] sm:$0xff] }
  0x1b   : > { %6364 = vmatpush3.bf16.msra.mxu0 %v7003_v11  ;;  %v513_v44 = vpack.c.bf16 %v490_v42, %v489_v41  ;;  %v492_v46 = vld [vmem:[%s7401_s26 + $0x98] sm:$0xff]  ;;  %v493_v47 = vld [vmem:[%s7401_s26 + $0xa0] sm:$0xff]  ;;  %v494_v48 = vld [vmem:[%s7401_s26 + $0xa8] sm:$0xff] }
  0x1c   : > { %6328 = vmatpush3.bf16.msra.mxu1 %v7001_v23  ;;  %v514_v49 = vpack.c.bf16 %v492_v46, %v491_v45  ;;  %v515_v50 = vpack.c.bf16 %v494_v48, %v493_v47  ;;  %v495_v51 = vld [vmem:[%s7401_s26 + $0xb0] sm:$0xff]  ;;  %v496_v52 = vld [vmem:[%s7401_s26 + $0xb8] sm:$0xff]  ;;  %6850 = vmatprep.subr.bf16.mxu0 %v7521_v56 }
  0x1d   : > { %v516_v53 = vpack.c.bf16 %v496_v52, %v495_v51  ;;  %6842 = vmatprep.subr.bf16.mxu1 %v7521_v56 }
  0x1e   : > { %6298 = vmatmul.mubr.msk.bf16.gmra.mrb[4].mxu0 %vm544_vm0, %v508_v30 }
  0x1f   : > { %6322 = vmatmul.mubr.msk.bf16.gmra.mrb[4].mxu1 %vm544_vm0, %v7451_v31  ;;  %6301 = vmatprep.mubr.msk.bf16.mxu0 %vm544_vm0, %v509_v32 }
  0x20   : > { %6329 = vmatprep.mubr.msk.bf16.mxu1 %vm544_vm0, %v7406_v7 }
  0x26   : > { %6302 = vmatmul.mubr.msk.bf16.gmra.mrb[8].mxu0 %vm544_vm0, %v510_v37 }
  0x27   : > { %6330 = vmatmul.mubr.msk.bf16.vlgmr.msra.gmra.mrb[8].mxu1 %vm544_vm0, %v7416_v13  ;;  %6305 = vmatprep.mubr.msk.bf16.mxu0 %vm544_vm0, %v511_v38 }
  0x28   : > { %6333 = vmatprep.mubr.msk.bf16.mxu1 %vm544_vm0, %v7432_v21  ;;  %6844 = vmatpush3.bf16.msra.mxu1 %v7521_v56 }
  0x29   : > { %6846 = vmatprep.subr.bf16.mxu1 %v7533_v59 }
  0x2c   : > { %6848 = vmatpush3.bf16.msra.mxu1 %v7533_v59 }
  0x2d   : > { %6858 = vmatprep.subr.bf16.mxu1 %v7521_v56 }
  0x2e   : > { %6306 = vmatmul.mubr.msk.bf16.gmra.mrb[12].mxu0 %vm544_vm0, %v512_v43 }
  0x2f   : > { %6334 = vmatmul.mubr.msk.bf16.gmra.mrb[12].mxu1 %vm544_vm0, %v508_v30  ;;  %6309 = vmatprep.mubr.msk.bf16.mxu0 %vm544_vm0, %v513_v44 }
  0x30   : > { %6337 = vmatprep.mubr.msk.bf16.mxu1 %vm544_vm0, %v509_v32 }
  0x36   : > { %6310 = vmatmul.mubr.msk.bf16.gmra.mrb[16].mxu0 %vm544_vm0, %v514_v49 }
  0x37   : > { %6338 = vmatmul.mubr.msk.bf16.gmra.mrb[16].mxu1 %vm544_vm0, %v510_v37  ;;  %6313 = vmatprep.mubr.msk.bf16.mxu0 %vm544_vm0, %v515_v50 }
  0x38   : > { %6341 = vmatprep.mubr.msk.bf16.mxu1 %vm544_vm0, %v511_v38 }
  0x3e   : > { %6314 = vmatmul.mubr.msk.bf16.gmra.mrb[20].mxu0 %vm544_vm0, %v516_v53 }
  0x3f   : > { %6342 = vmatmul.mubr.msk.bf16.gmra.mrb[20].mxu1 %vm544_vm0, %v512_v43  ;;  %6365 = vmatprep.mubr.msk.bf16.mxu0 %vm544_vm0, %v7406_v7 }
  0x40   : > { %6345 = vmatprep.mubr.msk.bf16.mxu1 %vm544_vm0, %v513_v44 }
  0x46   : > { %6366 = vmatmul.mubr.msk.bf16.vlgmr.msra.gmra.mrb[24].mxu0 %vm544_vm0, %v7416_v13 }
  0x47   : > { %6346 = vmatmul.mubr.msk.bf16.gmra.mrb[24].mxu1 %vm544_vm0, %v514_v49  ;;  %6369 = vmatprep.mubr.msk.bf16.mxu0 %vm544_vm0, %v7432_v21 }
  0x48   : > { %6349 = vmatprep.mubr.msk.bf16.mxu1 %vm544_vm0, %v515_v50  ;;  %6852 = vmatpush3.bf16.msra.mxu0 %v7521_v56 }
  0x49   : > { %6854 = vmatprep.subr.bf16.mxu0 %v7533_v59 }
  0x4c   : > { %6856 = vmatpush3.bf16.msra.mxu0 %v7533_v59 }
  0x4e   : > { %6370 = vmatmul.mubr.msk.bf16.gmra.mrb[28].mxu0 %vm544_vm0, %v508_v30  ;;  %v7621_v30 = vld [vmem:[%s9895_s5] ss:$0 sm:$0xff] }
  0x4f   : > { %6350 = vmatmul.mubr.msk.bf16.gmra.mrb[28].mxu1 %vm544_vm0, %v516_v53  ;;  %6373 = vmatprep.mubr.msk.bf16.mxu0 %vm544_vm0, %v509_v32 }
  0x50   : > { %6353 = vmatprep.mubr.msk.bf16.mxu1 %vm544_vm0, %v7414_v12 }
  0x56   : > { %6374 = vmatmul.mubr.msk.bf16.gmra.mrb[32].mxu0 %vm544_vm0, %v510_v37 }
  0x57   : > { %6354 = vmatmul.mubr.msk.bf16.gmra.mrb[32].mxu1 %vm544_vm0, %v7423_v17  ;;  %6377 = vmatprep.mubr.msk.bf16.mxu0 %vm544_vm0, %v511_v38 }
  0x58   : > { %6357 = vmatprep.mubr.msk.bf16.mxu1 %vm544_vm0, %v7434_v22 }
  0x5e   : > { %6378 = vmatmul.mubr.msk.bf16.gmra.mrb[36].mxu0 %vm544_vm0, %v512_v43 }
  0x5f   : > { %6358 = vmatmul.mubr.msk.bf16.gmra.mrb[36].mxu1 %vm544_vm0, %v7451_v31  ;;  %6381 = vmatprep.mubr.msk.bf16.mxu0 %vm544_vm0, %v513_v44 }
  0x66   : > { %6382 = vmatmul.mubr.msk.bf16.gmra.mrb[40].mxu0 %vm544_vm0, %v514_v49 }
  0x67   : > { %6385 = vmatprep.mubr.msk.bf16.mxu0 %vm544_vm0, %v515_v50 }
  0x6e   : > { %6386 = vmatmul.mubr.msk.bf16.gmra.mrb[44].mxu0 %vm544_vm0, %v516_v53 }
  0x6f   : > { %6389 = vmatprep.mubr.msk.bf16.mxu0 %vm544_vm0, %v7414_v12 }
  0x76   : > { %6390 = vmatmul.mubr.msk.bf16.gmra.mrb[48].mxu0 %vm544_vm0, %v7423_v17 }
  0x77   : > { %6393 = vmatprep.mubr.msk.bf16.mxu0 %vm544_vm0, %v7434_v22 }
  0x7e   : > { %6394 = vmatmul.mubr.msk.bf16.gmra.mrb[52].mxu0 %vm544_vm0, %v7451_v31 }
  0xe9   : > { %v6295_v60 = vpop.f32.mrb[0].mxu0 }
  0xea   : > { %v7555_v62 = vadd.f32 %v6295_v60, %v7552_v61  ;;  %v7557_v63 = vpop.f32.mrb[0].mxu1  ;;  %v627_v0 = vpop.f32.mrb[1].mxu0 }
  0xeb   : > { %v7560_v1 = vadd.f32 %v7552_v61, %v627_v0  ;;  %v7562_v2 = vpop.f32.mrb[1].mxu1  ;;  %v6296_v3 = vpop.f32.mrb[2].mxu0 }
  0xec   : > { %v7564_v4 = vpop.f32.mrb[2].mxu1  ;;  %v630_v5 = vpop.f32.mrb[3].mxu0  ;;  %v7569_v7 = vadd.f32 %v6296_v3, %v7552_v61  ;;  %v1124_v10 = vmul.f32 %v7555_v62, %v7555_v62 }
  0xed   : > { %v1122_v6 = vmul.f32 %v7560_v1, %v7560_v1  ;;  %v7572_v8 = vadd.f32 %v7552_v61, %v630_v5  ;;  %v7574_v9 = vpop.f32.mrb[3].mxu1 }
  0xee   : > { %v1125_v12 = vmul.f32 %v7569_v7, %v7569_v7 }
  0xef   : > { %v1123_v11 = vmul.f32 %v7572_v8, %v7572_v8  ;;  %6405 = vmatprep.mubr.msk.f32.mxu1 %vm544_vm0, %v1122_v6 }
  0xf1   : > { %v6299_v13 = vpop.f32.mrb[4].mxu0  ;;  %6406 = vmatmul.mubr.msk.f32.vlgmr.msra.gmra.mrb[40].mxu1 %vm544_vm0, %v1123_v11 }
  0xf2   : > { %v7585_v14 = vadd.f32 %v6299_v13, %v7552_v61  ;;  %v7587_v15 = vpop.f32.mrb[4].mxu1  ;;  %v643_v16 = vpop.f32.mrb[5].mxu0  ;;  %6408 = vmatprep.mubr.msk.f32.mxu1 %vm544_vm0, %v1124_v10  ;;  %6860 = vmatpush3.bf16.msra.mxu1 %v7521_v56 }
  0xf3   : > { %v7592_v17 = vadd.f32 %v7552_v61, %v643_v16  ;;  %v7594_v18 = vpop.f32.mrb[5].mxu1  ;;  %v6300_v19 = vpop.f32.mrb[6].mxu0  ;;  %6862 = vmatprep.subr.bf16.mxu1 %v7533_v59 }
  0xf4   : > { %v7597_v20 = vpop.f32.mrb[6].mxu1  ;;  %v646_v21 = vpop.f32.mrb[7].mxu0  ;;  %v7602_v23 = vadd.f32 %v6300_v19, %v7552_v61  ;;  %v1128_v26 = vmul.f32 %v7585_v14, %v7585_v14 }
  0xf5   : > { %v1126_v22 = vmul.f32 %v7592_v17, %v7592_v17  ;;  %v7605_v24 = vadd.f32 %v7552_v61, %v646_v21  ;;  %v7607_v25 = vpop.f32.mrb[7].mxu1  ;;  %6409 = vmatmul.mubr.msk.f32.gmra.mrb[42].mxu1 %vm544_vm0, %v1125_v12 }
  0xf6   : > { %6864 = vmatpush3.bf16.msra.mxu1 %v7533_v59  ;;  %v1129_v28 = vmul.f32 %v7602_v23, %v7602_v23 }
  0xf7   : > { %v1127_v27 = vmul.f32 %v7605_v24, %v7605_v24  ;;  %6411 = vmatprep.mubr.msk.f32.mxu1 %vm544_vm0, %v1126_v22 }
  0xf9   : > { %v6303_v29 = vpop.f32.mrb[8].mxu0  ;;  %6412 = vmatmul.mubr.msk.f32.gmra.mrb[44].mxu1 %vm544_vm0, %v1127_v27 }
  0xfa   : > { %v7625_v31 = vadd.f32 %v6303_v29, %v7552_v61  ;;  %v6331_v32 = vpop.f32.mrb[8].mxu1  ;;  %v659_v33 = vpop.f32.mrb[9].mxu0  ;;  %6414 = vmatprep.mubr.msk.f32.mxu1 %vm544_vm0, %v1128_v26 }
  0xfb   : > { %v7629_v34 = vadd.f32 %v7552_v61, %v659_v33  ;;  %v811_v35 = vpop.f32.mrb[9].mxu1  ;;  %v6304_v36 = vpop.f32.mrb[10].mxu0  ;;  %v7635_v40 = vadd.f32 %v6331_v32, %v7621_v30 }
  0xfc   : > { %v7632_v37 = vadd.f32 %v7621_v30, %v811_v35  ;;  %v6332_v38 = vpop.f32.mrb[10].mxu1  ;;  %v662_v39 = vpop.f32.mrb[11].mxu0  ;;  %v7640_v42 = vadd.f32 %v6304_v36, %v7552_v61  ;;  %v1132_v45 = vmul.f32 %v7625_v31, %v7625_v31 }
  0xfd   : > { %v1130_v41 = vmul.f32 %v7629_v34, %v7629_v34  ;;  %v7643_v43 = vadd.f32 %v7552_v61, %v662_v39  ;;  %v814_v44 = vpop.f32.mrb[11].mxu1  ;;  %6415 = vmatmul.mubr.msk.f32.gmra.mrb[46].mxu1 %vm544_vm0, %v1129_v28  ;;  %v7657_v49 = vadd.f32 %v6332_v38, %v7621_v30  ;;  %v1541_v51 = vmul.f32 %v7635_v40, %v7635_v40 }
  0xfe   : > { %v1539_v46 = vmul.f32 %v7632_v37, %v7632_v37  ;;  %v7651_v47 = vadd.f32 %v7621_v30, %v814_v44  ;;  %v1133_v52 = vmul.f32 %v7640_v42, %v7640_v42 }
  0xff   : > { %v1131_v48 = vmul.f32 %v7643_v43, %v7643_v43  ;;  %6417 = vmatprep.mubr.msk.f32.mxu1 %vm544_vm0, %v1130_v41  ;;  %v1542_v3 = vmul.f32 %v7657_v49, %v7657_v49 }
 0x100   : > { %v1540_v50 = vmul.f32 %v7651_v47, %v7651_v47  ;;  %6461 = vmatprep.mubr.msk.f32.mxu0 %vm544_vm0, %v1539_v46 }
 0x101   : > { %v6307_v53 = vpop.f32.mrb[12].mxu0  ;;  %6418 = vmatmul.mubr.msk.f32.gmra.mrb[48].mxu1 %vm544_vm0, %v1131_v48 }
 0x102   : > { %v7668_v54 = vadd.f32 %v6307_v53, %v7552_v61  ;;  %v6335_v55 = vpop.f32.mrb[12].mxu1  ;;  %6462 = vmatmul.mubr.msk.f32.vlgmr.msra.gmra.mrb[56].mxu0 %vm544_vm0, %v1540_v50  ;;  %v675_v57 = vpop.f32.mrb[13].mxu0  ;;  %6420 = vmatprep.mubr.msk.f32.mxu1 %vm544_vm0, %v1132_v45 }
 0x103   : > { %v7673_v58 = vadd.f32 %v7552_v61, %v675_v57  ;;  %v827_v60 = vpop.f32.mrb[13].mxu1  ;;  %6464 = vmatprep.mubr.msk.f32.mxu0 %vm544_vm0, %v1541_v51  ;;  %v6308_v0 = vpop.f32.mrb[14].mxu0  ;;  %v7682_v11 = vadd.f32 %v6335_v55, %v7621_v30 }
 0x104   : > { %v7679_v5 = vadd.f32 %v7621_v30, %v827_v60  ;;  %v6336_v6 = vpop.f32.mrb[14].mxu1  ;;  %v678_v10 = vpop.f32.mrb[15].mxu0  ;;  %v7687_v13 = vadd.f32 %v6308_v0, %v7552_v61  ;;  %v1136_v21 = vmul.f32 %v7668_v54, %v7668_v54 }
 0x105   : > { %v1134_v12 = vmul.f32 %v7673_v58, %v7673_v58  ;;  %v7690_v16 = vadd.f32 %v7552_v61, %v678_v10  ;;  %v830_v19 = vpop.f32.mrb[15].mxu1  ;;  %6421 = vmatmul.mubr.msk.f32.gmra.mrb[50].mxu1 %vm544_vm0, %v1133_v52  ;;  %v7705_v28 = vadd.f32 %v6336_v6, %v7621_v30  ;;  %v1545_v32 = vmul.f32 %v7682_v11, %v7682_v11 }
 0x106   : > { %v1543_v22 = vmul.f32 %v7679_v5, %v7679_v5  ;;  %v7698_v26 = vadd.f32 %v7621_v30, %v830_v19  ;;  %6465 = vmatmul.mubr.msk.f32.gmra.mrb[58].mxu0 %vm544_vm0, %v1542_v3  ;;  %v1137_v33 = vmul.f32 %v7687_v13, %v7687_v13 }
 0x107   : > { %v1135_v27 = vmul.f32 %v7690_v16, %v7690_v16  ;;  %6423 = vmatprep.mubr.msk.f32.mxu1 %vm544_vm0, %v1134_v12  ;;  %v1546_v46 = vmul.f32 %v7705_v28, %v7705_v28 }
 0x108   : > { %v1544_v29 = vmul.f32 %v7698_v26, %v7698_v26  ;;  %6467 = vmatprep.mubr.msk.f32.mxu0 %vm544_vm0, %v1543_v22 }
 0x109   : > { %v6311_v35 = vpop.f32.mrb[16].mxu0  ;;  %6424 = vmatmul.mubr.msk.f32.gmra.mrb[52].mxu1 %vm544_vm0, %v1135_v27 }
 0x10a   : > { %v7716_v36 = vadd.f32 %v6311_v35, %v7552_v61  ;;  %v6339_v38 = vpop.f32.mrb[16].mxu1  ;;  %6468 = vmatmul.mubr.msk.f32.gmra.mrb[60].mxu0 %vm544_vm0, %v1544_v29  ;;  %v691_v39 = vpop.f32.mrb[17].mxu0  ;;  %6426 = vmatprep.mubr.msk.f32.mxu1 %vm544_vm0, %v1136_v21 }
 0x10b   : > { %v7721_v41 = vadd.f32 %v7552_v61, %v691_v39  ;;  %v843_v44 = vpop.f32.mrb[17].mxu1  ;;  %6470 = vmatprep.mubr.msk.f32.mxu0 %vm544_vm0, %v1545_v32  ;;  %v6312_v45 = vpop.f32.mrb[18].mxu0  ;;  %v7730_v52 = vadd.f32 %v6339_v38, %v7621_v30 }
 0x10c   : > { %v7727_v48 = vadd.f32 %v7621_v30, %v843_v44  ;;  %v6340_v50 = vpop.f32.mrb[18].mxu1  ;;  %v694_v51 = vpop.f32.mrb[19].mxu0  ;;  %v7735_v55 = vadd.f32 %v6312_v45, %v7552_v61  ;;  %v1140_v0 = vmul.f32 %v7716_v36, %v7716_v36 }
 0x10d   : > { %v1138_v53 = vmul.f32 %v7721_v41, %v7721_v41  ;;  %v7738_v57 = vadd.f32 %v7552_v61, %v694_v51  ;;  %v846_v60 = vpop.f32.mrb[19].mxu1  ;;  %6427 = vmatmul.mubr.msk.f32.gmra.mrb[54].mxu1 %vm544_vm0, %v1137_v33  ;;  %v7753_v12 = vadd.f32 %v6340_v50, %v7621_v30  ;;  %v1549_v21 = vmul.f32 %v7730_v52, %v7730_v52 }
 0x10e   : > { %v1547_v3 = vmul.f32 %v7727_v48, %v7727_v48  ;;  %v7746_v6 = vadd.f32 %v7621_v30, %v846_v60  ;;  %6471 = vmatmul.mubr.msk.f32.gmra.mrb[62].mxu0 %vm544_vm0, %v1546_v46  ;;  %v1141_v22 = vmul.f32 %v7735_v55, %v7735_v55 }
 0x10f   : > { %v1139_v10 = vmul.f32 %v7738_v57, %v7738_v57  ;;  %6429 = vmatprep.mubr.msk.f32.mxu1 %vm544_vm0, %v1138_v53  ;;  %v1550_v44 = vmul.f32 %v7753_v12, %v7753_v12 }
 0x110   : > { %v1548_v19 = vmul.f32 %v7746_v6, %v7746_v6  ;;  %6473 = vmatprep.mubr.msk.f32.mxu0 %vm544_vm0, %v1547_v3 }
 0x111   : > { %v6315_v27 = vpop.f32.mrb[20].mxu0  ;;  %6430 = vmatmul.mubr.msk.f32.gmra.mrb[56].mxu1 %vm544_vm0, %v1139_v10 }
 0x112   : > { %v7764_v29 = vadd.f32 %v6315_v27, %v7552_v61  ;;  %v6343_v32 = vpop.f32.mrb[20].mxu1  ;;  %6474 = vmatmul.mubr.msk.f32.gmra.mrb[64].mxu0 %vm544_vm0, %v1548_v19  ;;  %v707_v33 = vpop.f32.mrb[21].mxu0  ;;  %6432 = vmatprep.mubr.msk.f32.mxu1 %vm544_vm0, %v1140_v0 }
 0x113   : > { %v7769_v35 = vadd.f32 %v7552_v61, %v707_v33  ;;  %v859_v38 = vpop.f32.mrb[21].mxu1  ;;  %6476 = vmatprep.mubr.msk.f32.mxu0 %vm544_vm0, %v1549_v21  ;;  %v6316_v39 = vpop.f32.mrb[22].mxu0  ;;  %v7778_v51 = vadd.f32 %v6343_v32, %v7621_v30  ;;  %v7807_v32 = vadd.f32 %v7552_v61, %v7562_v2 }
 0x114   : > { %9954 = vst [vmem:[#allocation9_spill] sm:$0xff] %v7764_v29  ;;  %v7775_v45 = vadd.f32 %v7621_v30, %v859_v38  ;;  %v6344_v46 = vpop.f32.mrb[22].mxu1  ;;  %v710_v50 = vpop.f32.mrb[23].mxu0  ;;  %v7783_v60 = vadd.f32 %v6316_v39, %v7552_v61  ;;  %v1144_v10 = vmul.f32 %v7764_v29, %v7764_v29 }
 0x115   : > { %9955 = vst [vmem:[#allocation10_spill] sm:$0xff] %v7778_v51  ;;  %v1142_v53 = vmul.f32 %v7769_v35, %v7769_v35  ;;  %v7786_v0 = vadd.f32 %v7552_v61, %v710_v50  ;;  %v862_v3 = vpop.f32.mrb[23].mxu1  ;;  %6433 = vmatmul.mubr.msk.f32.gmra.mrb[58].mxu1 %vm544_vm0, %v1141_v22  ;;  %v7803_v22 = vld [vmem:[%s9897_s7] ss:$0 sm:$0xff]  ;;  %9956 = vst [vmem:[#allocation11_spill] sm:$0xff] %v7807_v32  ;;  %v7810_v33 = vadd.f32 %v6344_v46, %v7621_v30 }
 0x116   : > { %v1551_v19 = vmul.f32 %v7775_v45, %v7775_v45  ;;  %v7794_v21 = vadd.f32 %v7621_v30, %v862_v3  ;;  %6477 = vmatmul.mubr.msk.f32.gmra.mrb[66].mxu0 %vm544_vm0, %v1550_v44  ;;  %v1553_v39 = vmul.f32 %v7778_v51, %v7778_v51  ;;  %v1145_v44 = vmul.f32 %v7783_v60, %v7783_v60 }
 0x117   : > { %v1143_v27 = vmul.f32 %v7786_v0, %v7786_v0  ;;  %6435 = vmatprep.mubr.msk.f32.mxu1 %vm544_vm0, %v1142_v53  ;;  %v7825_v3 = vadd.f32 %v7557_v63, %v7552_v61  ;;  %v1554_v63 = vmul.f32 %v7810_v33, %v7810_v33 }
 0x118   : > { %v1552_v38 = vmul.f32 %v7794_v21, %v7794_v21  ;;  %6479 = vmatprep.mubr.msk.f32.mxu0 %vm544_vm0, %v1551_v19  ;;  %v7829_v19 = vadd.f32 %v7552_v61, %v7574_v9 }
 0x119   : > { %6436 = vmatmul.mubr.msk.f32.gmra.mrb[60].mxu1 %vm544_vm0, %v1143_v27  ;;  %v6367_v50 = vpop.f32.mrb[24].mxu0  ;;  %9957 = vst [vmem:[#allocation12_spill] sm:$0xff] %v7825_v3 }
 0x11a   : > { %v6347_v53 = vpop.f32.mrb[24].mxu1  ;;  %6480 = vmatmul.mubr.msk.f32.gmra.mrb[68].mxu0 %vm544_vm0, %v1552_v38  ;;  %6438 = vmatprep.mubr.msk.f32.mxu1 %vm544_vm0, %v1144_v10  ;;  %v1004_v2 = vadd.f32 %v6367_v50, %v7803_v22  ;;  %v995_v46 = vpop.f32.mrb[25].mxu0  ;;  %9958 = vst [vmem:[#allocation13_spill] sm:$0xff] %v7829_v19  ;;  %v1146_v50 = vmul.f32 %v7807_v32, %v7807_v32 }
 0x11b   : > { %v7832_v59 = vadd.f32 %v6347_v53, %v7621_v30  ;;  %v875_v27 = vpop.f32.mrb[25].mxu1  ;;  %6482 = vmatprep.mubr.msk.f32.mxu0 %vm544_vm0, %v1553_v39  ;;  %v996_v38 = vadd.f32 %v7803_v22, %v995_v46  ;;  %v6368_v10 = vpop.f32.mrb[26].mxu0  ;;  %v7847_v39 = vadd.f32 %v7564_v4, %v7552_v61  ;;  %v1147_v4 = vmul.f32 %v7829_v19, %v7829_v19 }
 0x11c   : > { %v7841_v56 = vadd.f32 %v7621_v30, %v875_v27  ;;  %v6348_v9 = vpop.f32.mrb[26].mxu1  ;;  %2022 = vst.msk [vmem:[#allocation5 + $0x10] sm:$0xff] %vm544_vm0, %v1004_v2  ;;  %v1007_v53 = vadd.f32 %v6368_v10, %v7803_v22  ;;  %v998_v51 = vpop.f32.mrb[27].mxu0 }
 0x11d   : > { %9959 = vst [vmem:[#allocation14_spill] sm:$0xff] %v7832_v59  ;;  %9961 = vst [vmem:[#allocation16_spill] sm:$0xff] %v7847_v39  ;;  %v878_v46 = vpop.f32.mrb[27].mxu1  ;;  %6439 = vmatmul.mubr.msk.f32.gmra.mrb[62].mxu1 %vm544_vm0, %v1145_v44  ;;  %v999_v32 = vadd.f32 %v7803_v22, %v998_v51  ;;  %v7855_v29 = vadd.f32 %v6348_v9, %v7621_v30  ;;  %v1557_v51 = vmul.f32 %v7832_v59, %v7832_v59 }
 0x11e   : > { %9960 = vst [vmem:[#allocation15_spill] sm:$0xff] %v7841_v56  ;;  %2020 = vst.msk [vmem:[#allocation5] sm:$0xff] %vm544_vm0, %v996_v38  ;;  %v1555_v27 = vmul.f32 %v7841_v56, %v7841_v56  ;;  %v7858_v2 = vadd.f32 %v7621_v30, %v878_v46  ;;  %6483 = vmatmul.mubr.msk.f32.gmra.mrb[70].mxu0 %vm544_vm0, %v1554_v63  ;;  %6441 = vmatprep.mubr.msk.f32.mxu1 %vm544_vm0, %v1146_v50 }
 0x11f   : > { %9962 = vst [vmem:[#allocation17_spill] sm:$0xff] %v7855_v29  ;;  %2023 = vst.msk [vmem:[#allocation5 + $0x18] sm:$0xff] %vm544_vm0, %v1007_v53  ;;  %v1148_v44 = vmul.f32 %v7825_v3, %v7825_v3  ;;  %v7872_v38 = vadd.f32 %v7552_v61, %v7594_v18  ;;  %v1149_v63 = vmul.f32 %v7847_v39, %v7847_v39 }
 0x120   : > { %9963 = vst [vmem:[#allocation18_spill] sm:$0xff] %v7858_v2  ;;  %2021 = vst.msk [vmem:[#allocation5 + $0x8] sm:$0xff] %vm544_vm0, %v999_v32  ;;  %v1556_v10 = vmul.f32 %v7858_v2, %v7858_v2  ;;  %6485 = vmatprep.mubr.msk.f32.mxu0 %vm544_vm0, %v1555_v27  ;;  %v1558_v32 = vmul.f32 %v7855_v29, %v7855_v29  ;;  %v7887_v46 = vadd.f32 %v7587_v15, %v7552_v61 }
 0x121   : > { %9964 = vst [vmem:[#allocation19_spill] sm:$0xff] %v7872_v38  ;;  %6442 = vmatmul.mubr.msk.f32.gmra.mrb[64].mxu1 %vm544_vm0, %v1147_v4  ;;  %v6371_v50 = vpop.f32.mrb[28].mxu0  ;;  %v7891_v27 = vadd.f32 %v7552_v61, %v7607_v25 }
 0x122   : > { %v6351_v9 = vpop.f32.mrb[28].mxu1  ;;  %6486 = vmatmul.mubr.msk.f32.gmra.mrb[72].mxu0 %vm544_vm0, %v1556_v10  ;;  %6444 = vmatprep.mubr.msk.f32.mxu1 %vm544_vm0, %v1148_v44  ;;  %v1020_v18 = vadd.f32 %v6371_v50, %v7803_v22  ;;  %v1011_v53 = vpop.f32.mrb[29].mxu0  ;;  %9965 = vst [vmem:[#allocation20_spill] sm:$0xff] %v7887_v46  ;;  %v1150_v50 = vmul.f32 %v7872_v38, %v7872_v38 }
 0x123   : > { %v7894_v4 = vadd.f32 %v6351_v9, %v7621_v30  ;;  %v891_v59 = vpop.f32.mrb[29].mxu1  ;;  %6488 = vmatprep.mubr.msk.f32.mxu0 %vm544_vm0, %v1557_v51  ;;  %v1012_v10 = vadd.f32 %v7803_v22, %v1011_v53  ;;  %v6372_v44 = vpop.f32.mrb[30].mxu0  ;;  %v2069_v29 = vld [vmem:[#allocation5 + $0x10] sm:$0xff]  ;;  %v7908_v51 = vadd.f32 %v7597_v20, %v7552_v61 }
 0x124   : > { %v7901_v15 = vadd.f32 %v7621_v30, %v891_v59  ;;  %v6352_v3 = vpop.f32.mrb[30].mxu1  ;;  %2026 = vst.msk [vmem:[#allocation5 + $0x30] sm:$0xff] %vm544_vm0, %v1020_v18  ;;  %v1023_v25 = vadd.f32 %v6372_v44, %v7803_v22  ;;  %v1014_v9 = vpop.f32.mrb[31].mxu0  ;;  %v2370_v56 = vsel %vm544_vm0, %v2069_v29, 0.0 }
 0x125   : > { %9966 = vst [vmem:[#allocation21_spill] sm:$0xff] %v7894_v4  ;;  %v2068_v39 = vld [vmem:[#allocation5] sm:$0xff]  ;;  %9967 = vst [vmem:[#allocation22_spill] sm:$0xff] %v7908_v51  ;;  %v7911_v53 = vadd.f32 %v6352_v3, %v7621_v30  ;;  %v894_v38 = vpop.f32.mrb[31].mxu1  ;;  %6445 = vmatmul.mubr.msk.f32.gmra.mrb[66].mxu1 %vm544_vm0, %v1149_v63  ;;  %v1015_v59 = vadd.f32 %v7803_v22, %v1014_v9  ;;  %v1561_v63 = vmul.f32 %v7894_v4, %v7894_v4 }
 0x126   : > { %2024 = vst.msk [vmem:[#allocation5 + $0x20] sm:$0xff] %vm544_vm0, %v1012_v10  ;;  %v7916_v18 = vpack.c.bf16 %v2069_v29, %v2068_v39  ;;  %v2576_v44 = vld [vmem:[#allocation5 + $0x18] sm:$0xff]  ;;  %v1559_v2 = vmul.f32 %v7901_v15, %v7901_v15  ;;  %v7921_v19 = vadd.f32 %v7621_v30, %v894_v38  ;;  %6489 = vmatmul.mubr.msk.f32.gmra.mrb[74].mxu0 %vm544_vm0, %v1558_v32  ;;  %2027 = vst.msk [vmem:[#allocation5 + $0x38] sm:$0xff] %vm544_vm0, %v1023_v25 }
 0x127   : > { %9968 = vst [vmem:[#allocation23_spill] sm:$0xff] %v7911_v53  ;;  %6447 = vmatprep.mubr.msk.f32.mxu1 %vm544_vm0, %v1150_v50  ;;  %v2369_v61 = vsel %vm544_vm0, %v2068_v39, 0.0  ;;  %v2575_v20 = vld [vmem:[#allocation5 + $0x8] sm:$0xff]  ;;  %v2876_v3 = vsel %vm544_vm0, %v2576_v44, 0.0  ;;  %v1151_v29 = vmul.f32 %v7891_v27, %v7891_v27  ;;  %2025 = vst.msk [vmem:[#allocation5 + $0x28] sm:$0xff] %vm544_vm0, %v1015_v59  ;;  %v1152_v10 = vmul.f32 %v7887_v46, %v7887_v46 }
 0x128   : > { %9969 = vst [vmem:[#allocation24_spill] sm:$0xff] %v7916_v18  ;;  %6866 = vmatprep.subr.bf16.mxu1 %v7916_v18  ;;  %v2371_v38 = vadd.f32 %v2370_v56, %v2369_v61  ;;  %v2875_v32 = vsel %vm544_vm0, %v2575_v20, 0.0  ;;  %v1560_v39 = vmul.f32 %v7921_v19, %v7921_v19  ;;  %6491 = vmatprep.mubr.msk.f32.mxu0 %vm544_vm0, %v1559_v2 }
 0x129   : > { %v2877_v50 = vadd.f32 %v2876_v3, %v2875_v32  ;;  %6448 = vmatmul.mubr.msk.f32.gmra.mrb[68].mxu1 %vm544_vm0, %v1151_v29  ;;  %v6375_v25 = vpop.f32.mrb[32].mxu0  ;;  %v1562_v9 = vmul.f32 %v7911_v53, %v7911_v53  ;;  %v1153_v61 = vmul.f32 %v7908_v51, %v7908_v51 }
 0x12a   : > { %v6355_v59 = vpop.f32.mrb[32].mxu1  ;;  %6492 = vmatmul.mubr.msk.f32.gmra.mrb[76].mxu0 %vm544_vm0, %v1560_v39  ;;  %6450 = vmatprep.mubr.msk.f32.mxu1 %vm544_vm0, %v1152_v10  ;;  %v1036_v56 = vadd.f32 %v6375_v25, %v7803_v22  ;;  %v1027_v44 = vpop.f32.mrb[33].mxu0 }
 0x12b   : > { %v7949_v2 = vadd.f32 %v6355_v59, %v7621_v30  ;;  %v907_v20 = vpop.f32.mrb[33].mxu1  ;;  %6494 = vmatprep.mubr.msk.f32.mxu0 %vm544_vm0, %v1561_v63  ;;  %v1028_v3 = vadd.f32 %v7803_v22, %v1027_v44  ;;  %v6376_v29 = vpop.f32.mrb[34].mxu0  ;;  %v2071_v32 = vld [vmem:[#allocation5 + $0x30] sm:$0xff] }
 0x12c   : > { %v7954_v39 = vadd.f32 %v7621_v30, %v907_v20  ;;  %v6356_v10 = vpop.f32.mrb[34].mxu1  ;;  %2030 = vst.msk [vmem:[#allocation5 + $0x50] sm:$0xff] %vm544_vm0, %v1036_v56  ;;  %v1039_v25 = vadd.f32 %v6376_v29, %v7803_v22  ;;  %v1030_v18 = vpop.f32.mrb[35].mxu0  ;;  %v2374_v59 = vsel %vm544_vm0, %v2071_v32, 0.0 }
 0x12d   : > { %9970 = vst [vmem:[#allocation25_spill] sm:$0xff] %v7949_v2  ;;  %v2070_v4 = vld [vmem:[#allocation5 + $0x20] sm:$0xff]  ;;  %v910_v53 = vpop.f32.mrb[35].mxu1  ;;  %6451 = vmatmul.mubr.msk.f32.gmra.mrb[70].mxu1 %vm544_vm0, %v1153_v61  ;;  %2028 = vst.msk [vmem:[#allocation5 + $0x40] sm:$0xff] %vm544_vm0, %v1028_v3  ;;  %v1031_v63 = vadd.f32 %v7803_v22, %v1030_v18  ;;  %v2578_v44 = vld [vmem:[#allocation5 + $0x38] sm:$0xff]  ;;  %v7965_v46 = vadd.f32 %v6356_v10, %v7621_v30  ;;  %v1565_v18 = vmul.f32 %v7949_v2, %v7949_v2 }
 0x12e   : > { %9971 = vst [vmem:[#allocation26_spill] sm:$0xff] %v7954_v39  ;;  %v1563_v20 = vmul.f32 %v7954_v39, %v7954_v39  ;;  %v7968_v56 = vadd.f32 %v7621_v30, %v910_v53  ;;  %6495 = vmatmul.mubr.msk.f32.gmra.mrb[78].mxu0 %vm544_vm0, %v1562_v9  ;;  %2031 = vst.msk [vmem:[#allocation5 + $0x58] sm:$0xff] %vm544_vm0, %v1039_v25  ;;  %v2372_v61 = vsel %vm544_vm0, %v2070_v4, 0.0  ;;  %v2577_v3 = vld [vmem:[#allocation5 + $0x28] sm:$0xff]  ;;  %v2880_v10 = vsel %vm544_vm0, %v2578_v44, 0.0 }
 0x12f   : > { %2029 = vst.msk [vmem:[#allocation5 + $0x48] sm:$0xff] %vm544_vm0, %v1031_v63  ;;  %v2373_v29 = vadd.f32 %v2372_v61, %v2371_v38  ;;  %v2878_v32 = vsel %vm544_vm0, %v2577_v3, 0.0  ;;  %v1566_v4 = vmul.f32 %v7965_v46, %v7965_v46 }
 0x130   : > { %v1564_v53 = vmul.f32 %v7968_v56, %v7968_v56  ;;  %6497 = vmatprep.mubr.msk.f32.mxu0 %vm544_vm0, %v1563_v20  ;;  %v2879_v9 = vadd.f32 %v2878_v32, %v2877_v50 }
 0x131   : > { %v6379_v25 = vpop.f32.mrb[36].mxu0  ;;  %v2375_v39 = vadd.f32 %v2374_v59, %v2373_v29 }
 0x132   : > { %v6359_v51 = vpop.f32.mrb[36].mxu1  ;;  %6498 = vmatmul.mubr.msk.f32.gmra.mrb[80].mxu0 %vm544_vm0, %v1564_v53  ;;  %v1052_v38 = vadd.f32 %v6379_v25, %v7803_v22  ;;  %v1043_v63 = vpop.f32.mrb[37].mxu0  ;;  %v2881_v61 = vadd.f32 %v2880_v10, %v2879_v9 }
 0x133   : > { %v7986_v44 = vadd.f32 %v6359_v51, %v7621_v30  ;;  %v923_v3 = vpop.f32.mrb[37].mxu1  ;;  %6500 = vmatprep.mubr.msk.f32.mxu0 %vm544_vm0, %v1565_v18  ;;  %v1044_v50 = vadd.f32 %v7803_v22, %v1043_v63  ;;  %v6380_v20 = vpop.f32.mrb[38].mxu0  ;;  %v2073_v59 = vld [vmem:[#allocation5 + $0x50] sm:$0xff] }
 0x134   : > { %v7991_v29 = vadd.f32 %v7621_v30, %v923_v3  ;;  %v6360_v32 = vpop.f32.mrb[38].mxu1  ;;  %2034 = vst.msk [vmem:[#allocation5 + $0x70] sm:$0xff] %vm544_vm0, %v1052_v38  ;;  %v1055_v53 = vadd.f32 %v6380_v20, %v7803_v22  ;;  %v1046_v25 = vpop.f32.mrb[39].mxu0  ;;  %v2072_v10 = vld [vmem:[#allocation5 + $0x40] sm:$0xff]  ;;  %v2378_v18 = vsel %vm544_vm0, %v2073_v59, 0.0 }
 0x135   : > { %9972 = vst [vmem:[#allocation27_spill] sm:$0xff] %v7986_v44  ;;  %v926_v9 = vpop.f32.mrb[39].mxu1  ;;  %2032 = vst.msk [vmem:[#allocation5 + $0x60] sm:$0xff] %vm544_vm0, %v1044_v50  ;;  %v1047_v51 = vadd.f32 %v7803_v22, %v1046_v25  ;;  %v2580_v63 = vld [vmem:[#allocation5 + $0x58] sm:$0xff]  ;;  %v8001_v3 = vadd.f32 %v6360_v32, %v7621_v30  ;;  %v2376_v50 = vsel %vm544_vm0, %v2072_v10, 0.0  ;;  %v1569_v59 = vmul.f32 %v7986_v44, %v7986_v44 }
 0x136   : > { %9973 = vst [vmem:[#allocation28_spill] sm:$0xff] %v7991_v29  ;;  %v1567_v2 = vmul.f32 %v7991_v29, %v7991_v29  ;;  %v8004_v38 = vadd.f32 %v7621_v30, %v926_v9  ;;  %6501 = vmatmul.mubr.msk.f32.gmra.mrb[82].mxu0 %vm544_vm0, %v1566_v4  ;;  %2035 = vst.msk [vmem:[#allocation5 + $0x78] sm:$0xff] %vm544_vm0, %v1055_v53  ;;  %v2579_v20 = vld [vmem:[#allocation5 + $0x48] sm:$0xff]  ;;  %v2377_v25 = vadd.f32 %v2376_v50, %v2375_v39 }
 0x137   : > { %9974 = vst [vmem:[#allocation29_spill] sm:$0xff] %v8001_v3  ;;  %2033 = vst.msk [vmem:[#allocation5 + $0x68] sm:$0xff] %vm544_vm0, %v1047_v51  ;;  %v2882_v29 = vsel %vm544_vm0, %v2579_v20, 0.0  ;;  %v2884_v32 = vsel %vm544_vm0, %v2580_v63, 0.0  ;;  %v1570_v10 = vmul.f32 %v8001_v3, %v8001_v3 }
 0x138   : > { %9975 = vst [vmem:[#allocation30_spill] sm:$0xff] %v8004_v38  ;;  %v1568_v30 = vmul.f32 %v8004_v38, %v8004_v38  ;;  %6503 = vmatprep.mubr.msk.f32.mxu0 %vm544_vm0, %v1567_v2  ;;  %v2883_v4 = vadd.f32 %v2882_v29, %v2881_v61  ;;  %v2379_v9 = vadd.f32 %v2378_v18, %v2377_v25 }
 0x139   : > { %v6383_v53 = vpop.f32.mrb[40].mxu0 }
 0x13a   : > { %6504 = vmatmul.mubr.msk.f32.gmra.mrb[84].mxu0 %vm544_vm0, %v1568_v30  ;;  %v1068_v51 = vadd.f32 %v6383_v53, %v7803_v22  ;;  %v1059_v39 = vpop.f32.mrb[41].mxu0  ;;  %v2885_v50 = vadd.f32 %v2884_v32, %v2883_v4 }
 0x13b   : > { %6506 = vmatprep.mubr.msk.f32.mxu0 %vm544_vm0, %v1569_v59  ;;  %v1060_v63 = vadd.f32 %v7803_v22, %v1059_v39  ;;  %v6384_v20 = vpop.f32.mrb[42].mxu0  ;;  %v2075_v44 = vld [vmem:[#allocation5 + $0x70] sm:$0xff] }
 0x13c   : > { %2038 = vst.msk [vmem:[#allocation5 + $0x90] sm:$0xff] %vm544_vm0, %v1068_v51  ;;  %v1071_v2 = vadd.f32 %v6384_v20, %v7803_v22  ;;  %v1062_v61 = vpop.f32.mrb[43].mxu0  ;;  %v2074_v29 = vld [vmem:[#allocation5 + $0x60] sm:$0xff]  ;;  %v2382_v32 = vsel %vm544_vm0, %v2075_v44, 0.0 }
 0x13d   : > { %2036 = vst.msk [vmem:[#allocation5 + $0x80] sm:$0xff] %vm544_vm0, %v1060_v63  ;;  %v1063_v18 = vadd.f32 %v7803_v22, %v1062_v61  ;;  %v2380_v25 = vsel %vm544_vm0, %v2074_v29, 0.0  ;;  %v2582_v30 = vld [vmem:[#allocation5 + $0x78] sm:$0xff] }
 0x13e   : > { %6507 = vmatmul.mubr.msk.f32.gmra.mrb[86].mxu0 %vm544_vm0, %v1570_v10  ;;  %2039 = vst.msk [vmem:[#allocation5 + $0x98] sm:$0xff] %vm544_vm0, %v1071_v2  ;;  %v2381_v59 = vadd.f32 %v2380_v25, %v2379_v9  ;;  %v2581_v4 = vld [vmem:[#allocation5 + $0x68] sm:$0xff]  ;;  %v2888_v51 = vsel %vm544_vm0, %v2582_v30, 0.0 }
 0x13f   : > { %2037 = vst.msk [vmem:[#allocation5 + $0x88] sm:$0xff] %vm544_vm0, %v1063_v18  ;;  %v2886_v53 = vsel %vm544_vm0, %v2581_v4, 0.0 }
 0x140   : > { %v8034_v39 = vadd.f32 %v2382_v32, %v2381_v59  ;;  %v2887_v63 = vadd.f32 %v2886_v53, %v2885_v50 }
 0x141   : > { %v6387_v20 = vpop.f32.mrb[44].mxu0 }
 0x142   : > { %9976 = vst [vmem:[#allocation31_spill] sm:$0xff] %v8034_v39  ;;  %v1084_v61 = vadd.f32 %v6387_v20, %v7803_v22  ;;  %v1075_v44 = vpop.f32.mrb[45].mxu0  ;;  %v8037_v29 = vadd.f32 %v2888_v51, %v2887_v63 }
 0x143   : > { %v1076_v10 = vadd.f32 %v7803_v22, %v1075_v44  ;;  %v6388_v2 = vpop.f32.mrb[46].mxu0  ;;  %v3085_v9 = vld [vmem:[#allocation5 + $0x90] sm:$0xff] }
 0x144   : > { %9977 = vst [vmem:[#allocation32_spill] sm:$0xff] %v8037_v29  ;;  %2042 = vst.msk [vmem:[#allocation5 + $0xb0] sm:$0xff] %vm544_vm0, %v1084_v61  ;;  %v1087_v18 = vadd.f32 %v6388_v2, %v7803_v22  ;;  %v1078_v25 = vpop.f32.mrb[47].mxu0  ;;  %v3084_v4 = vld [vmem:[#allocation5 + $0x80] sm:$0xff]  ;;  %v3385_v32 = vsel %vm544_vm0, %v3085_v9, 0.0 }
 0x145   : > { %2040 = vst.msk [vmem:[#allocation5 + $0xa0] sm:$0xff] %vm544_vm0, %v1076_v10  ;;  %v1079_v50 = vadd.f32 %v7803_v22, %v1078_v25  ;;  %v3384_v30 = vsel %vm544_vm0, %v3084_v4, 0.0  ;;  %v3593_v59 = vld [vmem:[#allocation5 + $0x98] sm:$0xff] }
 0x146   : > { %2043 = vst.msk [vmem:[#allocation5 + $0xb8] sm:$0xff] %vm544_vm0, %v1087_v18  ;;  %v3386_v53 = vadd.f32 %v3385_v32, %v3384_v30  ;;  %v3592_v51 = vld [vmem:[#allocation5 + $0x88] sm:$0xff]  ;;  %v3893_v63 = vsel %vm544_vm0, %v3593_v59, 0.0 }
 0x147   : > { %2041 = vst.msk [vmem:[#allocation5 + $0xa8] sm:$0xff] %vm544_vm0, %v1079_v50  ;;  %v3892_v20 = vsel %vm544_vm0, %v3592_v51, 0.0 }
 0x148   : > { %v3894_v61 = vadd.f32 %v3893_v63, %v3892_v20 }
 0x149   : > { %v6391_v44 = vpop.f32.mrb[48].mxu0 }
 0x14a   : > { %v1100_v2 = vadd.f32 %v6391_v44, %v7803_v22  ;;  %v1091_v10 = vpop.f32.mrb[49].mxu0 }
 0x14b   : > { %v1092_v9 = vadd.f32 %v7803_v22, %v1091_v10  ;;  %v6392_v25 = vpop.f32.mrb[50].mxu0  ;;  %v3087_v4 = vld [vmem:[#allocation5 + $0xb0] sm:$0xff] }
 0x14c   : > { %2046 = vst.msk [vmem:[#allocation5 + $0xd0] sm:$0xff] %vm544_vm0, %v1100_v2  ;;  %v1103_v18 = vadd.f32 %v6392_v25, %v7803_v22  ;;  %v1094_v32 = vpop.f32.mrb[51].mxu0  ;;  %v3086_v30 = vld [vmem:[#allocation5 + $0xa0] sm:$0xff]  ;;  %v3389_v51 = vsel %vm544_vm0, %v3087_v4, 0.0 }
 0x14d   : > { %2044 = vst.msk [vmem:[#allocation5 + $0xc0] sm:$0xff] %vm544_vm0, %v1092_v9  ;;  %v1095_v50 = vadd.f32 %v7803_v22, %v1094_v32  ;;  %v3387_v59 = vsel %vm544_vm0, %v3086_v30, 0.0  ;;  %v3595_v63 = vld [vmem:[#allocation5 + $0xb8] sm:$0xff] }
 0x14e   : > { %2047 = vst.msk [vmem:[#allocation5 + $0xd8] sm:$0xff] %vm544_vm0, %v1103_v18  ;;  %v3388_v20 = vadd.f32 %v3387_v59, %v3386_v53  ;;  %v3594_v44 = vld [vmem:[#allocation5 + $0xa8] sm:$0xff]  ;;  %v3897_v10 = vsel %vm544_vm0, %v3595_v63, 0.0 }
 0x14f   : > { %2045 = vst.msk [vmem:[#allocation5 + $0xc8] sm:$0xff] %vm544_vm0, %v1095_v50  ;;  %v3895_v2 = vsel %vm544_vm0, %v3594_v44, 0.0 }
 0x150   : > { %v3390_v25 = vadd.f32 %v3389_v51, %v3388_v20  ;;  %v3896_v29 = vadd.f32 %v3895_v2, %v3894_v61 }
 0x151   : > { %v6395_v9 = vpop.f32.mrb[52].mxu0 }
 0x152   : > { %v1116_v32 = vadd.f32 %v6395_v9, %v7803_v22  ;;  %v1107_v39 = vpop.f32.mrb[53].mxu0  ;;  %v3898_v30 = vadd.f32 %v3897_v10, %v3896_v29 }
 0x153   : > { %v1108_v4 = vadd.f32 %v7803_v22, %v1107_v39  ;;  %v6396_v3 = vpop.f32.mrb[54].mxu0  ;;  %v3089_v38 = vld [vmem:[#allocation5 + $0xd0] sm:$0xff] }
 0x154   : > { %2050 = vst.msk [vmem:[#allocation5 + $0xf0] sm:$0xff] %vm544_vm0, %v1116_v32  ;;  %v1119_v53 = vadd.f32 %v6396_v3, %v7803_v22  ;;  %v1110_v18 = vpop.f32.mrb[55].mxu0  ;;  %v3088_v50 = vld [vmem:[#allocation5 + $0xc0] sm:$0xff]  ;;  %v3393_v51 = vsel %vm544_vm0, %v3089_v38, 0.0 }
 0x155   : > { %2048 = vst.msk [vmem:[#allocation5 + $0xe0] sm:$0xff] %vm544_vm0, %v1108_v4  ;;  %v1111_v59 = vadd.f32 %v7803_v22, %v1110_v18  ;;  %v3391_v61 = vsel %vm544_vm0, %v3088_v50, 0.0  ;;  %v3597_v63 = vld [vmem:[#allocation5 + $0xd8] sm:$0xff] }
 0x156   : > { %2051 = vst.msk [vmem:[#allocation5 + $0xf8] sm:$0xff] %vm544_vm0, %v1119_v53  ;;  %v3392_v39 = vadd.f32 %v3391_v61, %v3390_v25  ;;  %v3596_v29 = vld [vmem:[#allocation5 + $0xc8] sm:$0xff]  ;;  %v3901_v3 = vsel %vm544_vm0, %v3597_v63, 0.0 }
 0x157   : > { %2049 = vst.msk [vmem:[#allocation5 + $0xe8] sm:$0xff] %vm544_vm0, %v1111_v59  ;;  %v3899_v20 = vsel %vm544_vm0, %v3596_v29, 0.0 }
 0x158   : > { %v3394_v44 = vadd.f32 %v3393_v51, %v3392_v39  ;;  %v3900_v2 = vadd.f32 %v3899_v20, %v3898_v30 }
 0x15a   : > { %v3902_v10 = vadd.f32 %v3901_v3, %v3900_v2 }
 0x15b   : > { %v3091_v9 = vld [vmem:[#allocation5 + $0xf0] sm:$0xff] }
 0x15c   : > { %v3090_v22 = vld [vmem:[#allocation5 + $0xe0] sm:$0xff]  ;;  %v3397_v38 = vsel %vm544_vm0, %v3091_v9, 0.0 }
 0x15d   : > { %v3395_v32 = vsel %vm544_vm0, %v3090_v22, 0.0  ;;  %v3599_v4 = vld [vmem:[#allocation5 + $0xf8] sm:$0xff] }
 0x15e   : > { %v3396_v18 = vadd.f32 %v3395_v32, %v3394_v44  ;;  %v3598_v53 = vld [vmem:[#allocation5 + $0xe8] sm:$0xff]  ;;  %v3905_v50 = vsel %vm544_vm0, %v3599_v4, 0.0 }
 0x15f   : > { %v3903_v25 = vsel %vm544_vm0, %v3598_v53, 0.0 }
 0x160   : > { %v8078_v59 = vadd.f32 %v3397_v38, %v3396_v18  ;;  %v3904_v61 = vadd.f32 %v3903_v25, %v3902_v10 }
 0x162   : > { %v8080_v63 = vadd.f32 %v3905_v50, %v3904_v61 }
 0x164   : > { %9978 = vst [vmem:[#allocation33_spill] sm:$0xff] %v8080_v63 }
 0x1c4   : > { %v6407_v30 = vpop.f32.mrb[40].mxu1 }
 0x1c5   : > { %7014 = vrsqrt.f32 %v6407_v30  ;;  %v1316_v51 = vpop.f32.mrb[41].mxu1 }
 0x1c6   : > { %7016 = vrsqrt.f32 %v1316_v51 }
 0x1c8   : > { %v6410_v39 = vpop.f32.mrb[42].mxu1 }
 0x1c9   : > { %7018 = vrsqrt.f32 %v6410_v39  ;;  %v1326_v29 = vpop.f32.mrb[43].mxu1 }
 0x1ca   : > { %7020 = vrsqrt.f32 %v1326_v29 }
 0x1cc   : > { %v6413_v20 = vpop.f32.mrb[44].mxu1 }
 0x1cd   : > { %7022 = vrsqrt.f32 %v6413_v20  ;;  %v1336_v3 = vpop.f32.mrb[45].mxu1 }
 0x1ce   : > { %7024 = vrsqrt.f32 %v1336_v3 }
 0x1cf   : > { %v7015_v44 = vpop.eup %7014 }
 0x1d0   : > { %v7017_v2 = vpop.eup %7016  ;;  %v1508_v9 = vmul.f32 %v7015_v44, %v7572_v8  ;;  %v6416_v22 = vpop.f32.mrb[46].mxu1 }
 0x1d1   : > { %v1507_v10 = vmul.f32 %v7017_v2, %v7560_v1  ;;  %7026 = vrsqrt.f32 %v6416_v22  ;;  %v1346_v32 = vpop.f32.mrb[47].mxu1 }
 0x1d2   : > { %1957 = vst.msk [vmem:[#allocation3 + $0x8] sm:$0xff] %vm544_vm0, %v1508_v9  ;;  %7028 = vrsqrt.f32 %v1346_v32 }
 0x1d3   : > { %v7019_v38 = vpop.eup %7018  ;;  %1956 = vst.msk [vmem:[#allocation3] sm:$0xff] %vm544_vm0, %v1507_v10 }
 0x1d4   : > { %v7021_v4 = vpop.eup %7020  ;;  %v1510_v18 = vmul.f32 %v7019_v38, %v7569_v7  ;;  %v6419_v53 = vpop.f32.mrb[48].mxu1 }
 0x1d5   : > { %v1509_v25 = vmul.f32 %v7021_v4, %v7555_v62  ;;  %7030 = vrsqrt.f32 %v6419_v53  ;;  %v6463_v50 = vpop.f32.mrb[56].mxu0  ;;  %v1356_v8 = vpop.f32.mrb[49].mxu1 }
 0x1d6   : > { %1959 = vst.msk [vmem:[#allocation3 + $0x18] sm:$0xff] %vm544_vm0, %v1510_v18  ;;  %7032 = vrsqrt.f32 %v6463_v50  ;;  %v1733_v1 = vpop.f32.mrb[57].mxu0 }
 0x1d7   : > { %v7023_v61 = vpop.eup %7022  ;;  %1958 = vst.msk [vmem:[#allocation3 + $0x10] sm:$0xff] %vm544_vm0, %v1509_v25  ;;  %7034 = vrsqrt.f32 %v1356_v8 }
 0x1d8   : > { %v7025_v30 = vpop.eup %7024  ;;  %v1512_v51 = vmul.f32 %v7023_v61, %v7605_v24  ;;  %7036 = vrsqrt.f32 %v1733_v1  ;;  %v6422_v39 = vpop.f32.mrb[50].mxu1 }
 0x1d9   : > { %v1511_v7 = vmul.f32 %v7025_v30, %v7592_v17  ;;  %7038 = vrsqrt.f32 %v6422_v39  ;;  %v6466_v62 = vpop.f32.mrb[58].mxu0  ;;  %v1366_v29 = vpop.f32.mrb[51].mxu1  ;;  %v8092_v20 = vld [vmem:[#allocation3 + $0x8] sm:$0xff] }
 0x1da   : > { %1961 = vst.msk [vmem:[#allocation3 + $0x28] sm:$0xff] %vm544_vm0, %v1512_v51  ;;  %7040 = vrsqrt.f32 %v6466_v62  ;;  %v1743_v3 = vpop.f32.mrb[59].mxu0  ;;  %6621 = vmatprep.mubr.msk.f32.mxu0 %vm544_vm0, %v8092_v20 }
 0x1db   : > { %v7027_v44 = vpop.eup %7026  ;;  %1960 = vst.msk [vmem:[#allocation3 + $0x20] sm:$0xff] %vm544_vm0, %v1511_v7  ;;  %7042 = vrsqrt.f32 %v1366_v29 }
 0x1dc   : > { %v7029_v24 = vpop.eup %7028  ;;  %v1514_v2 = vmul.f32 %v7027_v44, %v7602_v23  ;;  %7044 = vrsqrt.f32 %v1743_v3  ;;  %v6425_v17 = vpop.f32.mrb[52].mxu1 }
 0x1dd   : > { %v1513_v9 = vmul.f32 %v7029_v24, %v7585_v14  ;;  %7046 = vrsqrt.f32 %v6425_v17  ;;  %v6469_v22 = vpop.f32.mrb[60].mxu0  ;;  %v1376_v10 = vpop.f32.mrb[53].mxu1 }
 0x1de   : > { %1963 = vst.msk [vmem:[#allocation3 + $0x38] sm:$0xff] %vm544_vm0, %v1514_v2  ;;  %7048 = vrsqrt.f32 %v6469_v22  ;;  %v1753_v32 = vpop.f32.mrb[61].mxu0 }
 0x1df   : > { %v7031_v38 = vpop.eup %7030  ;;  %1962 = vst.msk [vmem:[#allocation3 + $0x30] sm:$0xff] %vm544_vm0, %v1513_v9  ;;  %7050 = vrsqrt.f32 %v1376_v10 }
 0x1e0   : > { %v7033_v4 = vpop.eup %7032  ;;  %v1516_v18 = vmul.f32 %v7031_v38, %v7643_v43  ;;  %7052 = vrsqrt.f32 %v1753_v32  ;;  %v6428_v23 = vpop.f32.mrb[54].mxu1 }
 0x1e1   : > { %v7035_v53 = vpop.eup %7034  ;;  %v1925_v25 = vmul.f32 %v7033_v4, %v7651_v47  ;;  %7054 = vrsqrt.f32 %v6428_v23  ;;  %v6472_v14 = vpop.f32.mrb[62].mxu0 }
 0x1e2   : > { %v1386_v50 = vpop.f32.mrb[55].mxu1  ;;  %v7037_v8 = vpop.eup %7036  ;;  %1965 = vst.msk [vmem:[#allocation3 + $0x48] sm:$0xff] %vm544_vm0, %v1516_v18  ;;  %v1515_v1 = vmul.f32 %v7035_v53, %v7629_v34  ;;  %7056 = vrsqrt.f32 %v6472_v14 }
 0x1e3   : > { %v1763_v61 = vpop.f32.mrb[63].mxu0  ;;  %v7039_v30 = vpop.eup %7038  ;;  %1989 = vst.msk [vmem:[#allocation4 + $0x8] sm:$0xff] %vm544_vm0, %v1925_v25  ;;  %v1924_v43 = vmul.f32 %v7037_v8, %v7632_v37  ;;  %7058 = vrsqrt.f32 %v1386_v50 }
 0x1e4   : > { %v7041_v51 = vpop.eup %7040  ;;  %1964 = vst.msk [vmem:[#allocation3 + $0x40] sm:$0xff] %vm544_vm0, %v1515_v1  ;;  %v1518_v47 = vmul.f32 %v7039_v30, %v7640_v42  ;;  %7060 = vrsqrt.f32 %v1763_v61  ;;  %v6431_v39 = vpop.f32.mrb[56].mxu1 }
 0x1e5   : > { %v7043_v7 = vpop.eup %7042  ;;  %1988 = vst.msk [vmem:[#allocation4] sm:$0xff] %vm544_vm0, %v1924_v43  ;;  %v1927_v34 = vmul.f32 %v7041_v51, %v7657_v49  ;;  %7062 = vrsqrt.f32 %v6431_v39  ;;  %v6475_v62 = vpop.f32.mrb[64].mxu0 }
 0x1e6   : > { %v1396_v29 = vpop.f32.mrb[57].mxu1  ;;  %v7045_v3 = vpop.eup %7044  ;;  %1967 = vst.msk [vmem:[#allocation3 + $0x58] sm:$0xff] %vm544_vm0, %v1518_v47  ;;  %v1517_v37 = vmul.f32 %v7043_v7, %v7625_v31  ;;  %7064 = vrsqrt.f32 %v6475_v62 }
 0x1e7   : > { %v1773_v44 = vpop.f32.mrb[65].mxu0  ;;  %v7047_v24 = vpop.eup %7046  ;;  %1991 = vst.msk [vmem:[#allocation4 + $0x18] sm:$0xff] %vm544_vm0, %v1927_v34  ;;  %v1926_v42 = vmul.f32 %v7045_v3, %v7635_v40  ;;  %7066 = vrsqrt.f32 %v1396_v29 }
 0x1e8   : > { %v7049_v2 = vpop.eup %7048  ;;  %1966 = vst.msk [vmem:[#allocation3 + $0x50] sm:$0xff] %vm544_vm0, %v1517_v37  ;;  %v1520_v49 = vmul.f32 %v7047_v24, %v7690_v16  ;;  %7068 = vrsqrt.f32 %v1773_v44  ;;  %v6434_v17 = vpop.f32.mrb[58].mxu1 }
 0x1e9   : > { %v7051_v9 = vpop.eup %7050  ;;  %1990 = vst.msk [vmem:[#allocation4 + $0x10] sm:$0xff] %vm544_vm0, %v1926_v42  ;;  %v1929_v31 = vmul.f32 %v7049_v2, %v7698_v26  ;;  %7070 = vrsqrt.f32 %v6434_v17  ;;  %v6478_v22 = vpop.f32.mrb[66].mxu0 }
 0x1ea   : > { %v1406_v10 = vpop.f32.mrb[59].mxu1  ;;  %v7053_v32 = vpop.eup %7052  ;;  %1969 = vst.msk [vmem:[#allocation3 + $0x68] sm:$0xff] %vm544_vm0, %v1520_v49  ;;  %v1519_v40 = vmul.f32 %v7051_v9, %v7673_v58  ;;  %7072 = vrsqrt.f32 %v6478_v22  ;;  %v2567_v4 = vld [vmem:[#allocation4 + $0x8] sm:$0xff] }
 0x1eb   : > { %v1783_v38 = vpop.f32.mrb[67].mxu0  ;;  %v7055_v18 = vpop.eup %7054  ;;  %1993 = vst.msk [vmem:[#allocation4 + $0x28] sm:$0xff] %vm544_vm0, %v1929_v31  ;;  %v1928_v16 = vmul.f32 %v7053_v32, %v7679_v5  ;;  %7074 = vrsqrt.f32 %v1406_v10  ;;  %2742 = vxpose.xlu1.b32.start [1/8] (short) (narrow) %v2567_v4, 32 }
 0x1ec   : > { %v7057_v23 = vpop.eup %7056  ;;  %1968 = vst.msk [vmem:[#allocation3 + $0x60] sm:$0xff] %vm544_vm0, %v1519_v40  ;;  %v1522_v26 = vmul.f32 %v7055_v18, %v7687_v13  ;;  %7076 = vrsqrt.f32 %v1783_v38  ;;  %v8126_v53 = vld [vmem:[#allocation4] sm:$0xff]  ;;  %v6437_v25 = vpop.f32.mrb[60].mxu1 }
 0x1ed   : > { %v7059_v58 = vpop.eup %7058  ;;  %1992 = vst.msk [vmem:[#allocation4 + $0x20] sm:$0xff] %vm544_vm0, %v1928_v16  ;;  %v1931_v14 = vmul.f32 %v7057_v23, %v7705_v28  ;;  %2235 = vxpose.xlu0.b32.start [1/8] (short) (narrow) %v8126_v53, 32  ;;  %7078 = vrsqrt.f32 %v6437_v25  ;;  %v6481_v5 = vpop.f32.mrb[68].mxu0  ;;  %v2583_v28 = vsel %vm544_vm0, %v2567_v4, 0.0 }
 0x1ee   : > { %v1416_v50 = vpop.f32.mrb[61].mxu1  ;;  %v7061_v8 = vpop.eup %7060  ;;  %1971 = vst.msk [vmem:[#allocation3 + $0x78] sm:$0xff] %vm544_vm0, %v1522_v26  ;;  %v1521_v1 = vmul.f32 %v7059_v58, %v7668_v54  ;;  %7080 = vrsqrt.f32 %v6481_v5  ;;  %v2568_v61 = vld [vmem:[#allocation4 + $0x18] sm:$0xff] }
 0x1ef   : > { %v1793_v13 = vpop.f32.mrb[69].mxu0  ;;  %v7063_v30 = vpop.eup %7062  ;;  %1995 = vst.msk [vmem:[#allocation4 + $0x38] sm:$0xff] %vm544_vm0, %v1931_v14  ;;  %v1930_v43 = vmul.f32 %v7061_v8, %v7682_v11  ;;  %7082 = vrsqrt.f32 %v1416_v50  ;;  %2743 = vxpose.xlu1.b32.cont [2/8] (short) (narrow) %v2568_v61, 32  ;;  %v2584_v51 = vsel %vm544_vm0, %v2568_v61, 0.0 }
 0x1f0   : > { %v7065_v47 = vpop.eup %7064  ;;  %1970 = vst.msk [vmem:[#allocation3 + $0x70] sm:$0xff] %vm544_vm0, %v1521_v1  ;;  %v1524_v39 = vmul.f32 %v7063_v30, %v7738_v57  ;;  %7084 = vrsqrt.f32 %v1793_v13  ;;  %v2585_v54 = vadd.f32 %v2584_v51, %v2583_v28  ;;  %v8139_v7 = vld [vmem:[#allocation4 + $0x10] sm:$0xff]  ;;  %v6440_v34 = vpop.f32.mrb[62].mxu1 }
 0x1f1   : > { %v7067_v62 = vpop.eup %7066  ;;  %1994 = vst.msk [vmem:[#allocation4 + $0x30] sm:$0xff] %vm544_vm0, %v1930_v43  ;;  %v1933_v11 = vmul.f32 %v7065_v47, %v7746_v6  ;;  %2236 = vxpose.xlu0.b32.cont [2/8] (short) (narrow) %v8139_v7, 32  ;;  %7086 = vrsqrt.f32 %v6440_v34  ;;  %v6484_v29 = vpop.f32.mrb[70].mxu0 }
 0x1f2   : > { %v1426_v3 = vpop.f32.mrb[63].mxu1  ;;  %v7069_v37 = vpop.eup %7068  ;;  %1973 = vst.msk [vmem:[#allocation3 + $0x88] sm:$0xff] %vm544_vm0, %v1524_v39  ;;  %v1523_v57 = vmul.f32 %v7067_v62, %v7721_v41  ;;  %7088 = vrsqrt.f32 %v6484_v29  ;;  %v2569_v24 = vld [vmem:[#allocation4 + $0x28] sm:$0xff] }
 0x1f3   : > { %v1803_v44 = vpop.f32.mrb[71].mxu0  ;;  %v7071_v42 = vpop.eup %7070  ;;  %1997 = vst.msk [vmem:[#allocation4 + $0x48] sm:$0xff] %vm544_vm0, %v1933_v11  ;;  %v1932_v2 = vmul.f32 %v7069_v37, %v7727_v48  ;;  %7090 = vrsqrt.f32 %v1426_v3  ;;  %2744 = vxpose.xlu1.b32.cont [3/8] (short) (narrow) %v2569_v24, 32  ;;  %v2586_v6 = vsel %vm544_vm0, %v2569_v24, 0.0  ;;  %v9979_v3 = vld [vmem:[#allocation9_spill] sm:$0xff]  ;;  %v9980_v24 = vld [vmem:[#allocation10_spill] sm:$0xff] }
 0x1f4   : > { %v7073_v49 = vpop.eup %7072  ;;  %1972 = vst.msk [vmem:[#allocation3 + $0x80] sm:$0xff] %vm544_vm0, %v1523_v57  ;;  %v1526_v17 = vmul.f32 %v7071_v42, %v7735_v55  ;;  %7092 = vrsqrt.f32 %v1803_v44  ;;  %v2587_v9 = vadd.f32 %v2586_v6, %v2585_v54  ;;  %v2062_v41 = vld [vmem:[#allocation4 + $0x20] sm:$0xff]  ;;  %v6443_v31 = vpop.f32.mrb[64].mxu1 }
 0x1f5   : > { %v7075_v22 = vpop.eup %7074  ;;  %1996 = vst.msk [vmem:[#allocation4 + $0x40] sm:$0xff] %vm544_vm0, %v1932_v2  ;;  %v1935_v10 = vmul.f32 %v7073_v49, %v7753_v12  ;;  %2237 = vxpose.xlu0.b32.cont [3/8] (short) (narrow) %v2062_v41, 32  ;;  %7094 = vrsqrt.f32 %v6443_v31  ;;  %v1436_v48 = vpop.f32.mrb[65].mxu1  ;;  %v2079_v34 = vsel %vm544_vm0, %v2062_v41, 0.0 }
 0x1f6   : > { %v6487_v32 = vpop.f32.mrb[72].mxu0  ;;  %v7077_v40 = vpop.eup %7076  ;;  %1975 = vst.msk [vmem:[#allocation3 + $0x98] sm:$0xff] %vm544_vm0, %v1526_v17  ;;  %v1525_v38 = vmul.f32 %v7075_v22, %v7716_v36  ;;  %7096 = vrsqrt.f32 %v1436_v48  ;;  %v2570_v55 = vld [vmem:[#allocation4 + $0x38] sm:$0xff]  ;;  %v9981_v17 = vld [vmem:[#allocation13_spill] sm:$0xff]  ;;  %v9982_v48 = vld [vmem:[#allocation11_spill] sm:$0xff] }
 0x1f7   : > { %v1813_v4 = vpop.f32.mrb[73].mxu0  ;;  %v7079_v18 = vpop.eup %7078  ;;  %1999 = vst.msk [vmem:[#allocation4 + $0x58] sm:$0xff] %vm544_vm0, %v1935_v10  ;;  %v1934_v16 = vmul.f32 %v7077_v40, %v7730_v52  ;;  %2745 = vxpose.xlu1.b32.cont [4/8] (short) (narrow) %v2570_v55, 32  ;;  %v2588_v12 = vsel %vm544_vm0, %v2570_v55, 0.0  ;;  %7098 = vrsqrt.f32 %v6487_v32 }
 0x1f8   : > { %v7081_v23 = vpop.eup %7080  ;;  %1974 = vst.msk [vmem:[#allocation3 + $0x90] sm:$0xff] %vm544_vm0, %v1525_v38  ;;  %v1528_v26 = vmul.f32 %v7079_v18, %v7786_v0  ;;  %v2589_v25 = vadd.f32 %v2588_v12, %v2587_v9  ;;  %v2063_v58 = vld [vmem:[#allocation4 + $0x30] sm:$0xff]  ;;  %v6446_v36 = vpop.f32.mrb[66].mxu1  ;;  %7100 = vrsqrt.f32 %v1813_v4  ;;  %v9983_v12 = vld [vmem:[#allocation18_spill] sm:$0xff] }
 0x1f9   : > { %v7083_v14 = vpop.eup %7082  ;;  %1998 = vst.msk [vmem:[#allocation4 + $0x50] sm:$0xff] %vm544_vm0, %v1934_v16  ;;  %v1937_v5 = vmul.f32 %v7081_v23, %v7794_v21  ;;  %2238 = vxpose.xlu0.b32.cont [4/8] (short) (narrow) %v2063_v58, 32  ;;  %7102 = vrsqrt.f32 %v6446_v36  ;;  %v1446_v52 = vpop.f32.mrb[67].mxu1  ;;  %v2077_v21 = vsel %vm544_vm0, %v8139_v7, 0.0  ;;  %v2081_v42 = vsel %vm544_vm0, %v2063_v58, 0.0 }
 0x1fa   : > { %v6490_v50 = vpop.f32.mrb[74].mxu0  ;;  %v7085_v8 = vpop.eup %7084  ;;  %1977 = vst.msk [vmem:[#allocation3 + $0xa8] sm:$0xff] %vm544_vm0, %v1528_v26  ;;  %v1527_v1 = vmul.f32 %v7083_v14, %v7769_v35  ;;  %7104 = vrsqrt.f32 %v1446_v52  ;;  %v2571_v0 = vld [vmem:[#allocation4 + $0x48] sm:$0xff]  ;;  %v9984_v14 = vld [vmem:[#allocation15_spill] sm:$0xff] }
 0x1fb   : > { %v1823_v13 = vpop.f32.mrb[75].mxu0  ;;  %v7087_v61 = vpop.eup %7086  ;;  %2001 = vst.msk [vmem:[#allocation4 + $0x68] sm:$0xff] %vm544_vm0, %v1937_v5  ;;  %v1936_v30 = vmul.f32 %v7085_v8, %v7775_v45  ;;  %2746 = vxpose.xlu1.b32.cont [5/8] (short) (narrow) %v2571_v0, 32  ;;  %v2590_v43 = vsel %vm544_vm0, %v2571_v0, 0.0  ;;  %7106 = vrsqrt.f32 %v6490_v50  ;;  %v2076_v45 = vsel %vm544_vm0, %v8126_v53, 0.0  ;;  %v9985_v50 = vld [vmem:[#allocation16_spill] sm:$0xff] }
 0x1fc   : > { %v7089_v28 = vpop.eup %7088  ;;  %1976 = vst.msk [vmem:[#allocation3 + $0xa0] sm:$0xff] %vm544_vm0, %v1527_v1  ;;  %v1530_v35 = vmul.f32 %v7087_v61, %v7783_v60  ;;  %v2591_v51 = vadd.f32 %v2590_v43, %v2589_v25  ;;  %v2064_v47 = vld [vmem:[#allocation4 + $0x40] sm:$0xff]  ;;  %v6449_v39 = vpop.f32.mrb[68].mxu1  ;;  %7108 = vrsqrt.f32 %v1823_v13  ;;  %v2078_v60 = vadd.f32 %v2077_v21, %v2076_v45 }
 0x1fd   : > { %v7091_v54 = vpop.eup %7090  ;;  %2000 = vst.msk [vmem:[#allocation4 + $0x60] sm:$0xff] %vm544_vm0, %v1936_v30  ;;  %v1939_v7 = vmul.f32 %v7089_v28, %v7810_v33  ;;  %2239 = vxpose.xlu0.b32.cont [5/8] (short) (narrow) %v2064_v47, 32  ;;  %7110 = vrsqrt.f32 %v6449_v39  ;;  %v1456_v62 = vpop.f32.mrb[69].mxu1  ;;  %v2083_v40 = vsel %vm544_vm0, %v2064_v47, 0.0  ;;  %v9986_v30 = vld [vmem:[#allocation12_spill] sm:$0xff]  ;;  %v9987_v47 = vld [vmem:[#allocation17_spill] sm:$0xff] }
 0x1fe   : > { %v6493_v11 = vpop.f32.mrb[76].mxu0  ;;  %v7093_v29 = vpop.eup %7092  ;;  %1979 = vst.msk [vmem:[#allocation3 + $0xb8] sm:$0xff] %vm544_vm0, %v1530_v35  ;;  %v1529_v37 = vmul.f32 %v7091_v54, %v9979_v3  ;;  %7112 = vrsqrt.f32 %v1456_v62  ;;  %v2572_v57 = vld [vmem:[#allocation4 + $0x58] sm:$0xff]  ;;  %v2080_v49 = vadd.f32 %v2079_v34, %v2078_v60  ;;  %v9988_v34 = vld [vmem:[#allocation14_spill] sm:$0xff] }
 0x1ff   : > { %v1833_v44 = vpop.f32.mrb[77].mxu0  ;;  %v7095_v53 = vpop.eup %7094  ;;  %2003 = vst.msk [vmem:[#allocation4 + $0x78] sm:$0xff] %vm544_vm0, %v1939_v7  ;;  %v1938_v33 = vmul.f32 %v7093_v29, %v9980_v24  ;;  %2747 = vxpose.xlu1.b32.cont [6/8] (short) (narrow) %v2572_v57, 32  ;;  %v2592_v2 = vsel %vm544_vm0, %v2572_v57, 0.0  ;;  %7114 = vrsqrt.f32 %v6493_v11 }
 0x200   : > { %v7097_v6 = vpop.eup %7096  ;;  %1978 = vst.msk [vmem:[#allocation3 + $0xb0] sm:$0xff] %vm544_vm0, %v1529_v37  ;;  %v1532_v9 = vmul.f32 %v7095_v53, %v9981_v17  ;;  %v2593_v41 = vadd.f32 %v2592_v2, %v2591_v51  ;;  %v2065_v31 = vld [vmem:[#allocation4 + $0x50] sm:$0xff]  ;;  %v6452_v22 = vpop.f32.mrb[70].mxu1  ;;  %7116 = vrsqrt.f32 %v1833_v44  ;;  %v2082_v18 = vadd.f32 %v2081_v42, %v2080_v49 }
 0x201   : > { %v7099_v10 = vpop.eup %7098  ;;  %2002 = vst.msk [vmem:[#allocation4 + $0x70] sm:$0xff] %vm544_vm0, %v1938_v33  ;;  %v1531_v32 = vmul.f32 %v7097_v6, %v9982_v48  ;;  %2240 = vxpose.xlu0.b32.cont [6/8] (short) (narrow) %v2065_v31, 32  ;;  %7118 = vrsqrt.f32 %v6452_v22  ;;  %v1466_v38 = vpop.f32.mrb[71].mxu1  ;;  %v2085_v58 = vsel %vm544_vm0, %v2065_v31, 0.0  ;;  %v9989_v53 = vld [vmem:[#allocation19_spill] sm:$0xff] }
 0x202   : > { %v6496_v55 = vpop.f32.mrb[78].mxu0  ;;  %v7101_v4 = vpop.eup %7100  ;;  %1981 = vst.msk [vmem:[#allocation3 + $0xc8] sm:$0xff] %vm544_vm0, %v1532_v9  ;;  %7120 = vrsqrt.f32 %v1466_v38  ;;  %v2573_v16 = vld [vmem:[#allocation4 + $0x68] sm:$0xff]  ;;  %v1941_v23 = vmul.f32 %v7099_v10, %v9983_v12  ;;  %v2084_v1 = vadd.f32 %v2083_v40, %v2082_v18 }
 0x203   : > { %v1843_v26 = vpop.f32.mrb[79].mxu0  ;;  %v7103_v25 = vpop.eup %7102  ;;  %1980 = vst.msk [vmem:[#allocation3 + $0xc0] sm:$0xff] %vm544_vm0, %v1531_v32  ;;  %2748 = vxpose.xlu1.b32.cont [7/8] (short) (narrow) %v2573_v16, 32  ;;  %v2594_v36 = vsel %vm544_vm0, %v2573_v16, 0.0  ;;  %v1940_v5 = vmul.f32 %v7101_v4, %v9984_v14  ;;  %7122 = vrsqrt.f32 %v6496_v55  ;;  %v9990_v10 = vld [vmem:[#allocation22_spill] sm:$0xff]  ;;  %v9991_v55 = vld [vmem:[#allocation20_spill] sm:$0xff] }
 0x204   : > { %v7105_v52 = vpop.eup %7104  ;;  %v1534_v8 = vmul.f32 %v7103_v25, %v9985_v50  ;;  %v2595_v0 = vadd.f32 %v2594_v36, %v2593_v41  ;;  %2005 = vst.msk [vmem:[#allocation4 + $0x88] sm:$0xff] %vm544_vm0, %v1941_v23  ;;  %v2066_v13 = vld [vmem:[#allocation4 + $0x60] sm:$0xff]  ;;  %7124 = vrsqrt.f32 %v1843_v26  ;;  %v2086_v51 = vadd.f32 %v2085_v58, %v2084_v1  ;;  %v9992_v26 = vld [vmem:[#allocation23_spill] sm:$0xff] }
 0x205   : > { %v7107_v61 = vpop.eup %7106  ;;  %v1533_v21 = vmul.f32 %v7105_v52, %v9986_v30  ;;  %2241 = vxpose.xlu0.b32.cont [7/8] (short) (narrow) %v2066_v13, 32  ;;  %v2087_v43 = vsel %vm544_vm0, %v2066_v13, 0.0  ;;  %2004 = vst.msk [vmem:[#allocation4 + $0x80] sm:$0xff] %vm544_vm0, %v1940_v5  ;;  %v6499_v28 = vpop.f32.mrb[80].mxu0  ;;  %v9993_v36 = vld [vmem:[#allocation21_spill] sm:$0xff] }
 0x206   : > { %v7109_v35 = vpop.eup %7108  ;;  %1983 = vst.msk [vmem:[#allocation3 + $0xd8] sm:$0xff] %vm544_vm0, %v1534_v8  ;;  %v1943_v39 = vmul.f32 %v7107_v61, %v9987_v47  ;;  %v2574_v54 = vld [vmem:[#allocation4 + $0x78] sm:$0xff]  ;;  %7126 = vrsqrt.f32 %v6499_v28  ;;  %v1853_v45 = vpop.f32.mrb[81].mxu0  ;;  %v2088_v3 = vadd.f32 %v2087_v43, %v2086_v51  ;;  %v9994_v47 = vld [vmem:[#allocation26_spill] sm:$0xff] }
 0x207   : > { %v7111_v7 = vpop.eup %7110  ;;  %1982 = vst.msk [vmem:[#allocation3 + $0xd0] sm:$0xff] %vm544_vm0, %v1533_v21  ;;  %v1942_v62 = vmul.f32 %v7109_v35, %v9988_v34  ;;  %2749 = vxpose.xlu1.b32.end [8/8] (short) (narrow) %v2574_v54, 32  ;;  %v2596_v11 = vsel %vm544_vm0, %v2574_v54, 0.0  ;;  %7128 = vrsqrt.f32 %v1853_v45 }
 0x208   : > { %v7113_v29 = vpop.eup %7112  ;;  %v1536_v60 = vmul.f32 %v7111_v7, %v7891_v27  ;;  %2007 = vst.msk [vmem:[#allocation4 + $0x98] sm:$0xff] %vm544_vm0, %v1943_v39  ;;  %v2597_v37 = vadd.f32 %v2596_v11, %v2595_v0  ;;  %v2067_v57 = vld [vmem:[#allocation4 + $0x70] sm:$0xff] }
 0x209   : > { %v7115_v44 = vpop.eup %7114  ;;  %v1535_v24 = vmul.f32 %v7113_v29, %v9989_v53  ;;  %2006 = vst.msk [vmem:[#allocation4 + $0x90] sm:$0xff] %vm544_vm0, %v1942_v62  ;;  %2242 = vxpose.xlu0.b32.end [8/8] (short) (narrow) %v2067_v57, 32  ;;  %v2089_v33 = vsel %vm544_vm0, %v2067_v57, 0.0  ;;  %v6502_v42 = vpop.f32.mrb[82].mxu0 }
 0x20a   : > { %v7117_v2 = vpop.eup %7116  ;;  %1985 = vst.msk [vmem:[#allocation3 + $0xe8] sm:$0xff] %vm544_vm0, %v1536_v60  ;;  %v2598_v6 = vrot.slane %v2597_v37, 4  ;;  %v1945_v27 = vmul.f32 %v7115_v44, %v7921_v19  ;;  %v2090_v49 = vadd.f32 %v2089_v33, %v2088_v3  ;;  %7130 = vrsqrt.f32 %v6502_v42  ;;  %v1863_v17 = vpop.f32.mrb[83].mxu0 }
 0x20b   : > { %v7119_v9 = vpop.eup %7118  ;;  %1984 = vst.msk [vmem:[#allocation3 + $0xe0] sm:$0xff] %vm544_vm0, %v1535_v24  ;;  %v1944_v41 = vmul.f32 %v7117_v2, %v7901_v15  ;;  %7132 = vrsqrt.f32 %v1863_v17  ;;  %v3584_v31 = vld [vmem:[#allocation4 + $0x88] sm:$0xff]  ;;  %v9995_v24 = vld [vmem:[#allocation25_spill] sm:$0xff] }
 0x20c   : > { %v7121_v22 = vpop.eup %7120  ;;  %v1538_v48 = vmul.f32 %v7119_v9, %v9990_v10  ;;  %v2599_v32 = vadd.f32 %v2598_v6, %v2597_v37  ;;  %2009 = vst.msk [vmem:[#allocation4 + $0xa8] sm:$0xff] %vm544_vm0, %v1945_v27  ;;  %v2091_v40 = vrot.slane %v2090_v49, 4  ;;  %3759 = vxpose.xlu1.b32.start [1/8] (short) (narrow) %v3584_v31, 32  ;;  %v3075_v38 = vld [vmem:[#allocation4 + $0x80] sm:$0xff]  ;;  %v3600_v16 = vsel %vm544_vm0, %v3584_v31, 0.0  ;;  %v8248_v10 = vld [vmem:[#allocation3 + $0x10] sm:$0xff] }
 0x20d   : > { %v7123_v19 = vpop.eup %7122  ;;  %v1537_v4 = vmul.f32 %v7121_v22, %v9991_v55  ;;  %2008 = vst.msk [vmem:[#allocation4 + $0xa0] sm:$0xff] %vm544_vm0, %v1944_v41  ;;  %v6505_v18 = vpop.f32.mrb[84].mxu0  ;;  %3251 = vxpose.xlu0.b32.start [1/8] (short) (narrow) %v3075_v38, 32  ;;  %v3092_v1 = vsel %vm544_vm0, %v3075_v38, 0.0  ;;  %v9996_v41 = vld [vmem:[#allocation30_spill] sm:$0xff]  ;;  %v8246_v22 = vld [vmem:[#allocation3] sm:$0xff] }
 0x20e   : > { %v7125_v15 = vpop.eup %7124  ;;  %1987 = vst.msk [vmem:[#allocation3 + $0xf8] sm:$0xff] %vm544_vm0, %v1538_v48  ;;  %v2600_v12 = vrot.slane %v2599_v32, 2  ;;  %v2092_v23 = vadd.f32 %v2091_v40, %v2090_v49  ;;  %v1947_v25 = vmul.f32 %v7123_v19, %v9992_v26  ;;  %7134 = vrsqrt.f32 %v6505_v18  ;;  %v1873_v58 = vpop.f32.mrb[85].mxu0  ;;  %v9997_v40 = vld [vmem:[#allocation28_spill] sm:$0xff] }
 0x20f   : > { %1986 = vst.msk [vmem:[#allocation3 + $0xf0] sm:$0xff] %vm544_vm0, %v1537_v4  ;;  %v1946_v14 = vmul.f32 %v7125_v15, %v9993_v36  ;;  %7136 = vrsqrt.f32 %v1873_v58  ;;  %v3585_v5 = vld [vmem:[#allocation4 + $0x98] sm:$0xff]  ;;  %v8257_v4 = vld [vmem:[#allocation3 + $0x20] sm:$0xff] }
 0x210   : > { %v7127_v52 = vpop.eup %7126  ;;  %v2601_v50 = vadd.f32 %v2600_v12, %v2599_v32  ;;  %v2093_v8 = vrot.slane %v2092_v23, 2  ;;  %2011 = vst.msk [vmem:[#allocation4 + $0xb8] sm:$0xff] %vm544_vm0, %v1947_v25  ;;  %3760 = vxpose.xlu1.b32.cont [2/8] (short) (narrow) %v3585_v5, 32  ;;  %v3601_v0 = vsel %vm544_vm0, %v3585_v5, 0.0  ;;  %v3076_v13 = vld [vmem:[#allocation4 + $0x90] sm:$0xff]  ;;  %v9998_v58 = vld [vmem:[#allocation29_spill] sm:$0xff] }
 0x211   : > { %v7129_v61 = vpop.eup %7128  ;;  %2010 = vst.msk [vmem:[#allocation4 + $0xb0] sm:$0xff] %vm544_vm0, %v1946_v14  ;;  %v1949_v30 = vmul.f32 %v7127_v52, %v7968_v56  ;;  %v6508_v21 = vpop.f32.mrb[86].mxu0  ;;  %v3602_v43 = vadd.f32 %v3601_v0, %v3600_v16  ;;  %3252 = vxpose.xlu0.b32.cont [2/8] (short) (narrow) %v3076_v13, 32  ;;  %v3093_v28 = vsel %vm544_vm0, %v3076_v13, 0.0  ;;  %v7206_v14 = vld [vmem:[#allocation5 + $0x30] sm:$0xff]  ;;  %v7207_v5 = vld [vmem:[#allocation5 + $0x20] sm:$0xff] }
 0x212   : > { %v2602_v35 = vrot.slane %v2601_v50, 1  ;;  %v2094_v51 = vadd.f32 %v2093_v8, %v2092_v23  ;;  %v1948_v39 = vmul.f32 %v7129_v61, %v9994_v47  ;;  %7138 = vrsqrt.f32 %v6508_v21  ;;  %v1883_v54 = vpop.f32.mrb[87].mxu0  ;;  %v9999_v8 = vld [vmem:[#allocation27_spill] sm:$0xff]  ;;  %v10000_v0 = vld [vmem:[#allocation24_spill] sm:$0xff] }
 0x213   : > { %2013 = vst.msk [vmem:[#allocation4 + $0xc8] sm:$0xff] %vm544_vm0, %v1949_v30  ;;  %7140 = vrsqrt.f32 %v1883_v54  ;;  %v3094_v45 = vadd.f32 %v3093_v28, %v3092_v1  ;;  %v3586_v7 = vld [vmem:[#allocation4 + $0xa8] sm:$0xff]  ;;  %v6869_v52 = vpack.c.bf16 %v7206_v14, %v7207_v5  ;;  %v8270_v13 = vld [vmem:[#allocation3 + $0x30] sm:$0xff]  ;;  %v8336_v14 = vld [vmem:[%s9891_s1] sm:$0xff] }
 0x214   : > { %v7131_v34 = vpop.eup %7130  ;;  %v2603_v62 = vadd.f32 %v2602_v35, %v2601_v50  ;;  %v2095_v11 = vrot.slane %v2094_v51, 1  ;;  %2012 = vst.msk [vmem:[#allocation4 + $0xc0] sm:$0xff] %vm544_vm0, %v1948_v39  ;;  %3761 = vxpose.xlu1.b32.cont [3/8] (short) (narrow) %v3586_v7, 32  ;;  %v3603_v56 = vsel %vm544_vm0, %v3586_v7, 0.0  ;;  %v3077_v29 = vld [vmem:[#allocation4 + $0xa0] sm:$0xff]  ;;  %v7208_v54 = vld [vmem:[#allocation5 + $0x50] sm:$0xff] }
 0x215   : > { %v7133_v60 = vpop.eup %7132  ;;  %v1951_v3 = vmul.f32 %v7131_v34, %v7965_v46  ;;  %v3604_v37 = vadd.f32 %v3603_v56, %v3602_v43  ;;  %3253 = vxpose.xlu0.b32.cont [3/8] (short) (narrow) %v3077_v29, 32  ;;  %v3095_v57 = vsel %vm544_vm0, %v3077_v29, 0.0  ;;  %v8275_v43 = vld [vmem:[#allocation3 + $0x40] sm:$0xff] }
 0x216   : > { %v8233_v44 = vadd.f32 1e-06, %v2603_v62  ;;  %v2096_v53 = vadd.f32 %v2095_v11, %v2094_v51  ;;  %v1950_v33 = vmul.f32 %v7133_v60, %v9995_v24  ;;  %v3096_v42 = vadd.f32 %v3095_v57, %v3094_v45  ;;  %v7209_v45 = vld [vmem:[#allocation5 + $0x40] sm:$0xff]  ;;  %v8284_v62 = vld [vmem:[#allocation3 + $0x50] sm:$0xff] }
 0x217   : > { %2015 = vst.msk [vmem:[#allocation4 + $0xd8] sm:$0xff] %vm544_vm0, %v1951_v3  ;;  %v3587_v2 = vld [vmem:[#allocation4 + $0xb8] sm:$0xff]  ;;  %v6873_v7 = vpack.c.bf16 %v7208_v54, %v7209_v45  ;;  %v8288_v29 = vld [vmem:[#allocation3 + $0x60] sm:$0xff]  ;;  %v7210_v24 = vld [vmem:[#allocation5 + $0x70] sm:$0xff] }
 0x218   : > { %v7135_v6 = vpop.eup %7134  ;;  %v8237_v27 = vadd.f32 1e-06, %v2096_v53  ;;  %2014 = vst.msk [vmem:[#allocation4 + $0xd0] sm:$0xff] %vm544_vm0, %v1950_v33  ;;  %3762 = vxpose.xlu1.b32.cont [4/8] (short) (narrow) %v3587_v2, 32  ;;  %v3605_v46 = vsel %vm544_vm0, %v3587_v2, 0.0  ;;  %v3078_v49 = vld [vmem:[#allocation4 + $0xb0] sm:$0xff]  ;;  %v8243_v17 = vmul.f32 %v8233_v44, %v8092_v20 }
 0x219   : > { %v7137_v9 = vpop.eup %7136  ;;  %v1953_v31 = vmul.f32 %v7135_v6, %v9996_v41  ;;  %v3606_v48 = vadd.f32 %v3605_v46, %v3604_v37  ;;  %3254 = vxpose.xlu0.b32.cont [4/8] (short) (narrow) %v3078_v49, 32  ;;  %v3097_v32 = vsel %vm544_vm0, %v3078_v49, 0.0  ;;  %v7211_v33 = vld [vmem:[#allocation5 + $0x60] sm:$0xff]  ;;  %v8296_v6 = vld [vmem:[#allocation3 + $0x70] sm:$0xff]  ;;  %v8375_v54 = vld [vmem:[#allocation3 + $0x28] sm:$0xff] }
 0x21a   : > { %v1952_v38 = vmul.f32 %v7137_v9, %v9997_v40  ;;  %v2098_v19 = vmul.f32 %v8237_v27, %v8246_v22  ;;  %v2099_v20 = vmul.f32 %v8237_v27, %v8248_v10  ;;  %v3588_v55 = vld [vmem:[#allocation4 + $0xc8] sm:$0xff]  ;;  %v2100_v15 = vmul.f32 %v8237_v27, %v8257_v4 }
 0x21b   : > { %2017 = vst.msk [vmem:[#allocation4 + $0xe8] sm:$0xff] %vm544_vm0, %v1953_v31  ;;  %v3079_v18 = vld [vmem:[#allocation4 + $0xc0] sm:$0xff]  ;;  %v3098_v12 = vadd.f32 %v3097_v32, %v3096_v42  ;;  %v3607_v23 = vsel %vm544_vm0, %v3588_v55, 0.0  ;;  %v2101_v21 = vmul.f32 %v8237_v27, %v8270_v13  ;;  %v2102_v51 = vmul.f32 %v8237_v27, %v8275_v43 }
 0x21c   : > { %v7139_v16 = vpop.eup %7138  ;;  %2016 = vst.msk [vmem:[#allocation4 + $0xe0] sm:$0xff] %vm544_vm0, %v1952_v38  ;;  %6517 = vmatprep.mubr.msk.f32.mxu1 %vm544_vm0, %v2098_v19  ;;  %3763 = vxpose.xlu1.b32.cont [5/8] (short) (narrow) %v3588_v55, 32  ;;  %v3099_v26 = vsel %vm544_vm0, %v3079_v18, 0.0  ;;  %v3608_v50 = vadd.f32 %v3607_v23, %v3606_v48  ;;  %v2103_v56 = vmul.f32 %v8237_v27, %v8284_v62 }
 0x21d   : > { %v7141_v25 = vpop.eup %7140  ;;  %v1955_v36 = vmul.f32 %v7139_v16, %v9998_v58  ;;  %6518 = vmatmul.mubr.msk.f32.vlgmr.msra.gmra.mrb[72].mxu1 %vm544_vm0, %v2099_v20  ;;  %3255 = vxpose.xlu0.b32.cont [5/8] (short) (narrow) %v3079_v18, 32  ;;  %v3100_v61 = vadd.f32 %v3099_v26, %v3098_v12  ;;  %v2104_v37 = vmul.f32 %v8237_v27, %v8288_v29 }
 0x21e   : > { %v1954_v1 = vmul.f32 %v7141_v25, %v9999_v8  ;;  %6868 = vmatpush3.bf16.msra.mxu1 %v10000_v0  ;;  %6520 = vmatprep.mubr.msk.f32.mxu1 %vm544_vm0, %v2100_v15  ;;  %v3589_v30 = vld [vmem:[#allocation4 + $0xd8] sm:$0xff]  ;;  %v6877_v42 = vpack.c.bf16 %v7210_v24, %v7211_v33  ;;  %v2105_v49 = vmul.f32 %v8237_v27, %v8296_v6 }
 0x21f   : > { %2019 = vst.msk [vmem:[#allocation4 + $0xf8] sm:$0xff] %vm544_vm0, %v1955_v36  ;;  %6870 = vmatprep.subr.bf16.mxu1 %v6869_v52  ;;  %v3609_v28 = vsel %vm544_vm0, %v3589_v30, 0.0  ;;  %v3080_v35 = vld [vmem:[#allocation4 + $0xd0] sm:$0xff]  ;;  %v8342_v8 = vld [vmem:[%s9891_s1 + $0x18] sm:$0xff] }
 0x220   : > { %2018 = vst.msk [vmem:[#allocation4 + $0xf0] sm:$0xff] %vm544_vm0, %v1954_v1  ;;  %3764 = vxpose.xlu1.b32.cont [6/8] (short) (narrow) %v3589_v30, 32  ;;  %v3610_v47 = vadd.f32 %v3609_v28, %v3608_v50  ;;  %v3101_v39 = vsel %vm544_vm0, %v3080_v35, 0.0  ;;  %v10001_v28 = vld [vmem:[#allocation7_spill] sm:$0xff]  ;;  %v8391_v33 = vld [vmem:[#allocation3 + $0x58] sm:$0xff] }
 0x221   : > { %6521 = vmatmul.mubr.msk.f32.gmra.mrb[74].mxu1 %vm544_vm0, %v2101_v21  ;;  %3256 = vxpose.xlu0.b32.cont [6/8] (short) (narrow) %v3080_v35, 32  ;;  %v3102_v34 = vadd.f32 %v3101_v39, %v3100_v61  ;;  %v8348_v61 = vld [vmem:[%s9891_s1 + $0x10] sm:$0xff]  ;;  %v10002_v35 = vld [vmem:[#allocation8_spill] sm:$0xff] }
 0x222   : > { %6872 = vmatpush3.bf16.msra.mxu1 %v6869_v52  ;;  %6523 = vmatprep.mubr.msk.f32.mxu1 %vm544_vm0, %v2102_v51  ;;  %v3590_v11 = vld [vmem:[#allocation4 + $0xe8] sm:$0xff]  ;;  %v7216_v51 = vld [vmem:[#allocation5 + $0x18] sm:$0xff] }
 0x223   : > { %6874 = vmatprep.subr.bf16.mxu1 %v6873_v7  ;;  %v3611_v60 = vsel %vm544_vm0, %v3590_v11, 0.0  ;;  %v3081_v3 = vld [vmem:[#allocation4 + $0xe0] sm:$0xff] }
 0x224   : > { %3765 = vxpose.xlu1.b32.cont [7/8] (short) (narrow) %v3590_v11, 32  ;;  %v3612_v57 = vadd.f32 %v3611_v60, %v3610_v47  ;;  %v3103_v53 = vsel %vm544_vm0, %v3081_v3, 0.0  ;;  %v7217_v47 = vld [vmem:[#allocation5 + $0x8] sm:$0xff] }
 0x225   : > { %6524 = vmatmul.mubr.msk.f32.gmra.mrb[76].mxu1 %vm544_vm0, %v2103_v56  ;;  %3257 = vxpose.xlu0.b32.cont [7/8] (short) (narrow) %v3081_v3, 32  ;;  %v3104_v2 = vadd.f32 %v3103_v53, %v3102_v34  ;;  %v6897_v39 = vpack.c.bf16 %v7216_v51, %v7217_v47  ;;  %v7219_v11 = vld [vmem:[#allocation5 + $0x28] sm:$0xff]  ;;  %v8431_v51 = vld [vmem:[#allocation3 + $0xd0] sm:$0xff] }
 0x226   : > { %6876 = vmatpush3.bf16.msra.mxu1 %v6873_v7  ;;  %6526 = vmatprep.mubr.msk.f32.mxu1 %vm544_vm0, %v2104_v37  ;;  %v3591_v46 = vld [vmem:[#allocation4 + $0xf8] sm:$0xff]  ;;  %v2607_v7 = vmul.f32 %v8233_v44, %v8375_v54  ;;  %v8385_v60 = vld [vmem:[#allocation3 + $0x48] sm:$0xff] }
 0x227   : > { %6878 = vmatprep.subr.bf16.mxu1 %v6877_v42  ;;  %v3613_v9 = vsel %vm544_vm0, %v3591_v46, 0.0  ;;  %v3082_v41 = vld [vmem:[#allocation4 + $0xf0] sm:$0xff]  ;;  %v2609_v37 = vmul.f32 %v8233_v44, %v8385_v60  ;;  %v7221_v53 = vld [vmem:[#allocation5 + $0x48] sm:$0xff] }
 0x228   : > { %3766 = vxpose.xlu1.b32.end [8/8] (short) (narrow) %v3591_v46, 32  ;;  %v8301_v31 = vadd.f32 %v3613_v9, %v3612_v57  ;;  %v3105_v48 = vsel %vm544_vm0, %v3082_v41, 0.0  ;;  %v7220_v57 = vld [vmem:[#allocation5 + $0x58] sm:$0xff] }
 0x229   : > { %6527 = vmatmul.mubr.msk.f32.gmra.mrb[78].mxu1 %vm544_vm0, %v2105_v49  ;;  %3258 = vxpose.xlu0.b32.end [8/8] (short) (narrow) %v3082_v41, 32  ;;  %v3106_v32 = vadd.f32 %v3105_v48, %v3104_v2  ;;  %v6905_v24 = vpack.c.bf16 %v7220_v57, %v7221_v53  ;;  %v2610_v2 = vmul.f32 %v8233_v44, %v8391_v33  ;;  %v7222_v9 = vld [vmem:[#allocation5 + $0x78] sm:$0xff]  ;;  %v7223_v41 = vld [vmem:[#allocation5 + $0x68] sm:$0xff] }
 0x22a   : > { %6880 = vmatpush3.bf16.msra.mxu1 %v6877_v42  ;;  %v6909_v48 = vpack.c.bf16 %v7222_v9, %v7223_v41 }
 0x26b   : > { %v2758_v34 = vpop.trf.xlu1 }
 0x26d   : > { %v2251_v40 = vpop.trf.xlu0 }
 0x26e   : > { %6545 = vmatprep.mubr.msk.f32.mxu1 %vm2267_vm1, %v2251_v40 }
 0x26f   : > { %v2759_v42 = vpop.trf.xlu1 }
 0x271   : > { %v2252_v38 = vpop.trf.xlu0 }
 0x272   : > { %6546 = vmatmul.mubr.msk.f32.vlgmr.msra.gmra.mrb[80].mxu1 %vm2267_vm1, %v2252_v38 }
 0x275   : > { %v2253_v27 = vpop.trf.xlu0 }
 0x276   : > { %6548 = vmatprep.mubr.msk.f32.mxu1 %vm2267_vm1, %v2253_v27  ;;  %v2760_v27 = vpop.trf.xlu1 }
 0x279   : > { %v2254_v19 = vpop.trf.xlu0 }
 0x27a   : > { %6549 = vmatmul.mubr.msk.f32.gmra.mrb[82].mxu1 %vm2267_vm1, %v2254_v19 }
 0x27b   : > { %6559 = vmatprep.mubr.msk.f32.mxu1 %vm544_vm0, %v8246_v22  ;;  %v8330_v22 = vld [vmem:[%s9891_s1 + $0x8] sm:$0xff] }
 0x2f0   : > { %v8311_v20 = vpop.f32.mrb[72].mxu1 }
 0x2f1   : > { %v8313_v55 = vpop.f32.mrb[73].mxu1 }
 0x2f4   : > { %v8315_v18 = vpop.f32.mrb[74].mxu1 }
 0x2f5   : > { %v8317_v16 = vpop.f32.mrb[75].mxu1 }
 0x2f8   : > { %v8319_v15 = vpop.f32.mrb[76].mxu1 }
 0x2f9   : > { %v8321_v12 = vpop.f32.mrb[77].mxu1  ;;  %v2222_v53 = vadd.f32 64.0, %v8319_v15 }
 0x2fc   : > { %v8323_v23 = vpop.f32.mrb[78].mxu1 }
 0x2fd   : > { %v8325_v26 = vpop.f32.mrb[79].mxu1 }
 0x345   : > { %v6547_v25 = vpop.f32.mrb[80].mxu1 }
 0x346   : > { %v2366_v58 = vmul.f32 %v8330_v22, %v6547_v25  ;;  %v2346_v36 = vpop.f32.mrb[81].mxu1  ;;  %v2761_v25 = vpop.trf.xlu1 }
 0x347   : > { %v2365_v5 = vmul.f32 %v8336_v14, %v2346_v36  ;;  %v8415_v36 = vld [vmem:[#allocation3 + $0x90] sm:$0xff] }
 0x349   : > { %v6881_v52 = vpack.c.bf16 %v2366_v58, %v2365_v5 }
 0x34b   : > { %6882 = vmatprep.subr.bf16.mxu1 %v6881_v52 }
 0x34c   : > { %6884 = vmatpush3.bf16.msra.mxu1 %v6881_v52  ;;  %v8418_v52 = vld [vmem:[#allocation3 + $0xa0] sm:$0xff] }
 0x34d   : > { %v6550_v50 = vpop.f32.mrb[82].mxu1 }
 0x34e   : > { %v2368_v1 = vmul.f32 %v8342_v8, %v6550_v50  ;;  %v2356_v0 = vpop.f32.mrb[83].mxu1 }
 0x34f   : > { %v2367_v30 = vmul.f32 %v8348_v61, %v2356_v0 }
 0x351   : > { %v6885_v21 = vpack.c.bf16 %v2368_v1, %v2367_v30  ;;  %v8423_v1 = vld [vmem:[#allocation3 + $0xb0] sm:$0xff]  ;;  %v8426_v30 = vld [vmem:[#allocation3 + $0xc0] sm:$0xff] }
 0x353   : > { %6886 = vmatprep.subr.bf16.mxu1 %v6885_v21 }
 0x354   : > { %6888 = vmatpush3.bf16.msra.mxu1 %v6885_v21 }
 0x355   : > { %6890 = vmatprep.subr.bf16.mxu1 %v10001_v28 }
 0x357   : > { %6560 = vmatmul.mubr.msk.f32.vlgmr.msra.gmra.mrb[84].mxu1 %vm544_vm0, %v8248_v10  ;;  %v3107_v10 = vrot.slane %v3106_v32, 4 }
 0x358   : > { %6562 = vmatprep.mubr.msk.f32.mxu1 %vm544_vm0, %v8257_v4  ;;  %6892 = vmatpush3.bf16.msra.mxu1 %v10001_v28 }
 0x359   : > { %6894 = vmatprep.subr.bf16.mxu1 %v10002_v35  ;;  %v3108_v4 = vadd.f32 %v3107_v10, %v3106_v32  ;;  %v8401_v32 = vld [vmem:[#allocation3 + $0x78] sm:$0xff] }
 0x35a   : > { %v2612_v40 = vmul.f32 %v8233_v44, %v8401_v32 }
 0x35b   : > { %6563 = vmatmul.mubr.msk.f32.gmra.mrb[86].mxu1 %vm544_vm0, %v8270_v13  ;;  %v8371_v13 = vld [vmem:[#allocation3 + $0x18] sm:$0xff]  ;;  %v3109_v45 = vrot.slane %v3108_v4, 2 }
 0x35c   : > { %6565 = vmatprep.mubr.msk.f32.mxu1 %vm544_vm0, %v8275_v43  ;;  %6896 = vmatpush3.bf16.msra.mxu1 %v10002_v35  ;;  %v2606_v43 = vmul.f32 %v8233_v44, %v8371_v13 }
 0x35d   : > { %6898 = vmatprep.subr.bf16.mxu1 %v6897_v39  ;;  %v3110_v3 = vadd.f32 %v3109_v45, %v3108_v4  ;;  %v8439_v4 = vld [vmem:[#allocation3 + $0xf0] sm:$0xff] }
 0x35e   : > { %v10003_v45 = vld [vmem:[#allocation31_spill] sm:$0xff] }
 0x35f   : > { %6566 = vmatmul.mubr.msk.f32.gmra.mrb[88].mxu1 %vm544_vm0, %v8284_v62  ;;  %v7218_v62 = vld [vmem:[#allocation5 + $0x38] sm:$0xff]  ;;  %v3111_v46 = vrot.slane %v3110_v3, 1 }
 0x360   : > { %6568 = vmatprep.mubr.msk.f32.mxu1 %vm544_vm0, %v8288_v29  ;;  %v6901_v56 = vpack.c.bf16 %v7218_v62, %v7219_v11  ;;  %v2202_v11 = vadd.f32 64.0, %v8311_v20  ;;  %v2232_v20 = vadd.f32 64.0, %v8323_v23 }
 0x361   : > { %v3112_v38 = vadd.f32 %v3111_v46, %v3110_v3  ;;  %v2212_v3 = vadd.f32 64.0, %v8315_v18  ;;  %v2227_v18 = vadd.f32 64.0, %v8325_v26 }
 0x362   : > { %7142 = vrcp.f32 %v2202_v11 }
 0x363   : > { %6569 = vmatmul.mubr.msk.f32.gmra.mrb[90].mxu1 %vm544_vm0, %v8296_v6  ;;  %v8395_v6 = vld [vmem:[#allocation3 + $0x68] sm:$0xff]  ;;  %v3113_v19 = vadd.f32 1e-06, %v3112_v38 }
 0x364   : > { %6579 = vmatprep.mubr.msk.f32.mxu1 %vm544_vm0, %v8243_v17  ;;  %v8381_v17 = vld [vmem:[#allocation3 + $0x38] sm:$0xff]  ;;  %v2611_v49 = vmul.f32 %v8233_v44, %v8395_v6 }
 0x365   : > { %v2608_v29 = vmul.f32 %v8233_v44, %v8381_v17  ;;  %v3066_v44 = vld [vmem:[#allocation3 + $0x80] sm:$0xff]  ;;  %v3115_v5 = vmul.f32 %v3113_v19, %v8415_v36  ;;  %v3116_v50 = vmul.f32 %v3113_v19, %v8418_v52  ;;  %v3117_v0 = vmul.f32 %v3113_v19, %v8423_v1 }
 0x366   : > { %v3114_v58 = vmul.f32 %v3113_v19, %v3066_v44  ;;  %v3118_v21 = vmul.f32 %v3113_v19, %v8426_v30  ;;  %v3119_v47 = vmul.f32 %v3113_v19, %v8431_v51 }
 0x367   : > { %6580 = vmatmul.mubr.msk.f32.vlgmr.msra.gmra.mrb[92].mxu1 %vm544_vm0, %v2606_v43  ;;  %v3121_v43 = vmul.f32 %v3113_v19, %v8439_v4 }
 0x368   : > { %6900 = vmatpush3.bf16.msra.mxu1 %v6897_v39  ;;  %6582 = vmatprep.mubr.msk.f32.mxu1 %vm544_vm0, %v2607_v7  ;;  %v8434_v39 = vld [vmem:[#allocation3 + $0xe0] sm:$0xff]  ;;  %v2384_v7 = vrot.slane %v10003_v45, 4 }
 0x369   : > { %6902 = vmatprep.subr.bf16.mxu1 %v6901_v56  ;;  %v3120_v10 = vmul.f32 %v3113_v19, %v8434_v39 }
 0x36b   : > { %6583 = vmatmul.mubr.msk.f32.gmra.mrb[94].mxu1 %vm544_vm0, %v2608_v29 }
 0x36c   : > { %6904 = vmatpush3.bf16.msra.mxu1 %v6901_v56  ;;  %6585 = vmatprep.mubr.msk.f32.mxu1 %vm544_vm0, %v2609_v37  ;;  %v2197_v56 = vadd.f32 64.0, %v8313_v55  ;;  %v2207_v37 = vadd.f32 64.0, %v8317_v16  ;;  %v7143_v16 = vpop.eup %7142 }
 0x36d   : > { %6906 = vmatprep.subr.bf16.mxu1 %v6905_v24 }
 0x36e   : > { %7144 = vrcp.f32 %v2197_v56 }
 0x36f   : > { %6586 = vmatmul.mubr.msk.f32.gmra.mrb[96].mxu1 %vm544_vm0, %v2610_v2  ;;  %7146 = vrcp.f32 %v2212_v3 }
 0x370   : > { %6908 = vmatpush3.bf16.msra.mxu1 %v6905_v24  ;;  %6588 = vmatprep.mubr.msk.f32.mxu1 %vm544_vm0, %v2611_v49  ;;  %7148 = vrcp.f32 %v2207_v37  ;;  %v2217_v24 = vadd.f32 64.0, %v8321_v12  ;;  %v2536_v49 = vld [vmem:[%s7401_s26 + $0x10] sm:$0xff] }
 0x371   : > { %6910 = vmatprep.subr.bf16.mxu1 %v6909_v48  ;;  %7150 = vrcp.f32 %v2222_v53 }
 0x372   : > { %7152 = vrcp.f32 %v2217_v24 }
 0x373   : > { %6589 = vmatmul.mubr.msk.f32.gmra.mrb[98].mxu1 %vm544_vm0, %v2612_v40  ;;  %7154 = vrcp.f32 %v2232_v20 }
 0x374   : > { %6912 = vmatpush3.bf16.msra.mxu1 %v6909_v48  ;;  %6607 = vmatprep.mubr.msk.f32.mxu1 %vm2267_vm1, %v2758_v34  ;;  %v2385_v34 = vadd.f32 %v2384_v7, %v10003_v45  ;;  %v2535_v48 = vld [vmem:[%s7401_s26] sm:$0xff]  ;;  %7156 = vrcp.f32 %v2227_v18  ;;  %v2542_v18 = vld [vmem:[%s7401_s26 + $0x70] sm:$0xff] }
 0x375   : > { %6922 = vmatprep.subr.bf16.mxu1 %v10001_v28 }
 0x376   : > { %v2386_v62 = vrot.slane %v2385_v34, 2 }
 0x377   : > { %6608 = vmatmul.mubr.msk.f32.vlgmr.msra.gmra.mrb[100].mxu1 %vm2267_vm1, %v2759_v42 }
 0x378   : > { %6924 = vmatpush3.bf16.msra.mxu1 %v10001_v28  ;;  %6610 = vmatprep.mubr.msk.f32.mxu1 %vm2267_vm1, %v2760_v27  ;;  %v2387_v29 = vadd.f32 %v2386_v62, %v2385_v34  ;;  %v7145_v41 = vpop.eup %7144  ;;  %v2540_v34 = vld [vmem:[%s7401_s26 + $0x50] sm:$0xff] }
 0x379   : > { %6926 = vmatprep.subr.bf16.mxu1 %v10002_v35  ;;  %v7147_v19 = vpop.eup %7146 }
 0x37a   : > { %v2388_v57 = vrot.slane %v2387_v29, 1 }
 0x37b   : > { %6611 = vmatmul.mubr.msk.f32.gmra.mrb[102].mxu1 %vm2267_vm1, %v2761_v25  ;;  %v2538_v25 = vld [vmem:[%s7401_s26 + $0x30] sm:$0xff] }
 0x37c   : > { %6928 = vmatpush3.bf16.msra.mxu1 %v10002_v35  ;;  %6641 = vmatprep.mubr.msk.f32.mxu1 %vm544_vm0, %v3114_v58  ;;  %v2389_v42 = vadd.f32 %v2388_v57, %v2387_v29  ;;  %v7149_v58 = vpop.eup %7148  ;;  %v2539_v29 = vld [vmem:[%s7401_s26 + $0x40] sm:$0xff] }
 0x37d   : > { %v7151_v45 = vpop.eup %7150 }
 0x37e   : > { %v7153_v11 = vpop.eup %7152 }
 0x37f   : > { %6642 = vmatmul.mubr.msk.f32.vlgmr.msra.gmra.mrb[104].mxu1 %vm544_vm0, %v3115_v5  ;;  %v7155_v20 = vpop.eup %7154 }
 0x380   : > { %6644 = vmatprep.mubr.msk.f32.mxu1 %vm544_vm0, %v3116_v50  ;;  %v2537_v50 = vld [vmem:[%s7401_s26 + $0x20] sm:$0xff] }
 0x383   : > { %6645 = vmatmul.mubr.msk.f32.gmra.mrb[106].mxu1 %vm544_vm0, %v3117_v0 }
 0x384   : > { %6647 = vmatprep.mubr.msk.f32.mxu1 %vm544_vm0, %v3118_v21 }
 0x387   : > { %6648 = vmatmul.mubr.msk.f32.gmra.mrb[108].mxu1 %vm544_vm0, %v3119_v47 }
 0x388   : > { %6650 = vmatprep.mubr.msk.f32.mxu1 %vm544_vm0, %v3120_v10 }
 0x38b   : > { %6651 = vmatmul.mubr.msk.f32.gmra.mrb[110].mxu1 %vm544_vm0, %v3121_v43 }
 0x38c   : > { %6683 = vmatprep.mubr.msk.f32.mxu1 %vm544_vm0, %v3066_v44 }
 0x42a   : > { %v6561_v55 = vpop.f32.mrb[84].mxu1 }
 0x42b   : > { %v2486_v2 = vadd.f32 %v6561_v55, %v2389_v42  ;;  %v2480_v46 = vpop.f32.mrb[85].mxu1 }
 0x42c   : > { %v2481_v9 = vadd.f32 %v2480_v46, %v2389_v42  ;;  %v7157_v46 = vpop.eup %7156 }
 0x42d   : > { %v2528_v15 = vmul.f32 %v7143_v16, %v2486_v2 }
 0x42e   : > { %v2527_v12 = vmul.f32 %v7145_v41, %v2481_v9  ;;  %v6564_v40 = vpop.f32.mrb[86].mxu1 }
 0x42f   : > { %v2544_v38 = vadd.f32 %v2536_v49, %v2528_v15  ;;  %v2496_v23 = vadd.f32 %v6564_v40, %v2389_v42  ;;  %v2490_v27 = vpop.f32.mrb[87].mxu1  ;;  %v2541_v49 = vld [vmem:[%s7401_s26 + $0x60] sm:$0xff] }
 0x430   : > { %v2543_v26 = vadd.f32 %v2535_v48, %v2527_v12  ;;  %v2491_v44 = vadd.f32 %v2490_v27, %v2389_v42 }
 0x431   : > { %2552 = vst.msk [vmem:[#allocation2 + $0x10] sm:$0xff] %vm544_vm0, %v2544_v38  ;;  %v2530_v5 = vmul.f32 %v7147_v19, %v2496_v23 }
 0x432   : > { %2551 = vst.msk [vmem:[#allocation2] sm:$0xff] %vm544_vm0, %v2543_v26  ;;  %v2529_v0 = vmul.f32 %v7149_v58, %v2491_v44  ;;  %v6567_v21 = vpop.f32.mrb[88].mxu1 }
 0x433   : > { %v2546_v47 = vadd.f32 %v2538_v25, %v2530_v5  ;;  %v2506_v10 = vadd.f32 %v6567_v21, %v2389_v42  ;;  %v2500_v43 = vpop.f32.mrb[89].mxu1 }
 0x434   : > { %v2545_v7 = vadd.f32 %v2537_v50, %v2529_v0  ;;  %v2501_v62 = vadd.f32 %v2500_v43, %v2389_v42  ;;  %v3615_v0 = vrot.slane %v8301_v31, 4 }
 0x435   : > { %2554 = vst.msk [vmem:[#allocation2 + $0x30] sm:$0xff] %vm544_vm0, %v2546_v47  ;;  %v2532_v56 = vmul.f32 %v7151_v45, %v2506_v10 }
 0x436   : > { %2553 = vst.msk [vmem:[#allocation2 + $0x20] sm:$0xff] %vm544_vm0, %v2545_v7  ;;  %v2531_v3 = vmul.f32 %v7153_v11, %v2501_v62  ;;  %v6570_v37 = vpop.f32.mrb[90].mxu1  ;;  %v3616_v7 = vadd.f32 %v3615_v0, %v8301_v31  ;;  %v7224_v62 = vld [vmem:[#allocation5 + $0x90] sm:$0xff]  ;;  %v7225_v11 = vld [vmem:[#allocation5 + $0x80] sm:$0xff] }
 0x437   : > { %v2548_v57 = vadd.f32 %v2540_v34, %v2532_v56  ;;  %v2516_v53 = vadd.f32 %v6570_v37, %v2389_v42  ;;  %v2510_v24 = vpop.f32.mrb[91].mxu1  ;;  %v6929_v56 = vpack.c.bf16 %v7224_v62, %v7225_v11  ;;  %v8555_v62 = vld [vmem:[#allocation3 + $0xf8] sm:$0xff] }
 0x438   : > { %v2547_v55 = vadd.f32 %v2539_v29, %v2531_v3  ;;  %v2511_v2 = vadd.f32 %v2510_v24, %v2389_v42  ;;  %v3617_v3 = vrot.slane %v3616_v7, 2  ;;  %v7227_v24 = vld [vmem:[#allocation5 + $0xa0] sm:$0xff] }
 0x439   : > { %2556 = vst.msk [vmem:[#allocation2 + $0x50] sm:$0xff] %vm544_vm0, %v2548_v57  ;;  %v2534_v16 = vmul.f32 %v7155_v20, %v2516_v53  ;;  %v3267_v57 = vpop.trf.xlu0  ;;  %v7226_v53 = vld [vmem:[#allocation5 + $0xb0] sm:$0xff] }
 0x43a   : > { %2555 = vst.msk [vmem:[#allocation2 + $0x40] sm:$0xff] %vm544_vm0, %v2547_v55  ;;  %v2533_v9 = vmul.f32 %v7157_v46, %v2511_v2  ;;  %v8468_v41 = vpop.f32.mrb[92].mxu1  ;;  %v6933_v31 = vpack.c.bf16 %v7226_v53, %v7227_v24  ;;  %v3618_v55 = vadd.f32 %v3617_v3, %v3616_v7  ;;  %v7228_v2 = vld [vmem:[#allocation5 + $0xd0] sm:$0xff]  ;;  %v7229_v46 = vld [vmem:[#allocation5 + $0xc0] sm:$0xff] }
 0x43b   : > { %v2550_v15 = vadd.f32 %v2542_v18, %v2534_v16  ;;  %v8470_v48 = vpop.f32.mrb[93].mxu1  ;;  %v6937_v16 = vpack.c.bf16 %v7228_v2, %v7229_v46  ;;  %v2709_v24 = vadd.f32 64.0, %v8468_v41 }
 0x43c   : > { %v2549_v12 = vadd.f32 %v2541_v49, %v2533_v9 }
 0x43d   : > { %2558 = vst.msk [vmem:[#allocation2 + $0x70] sm:$0xff] %vm544_vm0, %v2550_v15  ;;  %v7230_v15 = vld [vmem:[#allocation5 + $0xf0] sm:$0xff]  ;;  %7158 = vrcp.f32 %v2709_v24 }
 0x43e   : > { %2557 = vst.msk [vmem:[#allocation2 + $0x60] sm:$0xff] %vm544_vm0, %v2549_v12  ;;  %v8474_v40 = vpop.f32.mrb[94].mxu1  ;;  %v7231_v12 = vld [vmem:[#allocation5 + $0xe0] sm:$0xff] }
 0x43f   : > { %v8476_v42 = vpop.f32.mrb[95].mxu1  ;;  %v2719_v2 = vadd.f32 64.0, %v8474_v40 }
 0x440   : > { %v2714_v46 = vadd.f32 64.0, %v8476_v42 }
 0x442   : > { %v8478_v38 = vpop.f32.mrb[96].mxu1 }
 0x443   : > { %v8480_v23 = vpop.f32.mrb[97].mxu1 }
 0x446   : > { %v8482_v27 = vpop.f32.mrb[98].mxu1 }
 0x447   : > { %v8484_v19 = vpop.f32.mrb[99].mxu1  ;;  %v2739_v41 = vadd.f32 64.0, %v8482_v27  ;;  %v7159_v42 = vpop.eup %7158 }
 0x448   : > { %v2734_v40 = vadd.f32 64.0, %v8484_v19 }
 0x44a   : > { %v6609_v26 = vpop.f32.mrb[100].mxu1 }
 0x44b   : > { %v2872_v25 = vmul.f32 %v8330_v22, %v6609_v26  ;;  %v2852_v44 = vpop.f32.mrb[101].mxu1 }
 0x44c   : > { %v2871_v58 = vmul.f32 %v8336_v14, %v2852_v44 }
 0x44e   : > { %v6913_v5 = vpack.c.bf16 %v2872_v25, %v2871_v58  ;;  %v6612_v50 = vpop.f32.mrb[102].mxu1 }
 0x44f   : > { %v2874_v21 = vmul.f32 %v8342_v8, %v6612_v50  ;;  %v2862_v47 = vpop.f32.mrb[103].mxu1  ;;  %v8539_v50 = vld [vmem:[#allocation3 + $0xb8] sm:$0xff] }
 0x450   : > { %v2873_v10 = vmul.f32 %v8348_v61, %v2862_v47  ;;  %6914 = vmatprep.subr.bf16.mxu0 %v6913_v5  ;;  %v8547_v47 = vld [vmem:[#allocation3 + $0xd8] sm:$0xff] }
 0x451   : > { %6916 = vmatpush3.bf16.msra.mxu0 %v6913_v5  ;;  %v8534_v5 = vld [vmem:[#allocation3 + $0xa8] sm:$0xff] }
 0x452   : > { %v6917_v43 = vpack.c.bf16 %v2874_v21, %v2873_v10  ;;  %v8491_v45 = vpop.f32.mrb[104].mxu1  ;;  %v8542_v21 = vld [vmem:[#allocation3 + $0xc8] sm:$0xff] }
 0x453   : > { %v8494_v34 = vpop.f32.mrb[105].mxu1 }
 0x454   : > { %6918 = vmatprep.subr.bf16.mxu0 %v6917_v43 }
 0x455   : > { %6920 = vmatpush3.bf16.msra.mxu0 %v6917_v43  ;;  %v8550_v43 = vld [vmem:[#allocation3 + $0xe8] sm:$0xff] }
 0x456   : > { %v8496_v29 = vpop.f32.mrb[106].mxu1  ;;  %6930 = vmatprep.subr.bf16.mxu0 %v6929_v56 }
 0x457   : > { %v8498_v37 = vpop.f32.mrb[107].mxu1 }
 0x458   : > { %6622 = vmatmul.mubr.msk.f32.vlgmr.msra.gmra.mrb[88].mxu0 %vm544_vm0, %v8371_v13  ;;  %v3268_v13 = vpop.trf.xlu0 }
 0x459   : > { %6624 = vmatprep.mubr.msk.f32.mxu0 %vm544_vm0, %v8375_v54  ;;  %6932 = vmatpush3.bf16.msra.mxu0 %v6929_v56  ;;  %v3619_v54 = vrot.slane %v3618_v55, 1  ;;  %v10004_v56 = vld [vmem:[#allocation32_spill] sm:$0xff] }
 0x45a   : > { %v8504_v20 = vpop.f32.mrb[108].mxu1  ;;  %6934 = vmatprep.subr.bf16.mxu0 %v6933_v31  ;;  %v2890_v3 = vrot.slane %v10004_v56, 4 }
 0x45b   : > { %v8506_v18 = vpop.f32.mrb[109].mxu1 }
 0x45c   : > { %6625 = vmatmul.mubr.msk.f32.gmra.mrb[90].mxu0 %vm544_vm0, %v8381_v17  ;;  %v6941_v17 = vpack.c.bf16 %v7230_v15, %v7231_v12  ;;  %v3269_v26 = vpop.trf.xlu0 }
 0x45d   : > { %6627 = vmatprep.mubr.msk.f32.mxu0 %vm544_vm0, %v8385_v60  ;;  %6936 = vmatpush3.bf16.msra.mxu0 %v6933_v31  ;;  %v3620_v60 = vadd.f32 %v3619_v54, %v3618_v55  ;;  %v2704_v31 = vadd.f32 64.0, %v8470_v48  ;;  %v2724_v54 = vadd.f32 64.0, %v8480_v23 }
 0x45e   : > { %v8512_v49 = vpop.f32.mrb[110].mxu1  ;;  %6938 = vmatprep.subr.bf16.mxu0 %v6937_v16 }
 0x45f   : > { %v8514_v9 = vpop.f32.mrb[111].mxu1  ;;  %v3621_v25 = vadd.f32 1e-06, %v3620_v60  ;;  %7160 = vrcp.f32 %v2704_v31  ;;  %v3042_v60 = vld [vmem:[%s7401_s26 + $0x18] sm:$0xff] }
 0x460   : > { %6628 = vmatmul.mubr.msk.f32.gmra.mrb[92].mxu0 %vm544_vm0, %v8391_v33  ;;  %v3270_v33 = vpop.trf.xlu0  ;;  %7162 = vrcp.f32 %v2719_v2  ;;  %v3046_v2 = vld [vmem:[%s7401_s26 + $0x58] sm:$0xff] }
 0x461   : > { %6630 = vmatprep.mubr.msk.f32.mxu0 %vm544_vm0, %v8395_v6  ;;  %6940 = vmatpush3.bf16.msra.mxu0 %v6937_v16  ;;  %v3576_v6 = vld [vmem:[#allocation3 + $0x88] sm:$0xff]  ;;  %v3625_v0 = vmul.f32 %v3621_v25, %v8539_v50  ;;  %v3627_v10 = vmul.f32 %v3621_v25, %v8547_v47  ;;  %v3628_v7 = vmul.f32 %v3621_v25, %v8550_v43  ;;  %7164 = vrcp.f32 %v2714_v46 }
 0x462   : > { %6942 = vmatprep.subr.bf16.mxu0 %v6941_v17  ;;  %v3622_v44 = vmul.f32 %v3621_v25, %v3576_v6  ;;  %v3629_v11 = vmul.f32 %v3621_v25, %v8555_v62 }
 0x464   : > { %6631 = vmatmul.mubr.msk.f32.gmra.mrb[94].mxu0 %vm544_vm0, %v8401_v32  ;;  %v8531_v32 = vld [vmem:[#allocation3 + $0x98] sm:$0xff] }
 0x465   : > { %6944 = vmatpush3.bf16.msra.mxu0 %v6941_v17  ;;  %6669 = vmatprep.mubr.msk.f32.mxu0 %vm2267_vm1, %v3267_v57  ;;  %v3623_v58 = vmul.f32 %v3621_v25, %v8531_v32  ;;  %v2891_v57 = vadd.f32 %v2890_v3, %v10004_v56 }
 0x466   : > { %6954 = vmatprep.subr.bf16.mxu0 %v10001_v28 }
 0x467   : > { %v2892_v53 = vrot.slane %v2891_v57, 2 }
 0x468   : > { %6670 = vmatmul.mubr.msk.f32.vlgmr.msra.gmra.mrb[96].mxu0 %vm2267_vm1, %v3268_v13  ;;  %v2729_v13 = vadd.f32 64.0, %v8478_v38 }
 0x469   : > { %6956 = vmatpush3.bf16.msra.mxu0 %v10001_v28  ;;  %6672 = vmatprep.mubr.msk.f32.mxu0 %vm2267_vm1, %v3269_v26  ;;  %v3624_v28 = vmul.f32 %v3621_v25, %v8534_v5  ;;  %v2893_v55 = vadd.f32 %v2892_v53, %v2891_v57 }
 0x46a   : > { %6958 = vmatprep.subr.bf16.mxu0 %v10002_v35  ;;  %7166 = vrcp.f32 %v2729_v13 }
 0x46b   : > { %v2894_v16 = vrot.slane %v2893_v55, 1  ;;  %7168 = vrcp.f32 %v2724_v54  ;;  %v3045_v54 = vld [vmem:[%s7401_s26 + $0x48] sm:$0xff] }
 0x46c   : > { %6673 = vmatmul.mubr.msk.f32.gmra.mrb[98].mxu0 %vm2267_vm1, %v3270_v33  ;;  %v3041_v33 = vld [vmem:[%s7401_s26 + $0x8] sm:$0xff]  ;;  %7170 = vrcp.f32 %v2739_v41 }
 0x46d   : > { %6960 = vmatpush3.bf16.msra.mxu0 %v10002_v35  ;;  %6703 = vmatprep.mubr.msk.f32.mxu0 %vm544_vm0, %v3622_v44  ;;  %v3626_v35 = vmul.f32 %v3621_v25, %v8542_v21  ;;  %v2895_v15 = vadd.f32 %v2894_v16, %v2893_v55  ;;  %v7161_v25 = vpop.eup %7160  ;;  %7172 = vrcp.f32 %v2734_v40 }
 0x470   : > { %6704 = vmatmul.mubr.msk.f32.vlgmr.msra.gmra.mrb[100].mxu0 %vm544_vm0, %v3623_v58 }
 0x471   : > { %6706 = vmatprep.mubr.msk.f32.mxu0 %vm544_vm0, %v3624_v28  ;;  %v7163_v28 = vpop.eup %7162 }
 0x474   : > { %6707 = vmatmul.mubr.msk.f32.gmra.mrb[102].mxu0 %vm544_vm0, %v3625_v0  ;;  %v3044_v0 = vld [vmem:[%s7401_s26 + $0x38] sm:$0xff] }
 0x475   : > { %6709 = vmatprep.mubr.msk.f32.mxu0 %vm544_vm0, %v3626_v35 }
 0x478   : > { %6710 = vmatmul.mubr.msk.f32.gmra.mrb[104].mxu0 %vm544_vm0, %v3627_v10  ;;  %v7165_v10 = vpop.eup %7164 }
 0x479   : > { %6712 = vmatprep.mubr.msk.f32.mxu0 %vm544_vm0, %v3628_v7  ;;  %v7167_v31 = vpop.eup %7166 }
 0x47a   : > { %v7169_v16 = vpop.eup %7168 }
 0x47c   : > { %6713 = vmatmul.mubr.msk.f32.gmra.mrb[106].mxu0 %vm544_vm0, %v3629_v11  ;;  %v3043_v11 = vld [vmem:[%s7401_s26 + $0x28] sm:$0xff] }
 0x47d   : > { %6745 = vmatprep.mubr.msk.f32.mxu0 %vm544_vm0, %v3576_v6 }
 0x52b   : > { %v6623_v48 = vpop.f32.mrb[88].mxu0 }
 0x52c   : > { %v2992_v12 = vadd.f32 %v6623_v48, %v2895_v15  ;;  %v2986_v17 = vpop.f32.mrb[89].mxu0 }
 0x52d   : > { %v2987_v26 = vadd.f32 %v2986_v17, %v2895_v15 }
 0x52e   : > { %v3034_v38 = vmul.f32 %v7159_v42, %v2992_v12  ;;  %v7171_v42 = vpop.eup %7170 }
 0x52f   : > { %v3033_v23 = vmul.f32 %v7161_v25, %v2987_v26  ;;  %v6626_v6 = vpop.f32.mrb[90].mxu0  ;;  %v3048_v26 = vld [vmem:[%s7401_s26 + $0x78] sm:$0xff] }
 0x530   : > { %v3050_v44 = vadd.f32 %v3042_v60, %v3034_v38  ;;  %v3002_v27 = vadd.f32 %v6626_v6, %v2895_v15  ;;  %v2996_v58 = vpop.f32.mrb[91].mxu0  ;;  %v7173_v38 = vpop.eup %7172 }
 0x531   : > { %v3049_v19 = vadd.f32 %v3041_v33, %v3033_v23  ;;  %v2997_v35 = vadd.f32 %v2996_v58, %v2895_v15  ;;  %v3047_v23 = vld [vmem:[%s7401_s26 + $0x68] sm:$0xff] }
 0x532   : > { %3058 = vst.msk [vmem:[#allocation2 + $0x18] sm:$0xff] %vm544_vm0, %v3050_v44  ;;  %v3036_v7 = vmul.f32 %v7163_v28, %v3002_v27 }
 0x533   : > { %3057 = vst.msk [vmem:[#allocation2 + $0x8] sm:$0xff] %vm544_vm0, %v3049_v19  ;;  %v3035_v56 = vmul.f32 %v7165_v10, %v2997_v35  ;;  %v6629_v3 = vpop.f32.mrb[92].mxu0 }
 0x534   : > { %v3052_v57 = vadd.f32 %v3044_v0, %v3036_v7  ;;  %v3012_v53 = vadd.f32 %v6629_v3, %v2895_v15  ;;  %v3006_v24 = vpop.f32.mrb[93].mxu0 }
 0x535   : > { %v3051_v55 = vadd.f32 %v3043_v11, %v3035_v56  ;;  %v3007_v46 = vadd.f32 %v3006_v24, %v2895_v15 }
 0x536   : > { %3060 = vst.msk [vmem:[#allocation2 + $0x38] sm:$0xff] %vm544_vm0, %v3052_v57  ;;  %v3038_v13 = vmul.f32 %v7167_v31, %v3012_v53  ;;  %v7233_v57 = vld [vmem:[#allocation5 + $0x88] sm:$0xff] }
 0x537   : > { %3059 = vst.msk [vmem:[#allocation2 + $0x28] sm:$0xff] %vm544_vm0, %v3051_v55  ;;  %v3037_v41 = vmul.f32 %v7169_v16, %v3007_v46  ;;  %v6632_v48 = vpop.f32.mrb[94].mxu0  ;;  %v7235_v55 = vld [vmem:[#allocation5 + $0xa8] sm:$0xff] }
 0x538   : > { %v3054_v40 = vadd.f32 %v3046_v2, %v3038_v13  ;;  %v3022_v12 = vadd.f32 %v6632_v48, %v2895_v15  ;;  %v3016_v17 = vpop.f32.mrb[95].mxu0  ;;  %v7236_v13 = vld [vmem:[#allocation5 + $0xd8] sm:$0xff] }
 0x539   : > { %v3053_v60 = vadd.f32 %v3045_v54, %v3037_v41  ;;  %v3017_v25 = vadd.f32 %v3016_v17, %v2895_v15  ;;  %v7237_v54 = vld [vmem:[#allocation5 + $0xc8] sm:$0xff] }
 0x53a   : > { %3062 = vst.msk [vmem:[#allocation2 + $0x58] sm:$0xff] %vm544_vm0, %v3054_v40  ;;  %v3040_v33 = vmul.f32 %v7171_v42, %v3022_v12  ;;  %v6969_v41 = vpack.c.bf16 %v7236_v13, %v7237_v54  ;;  %v7238_v40 = vld [vmem:[#allocation5 + $0xf8] sm:$0xff]  ;;  %v7239_v12 = vld [vmem:[#allocation5 + $0xe8] sm:$0xff]  ;;  %v3218_v13 = vadd.f32 64.0, %v8491_v45  ;;  %v3213_v54 = vadd.f32 64.0, %v8494_v34 }
 0x53b   : > { %3061 = vst.msk [vmem:[#allocation2 + $0x48] sm:$0xff] %vm544_vm0, %v3053_v60  ;;  %v3039_v6 = vmul.f32 %v7173_v38, %v3017_v25  ;;  %v6671_v44 = vpop.f32.mrb[96].mxu0  ;;  %v6973_v17 = vpack.c.bf16 %v7238_v40, %v7239_v12  ;;  %v4082_v60 = vld [vmem:[#allocation2] sm:$0xff]  ;;  %v4085_v25 = vld [vmem:[#allocation2 + $0x18] sm:$0xff]  ;;  %v4084_v38 = vld [vmem:[#allocation2 + $0x10] sm:$0xff]  ;;  %v3223_v40 = vadd.f32 64.0, %v8498_v37 }
 0x53c   : > { %v3056_v27 = vadd.f32 %v3048_v26, %v3040_v33  ;;  %v3381_v58 = vmul.f32 %v8330_v22, %v6671_v44  ;;  %v3361_v28 = vpop.f32.mrb[97].mxu0  ;;  %v4115_v33 = vpack.c.bf16 %v4085_v25, %v4084_v38  ;;  %7174 = vrcp.f32 %v3218_v13 }
 0x53d   : > { %v3055_v19 = vadd.f32 %v3047_v23, %v3039_v6  ;;  %v3380_v0 = vmul.f32 %v8336_v14, %v3361_v28  ;;  %v7232_v14 = vld [vmem:[#allocation5 + $0x98] sm:$0xff]  ;;  %v4086_v23 = vld [vmem:[#allocation2 + $0x20] sm:$0xff]  ;;  %7176 = vrcp.f32 %v3213_v54  ;;  %v3248_v45 = vadd.f32 64.0, %v8512_v49 }
 0x53e   : > { %3064 = vst.msk [vmem:[#allocation2 + $0x78] sm:$0xff] %vm544_vm0, %v3056_v27  ;;  %v6961_v53 = vpack.c.bf16 %v7232_v14, %v7233_v57  ;;  %v4089_v44 = vld [vmem:[#allocation2 + $0x38] sm:$0xff]  ;;  %v4096_v57 = vld [vmem:[#allocation2 + $0x70] sm:$0xff] }
 0x53f   : > { %3063 = vst.msk [vmem:[#allocation2 + $0x68] sm:$0xff] %vm544_vm0, %v3055_v19  ;;  %v6945_v15 = vpack.c.bf16 %v3381_v58, %v3380_v0  ;;  %v6674_v35 = vpop.f32.mrb[98].mxu0  ;;  %v4088_v58 = vld [vmem:[#allocation2 + $0x30] sm:$0xff]  ;;  %v4090_v19 = vld [vmem:[#allocation2 + $0x40] sm:$0xff] }
 0x540   : > { %v3383_v10 = vmul.f32 %v8342_v8, %v6674_v35  ;;  %v3371_v7 = vpop.f32.mrb[99].mxu0  ;;  %v3775_v8 = vpop.trf.xlu1  ;;  %v4117_v28 = vpack.c.bf16 %v4089_v44, %v4088_v58  ;;  %v5895_v58 = vld [vmem:[%s7401_s26 + $0xa0] sm:$0xff] }
 0x541   : > { %v3382_v11 = vmul.f32 %v8348_v61, %v3371_v7  ;;  %6946 = vmatprep.subr.bf16.mxu1 %v6945_v15  ;;  %v7234_v61 = vld [vmem:[#allocation5 + $0xb8] sm:$0xff] }
 0x542   : > { %6948 = vmatpush3.bf16.msra.mxu1 %v6945_v15  ;;  %v6965_v2 = vpack.c.bf16 %v7234_v61, %v7235_v55  ;;  %v4091_v27 = vld [vmem:[#allocation2 + $0x48] sm:$0xff]  ;;  %v4093_v15 = vld [vmem:[#allocation2 + $0x58] sm:$0xff]  ;;  %v3399_v61 = vrot.slane %v8078_v59, 4 }
 0x543   : > { %v6949_v56 = vpack.c.bf16 %v3383_v10, %v3382_v11  ;;  %v8590_v3 = vpop.f32.mrb[100].mxu0  ;;  %v4118_v0 = vpack.c.bf16 %v4091_v27, %v4090_v19  ;;  %v4092_v10 = vld [vmem:[#allocation2 + $0x50] sm:$0xff]  ;;  %v4094_v11 = vld [vmem:[#allocation2 + $0x60] sm:$0xff] }
 0x544   : > { %10005 = vst [vmem:[#allocation9_spill] sm:$0xff] %v8590_v3  ;;  %v8592_v22 = vpop.f32.mrb[101].mxu0  ;;  %v4119_v7 = vpack.c.bf16 %v4093_v15, %v4092_v10  ;;  %v3400_v55 = vadd.f32 %v3399_v61, %v8078_v59  ;;  %v3233_v59 = vadd.f32 64.0, %v8506_v18 }
 0x545   : > { %10006 = vst [vmem:[#allocation10_spill] sm:$0xff] %v8592_v22  ;;  %6950 = vmatprep.subr.bf16.mxu1 %v6949_v56  ;;  %v4097_v14 = vld [vmem:[#allocation2 + $0x78] sm:$0xff] }
 0x546   : > { %6952 = vmatpush3.bf16.msra.mxu1 %v6949_v56  ;;  %v4095_v35 = vld [vmem:[#allocation2 + $0x68] sm:$0xff]  ;;  %v7175_v37 = vpop.eup %7174 }
 0x547   : > { %v8594_v24 = vpop.f32.mrb[102].mxu0  ;;  %6962 = vmatprep.subr.bf16.mxu1 %v6961_v53  ;;  %v4120_v56 = vpack.c.bf16 %v4095_v35, %v4094_v11  ;;  %v5898_v11 = vld [vmem:[%s7401_s26 + $0xd0] sm:$0xff] }
 0x548   : > { %10007 = vst [vmem:[#allocation13_spill] sm:$0xff] %v8594_v24  ;;  %v8596_v31 = vpop.f32.mrb[103].mxu0 }
 0x549   : > { %10008 = vst [vmem:[#allocation11_spill] sm:$0xff] %v8596_v31  ;;  %6684 = vmatmul.mubr.msk.f32.vlgmr.msra.gmra.mrb[112].mxu1 %vm544_vm0, %v8415_v36  ;;  %v3776_v36 = vpop.trf.xlu1 }
 0x54a   : > { %6686 = vmatprep.mubr.msk.f32.mxu1 %vm544_vm0, %v8418_v52  ;;  %6964 = vmatpush3.bf16.msra.mxu1 %v6961_v53  ;;  %v4121_v53 = vpack.c.bf16 %v4097_v14, %v4096_v57 }
 0x54b   : > { %v8602_v46 = vpop.f32.mrb[104].mxu0  ;;  %6966 = vmatprep.subr.bf16.mxu1 %v6965_v2 }
 0x54c   : > { %10009 = vst [vmem:[#allocation18_spill] sm:$0xff] %v8602_v46  ;;  %v8604_v16 = vpop.f32.mrb[105].mxu0 }
 0x54d   : > { %10010 = vst [vmem:[#allocation15_spill] sm:$0xff] %v8604_v16  ;;  %6687 = vmatmul.mubr.msk.f32.gmra.mrb[114].mxu1 %vm544_vm0, %v8423_v1  ;;  %v7004_v1 = vld [vmem:[%s9898_s8] sm:$0xff]  }
 0x54e   : > { %6689 = vmatprep.mubr.msk.f32.mxu1 %vm544_vm0, %v8426_v30  ;;  %6968 = vmatpush3.bf16.msra.mxu1 %v6965_v2  ;;  %v3777_v30 = vpop.trf.xlu1  ;;  %v3401_v2 = vrot.slane %v3400_v55, 2 }
 0x54f   : > { %v8610_v48 = vpop.f32.mrb[106].mxu0  ;;  %6970 = vmatprep.subr.bf16.mxu1 %v6969_v41 }
 0x550   : > { %10011 = vst [vmem:[#allocation16_spill] sm:$0xff] %v8610_v48  ;;  %v8612_v52 = vpop.f32.mrb[107].mxu0 }
 0x551   : > { %10012 = vst [vmem:[#allocation12_spill] sm:$0xff] %v8612_v52  ;;  %6690 = vmatmul.mubr.msk.f32.gmra.mrb[116].mxu1 %vm544_vm0, %v8431_v51  ;;  %v7005_v51 = vld [vmem:[%s9898_s8 + $0x8] sm:$0xff]  }
 0x552   : > { %6692 = vmatprep.mubr.msk.f32.mxu1 %vm544_vm0, %v8434_v39  ;;  %6972 = vmatpush3.bf16.msra.mxu1 %v6969_v41  ;;  %v4083_v39 = vld [vmem:[#allocation2 + $0x8] sm:$0xff]  ;;  %v3778_v42 = vpop.trf.xlu1  ;;  %v3402_v41 = vadd.f32 %v3401_v2, %v3400_v55 }
 0x553   : > { %6974 = vmatprep.subr.bf16.mxu1 %v6973_v17  ;;  %v4114_v26 = vpack.c.bf16 %v4083_v39, %v4082_v60  ;;  %v5894_v39 = vld [vmem:[%s7401_s26 + $0x90] sm:$0xff]  ;;  %v7177_v60 = vpop.eup %7176 }
 0x554   : > { %v3403_v12 = vrot.slane %v3402_v41, 1 }
 0x555   : > { %6693 = vmatmul.mubr.msk.f32.gmra.mrb[118].mxu1 %vm544_vm0, %v8439_v4  ;;  %v4087_v4 = vld [vmem:[#allocation2 + $0x28] sm:$0xff] }
 0x556   : > { %6976 = vmatpush3.bf16.msra.mxu1 %v6973_v17  ;;  %6731 = vmatprep.mubr.msk.f32.mxu1 %vm2267_vm1, %v3775_v8  ;;  %v4116_v6 = vpack.c.bf16 %v4087_v4, %v4086_v23  ;;  %v7297_v8 = vmov 0.0   ;;  %v3238_v17 = vadd.f32 64.0, %v8504_v20  ;;  %v5896_v23 = vld [vmem:[%s7401_s26 + $0xb0] sm:$0xff] }
 0x557   : > { %6757 = vmatprep.subr.bf16.mxu1 %v7004_v1  ;;  %4426 = vst [vmem:[#allocation6] sm:$0xff] %v7297_v8  ;;  %4427 = vst [vmem:[#allocation6 + $0x8] sm:$0xff] %v7297_v8 }
 0x558   : > { %4428 = vst [vmem:[#allocation6 + $0x10] sm:$0x3] %v7297_v8  ;;  %4434 = vst [vmem:[#allocation6 + $0x18] sm:$0x1] %v7297_v8 }
 0x559   : > { %6732 = vmatmul.mubr.msk.f32.vlgmr.msra.gmra.mrb[120].mxu1 %vm2267_vm1, %v3776_v36  ;;  %4435 = vst [vmem:[#allocation6 + $0x30] sm:$0x1] %v7297_v8  ;;  %4436 = vst [vmem:[#allocation6 + $0x48] sm:$0x1] %v7297_v8  ;;  %v3228_v36 = vadd.f32 64.0, %v8496_v29  ;;  %v3243_v29 = vadd.f32 64.0, %v8514_v9 }
 0x55a   : > { %6758 = vmatpush3.bf16.msra.mxu1 %v7004_v1  ;;  %6734 = vmatprep.mubr.msk.f32.mxu1 %vm2267_vm1, %v3777_v30  ;;  %4452 = vst [vmem:[#allocation6 + $0x29] sm:$0x1] %v7297_v8  ;;  %4453 = vst [vmem:[#allocation6 + $0x41] sm:$0x1] %v7297_v8  ;;  %v3404_v1 = vadd.f32 %v3403_v12, %v3402_v41 }
 0x55b   : > { %6759 = vmatprep.subr.bf16.mxu1 %v7005_v51  ;;  %4430 = vst [vmem:[#allocation6 + $0x198] sm:$0xff] %v7297_v8  ;;  %4431 = vst [vmem:[#allocation6 + $0x1a0] sm:$0xff] %v7297_v8  ;;  %7178 = vrcp.f32 %v3228_v36  ;;  %v5900_v36 = vld [vmem:[%s7401_s26 + $0xf0] sm:$0xff] }
 0x55c   : > { %4432 = vst [vmem:[#allocation6 + $0x1a8] sm:$0x3] %v7297_v8  ;;  %4437 = vst [vmem:[#allocation6 + $0x60] sm:$0x1] %v7297_v8  ;;  %7180 = vrcp.f32 %v3223_v40 }
 0x55d   : > { %6735 = vmatmul.mubr.msk.f32.gmra.mrb[122].mxu1 %vm2267_vm1, %v3778_v42  ;;  %4438 = vst [vmem:[#allocation6 + $0x78] sm:$0x1] %v7297_v8  ;;  %4439 = vst [vmem:[#allocation6 + $0x90] sm:$0x1] %v7297_v8  ;;  %7182 = vrcp.f32 %v3238_v17 }
 0x55e   : > { %6760 = vmatpush3.bf16.msra.mxu1 %v7005_v51  ;;  %6761 = vmatprep.mubr.msk.bf16.mxu1 %vm544_vm0, %v4114_v26  ;;  %4440 = vst [vmem:[#allocation6 + $0xa8] sm:$0x1] %v7297_v8  ;;  %4441 = vst [vmem:[#allocation6 + $0xc0] sm:$0x1] %v7297_v8  ;;  %7184 = vrcp.f32 %v3233_v59  ;;  %v5893_v26 = vld [vmem:[%s7401_s26 + $0x80] sm:$0xff] }
 0x55f   : > { %4442 = vst [vmem:[#allocation6 + $0xd8] sm:$0x1] %v7297_v8  ;;  %4443 = vst [vmem:[#allocation6 + $0xf0] sm:$0x1] %v7297_v8  ;;  %7186 = vrcp.f32 %v3248_v45  ;;  %v5899_v59 = vld [vmem:[%s7401_s26 + $0xe0] sm:$0xff] }
 0x560   : > { %4444 = vst [vmem:[#allocation6 + $0x108] sm:$0x1] %v7297_v8  ;;  %4445 = vst [vmem:[#allocation6 + $0x120] sm:$0x1] %v7297_v8  ;;  %7188 = vrcp.f32 %v3243_v29 }
 0x561   : > { %6762 = vmatmul.mubr.msk.bf16.vlgmr.msra.gmra.mrb[124].mxu1 %vm544_vm0, %v4115_v33  ;;  %4446 = vst [vmem:[#allocation6 + $0x138] sm:$0x1] %v7297_v8  ;;  %4447 = vst [vmem:[#allocation6 + $0x150] sm:$0x1] %v7297_v8 }
 0x562   : > { %6765 = vmatprep.mubr.msk.bf16.mxu1 %vm544_vm0, %v4116_v6  ;;  %4448 = vst [vmem:[#allocation6 + $0x168] sm:$0x1] %v7297_v8  ;;  %4449 = vst [vmem:[#allocation6 + $0x180] sm:$0x1] %v7297_v8 }
 0x563   : > { %4454 = vst [vmem:[#allocation6 + $0x59] sm:$0x1] %v7297_v8  ;;  %4455 = vst [vmem:[#allocation6 + $0x71] sm:$0x1] %v7297_v8 }
 0x564   : > { %4456 = vst [vmem:[#allocation6 + $0x89] sm:$0x1] %v7297_v8  ;;  %4457 = vst [vmem:[#allocation6 + $0xa1] sm:$0x1] %v7297_v8 }
 0x565   : > { %4458 = vst [vmem:[#allocation6 + $0xb9] sm:$0x1] %v7297_v8  ;;  %4459 = vst [vmem:[#allocation6 + $0xd1] sm:$0x1] %v7297_v8  ;;  %v7179_v33 = vpop.eup %7178 }
 0x566   : > { %4460 = vst [vmem:[#allocation6 + $0xe9] sm:$0x1] %v7297_v8  ;;  %4461 = vst [vmem:[#allocation6 + $0x101] sm:$0x1] %v7297_v8  ;;  %v7181_v44 = vpop.eup %7180 }
 0x567   : > { %4462 = vst [vmem:[#allocation6 + $0x119] sm:$0x1] %v7297_v8  ;;  %4463 = vst [vmem:[#allocation6 + $0x131] sm:$0x1] %v7297_v8  ;;  %v7183_v10 = vpop.eup %7182 }
 0x568   : > { %4464 = vst [vmem:[#allocation6 + $0x149] sm:$0x1] %v7297_v8  ;;  %4465 = vst [vmem:[#allocation6 + $0x161] sm:$0x1] %v7297_v8  ;;  %v7185_v14 = vpop.eup %7184 }
 0x569   : > { %6766 = vmatmul.mubr.msk.bf16.gmra.mrb[128].mxu1 %vm544_vm0, %v4117_v28  ;;  %4466 = vst [vmem:[#allocation6 + $0x179] sm:$0x1] %v7297_v8  ;;  %4467 = vst [vmem:[#allocation6 + $0x191] sm:$0x1] %v7297_v8  ;;  %v7187_v54 = vpop.eup %7186 }
 0x56a   : > { %6769 = vmatprep.mubr.msk.bf16.mxu1 %vm544_vm0, %v4118_v0  ;;  %4433 = vst [vmem:[#allocation6] sm:$0x1] %v7297_v8  ;;  %4451 = vst [vmem:[#allocation6 + $0x11] sm:$0x1] %v7297_v8  ;;  %v7189_v12 = vpop.eup %7188 }
 0x56b   : > { %4450 = vst [vmem:[#allocation6 + $0x198] sm:$0x1] %v7297_v8  ;;  %4468 = vst [vmem:[#allocation6 + $0x1a9] sm:$0x1] %v7297_v8 }
 0x571   : > { %6770 = vmatmul.mubr.msk.bf16.gmra.mrb[132].mxu1 %vm544_vm0, %v4119_v7 }
 0x572   : > { %6773 = vmatprep.mubr.msk.bf16.mxu1 %vm544_vm0, %v4120_v56 }
 0x579   : > { %6774 = vmatmul.mubr.msk.bf16.gmra.mrb[136].mxu1 %vm544_vm0, %v4121_v53  ;;  %v5897_v53 = vld [vmem:[%s7401_s26 + $0xc0] sm:$0xff] }
 0x61c   : > { %v6685_v34 = vpop.f32.mrb[112].mxu1 }
 0x61d   : > { %v3501_v30 = vadd.f32 %v6685_v34, %v3404_v1  ;;  %v3495_v51 = vpop.f32.mrb[113].mxu1 }
 0x61e   : > { %v3496_v42 = vadd.f32 %v3495_v51, %v3404_v1 }
 0x61f   : > { %v3543_v20 = vmul.f32 %v7175_v37, %v3501_v30  ;;  %v7240_v30 = vld [vmem:[%s9891_s1 + $0x8] sm:$0xff] }
 0x620   : > { %v3542_v18 = vmul.f32 %v7177_v60, %v3496_v42  ;;  %v6688_v25 = vpop.f32.mrb[114].mxu1 }
 0x621   : > { %v3560_v4 = vadd.f32 %v5894_v39, %v3543_v20  ;;  %v3511_v49 = vadd.f32 %v6688_v25, %v3404_v1  ;;  %v3505_v38 = vpop.f32.mrb[115].mxu1 }
 0x622   : > { %v3559_v9 = vadd.f32 %v5893_v26, %v3542_v18  ;;  %v3506_v6 = vadd.f32 %v3505_v38, %v3404_v1  ;;  %v7242_v26 = vld [vmem:[%s9891_s1 + $0x18] sm:$0xff]  ;;  %v8679_v38 = vld [vmem:[%s9899_s9] ss:$0 sm:$0xff] }
 0x623   : > { %3569 = vst.msk [vmem:[#allocation2 + $0x90] sm:$0xff] %vm544_vm0, %v3560_v4  ;;  %v3545_v27 = vmul.f32 %v7179_v33, %v3511_v49  ;;  %v7243_v4 = vld [vmem:[%s9891_s1 + $0x10] sm:$0xff] }
 0x624   : > { %3568 = vst.msk [vmem:[#allocation2 + $0x80] sm:$0xff] %vm544_vm0, %v3559_v9  ;;  %v3544_v28 = vmul.f32 %v7181_v44, %v3506_v6  ;;  %v6691_v19 = vpop.f32.mrb[116].mxu1 }
 0x625   : > { %v3562_v0 = vadd.f32 %v5896_v23, %v3545_v27  ;;  %v3521_v15 = vadd.f32 %v6691_v19, %v3404_v1  ;;  %v3515_v35 = vpop.f32.mrb[117].mxu1  ;;  %v7006_v23 = vld [vmem:[%s9902_s12] sm:$0xff]  }
 0x626   : > { %v3561_v7 = vadd.f32 %v5895_v58, %v3544_v28  ;;  %v3516_v56 = vadd.f32 %v3515_v35, %v3404_v1 }
 0x627   : > { %3571 = vst.msk [vmem:[#allocation2 + $0xb0] sm:$0xff] %vm544_vm0, %v3562_v0  ;;  %v3547_v57 = vmul.f32 %v7183_v10, %v3521_v15  ;;  %v7007_v10 = vld [vmem:[%s9902_s12 + $0x8] sm:$0xff]  }
 0x628   : > { %3570 = vst.msk [vmem:[#allocation2 + $0xa0] sm:$0xff] %vm544_vm0, %v3561_v7  ;;  %v3546_v8 = vmul.f32 %v7185_v14, %v3516_v56  ;;  %v6694_v61 = vpop.f32.mrb[118].mxu1  ;;  %v4502_v56 = vld [vmem:[#allocation6] sm:$0xff] }
 0x629   : > { %v3564_v55 = vadd.f32 %v5898_v11, %v3547_v57  ;;  %v3531_v2 = vadd.f32 %v6694_v61, %v3404_v1  ;;  %v3525_v13 = vpop.f32.mrb[119].mxu1  ;;  %v8694_v14 = vld [vmem:[%s9900_s10] ss:$0 sm:$0xff]  ;;  %v4748_v61 = vld [vmem:[#allocation6 + $0x9] sm:$0xff] }
 0x62a   : > { %v3563_v41 = vadd.f32 %v5897_v53, %v3546_v8  ;;  %v3526_v40 = vadd.f32 %v3525_v13, %v3404_v1  ;;  %v7241_v1 = vld [vmem:[%s9891_s1] sm:$0xff] }
 0x62b   : > { %3573 = vst.msk [vmem:[#allocation2 + $0xd0] sm:$0xff] %vm544_vm0, %v3564_v55  ;;  %v3549_v17 = vmul.f32 %v7187_v54, %v3531_v2  ;;  %v4747_v8 = vld [vmem:[#allocation6 + $0x1] sm:$0xff] }
 0x62c   : > { %3572 = vst.msk [vmem:[#allocation2 + $0xc0] sm:$0xff] %vm544_vm0, %v3563_v41  ;;  %v3548_v45 = vmul.f32 %v7189_v12, %v3526_v40  ;;  %v6733_v34 = vpop.f32.mrb[120].mxu1  ;;  %v8701_v55 = vld [vmem:[%s9900_s10 + $0x1] ss:$0 sm:$0xff]  ;;  %v8708_v13 = vld [vmem:[%s9900_s10 + $0x5] ss:$0 sm:$0xff]  ;;  %v8714_v12 = vmul.f32 %v8694_v14, %v4502_v56 }
 0x62d   : > { %v3566_v29 = vadd.f32 %v5900_v36, %v3549_v17  ;;  %v3889_v51 = vmul.f32 %v7240_v30, %v6733_v34  ;;  %v3869_v37 = vpop.f32.mrb[121].mxu1  ;;  %v4990_v54 = vld [vmem:[#allocation6 + $0x2] sm:$0xff]  ;;  %v7008_v40 = vld [vmem:[%s9902_s12 + $0x10] sm:$0xff]   ;;  %v8726_v34 = vmul.f32 %v8701_v55, %v4747_v8 }
 0x62e   : > { %v3565_v39 = vadd.f32 %v5899_v59, %v3548_v45  ;;  %v3888_v42 = vmul.f32 %v7241_v1, %v3869_v37  ;;  %v8723_v45 = vmul.f32 0.0, %v8694_v14  ;;  %v8734_v30 = vld [vmem:[%s9900_s10 + $0x2] ss:$0 sm:$0xff] }
 0x62f   : > { %3575 = vst.msk [vmem:[#allocation2 + $0xf0] sm:$0xff] %vm544_vm0, %v3566_v29  ;;  %v8729_v29 = vmul.f32 %v8701_v55, %v4748_v61  ;;  %v8743_v1 = vmul.f32 %v8734_v30, %v4990_v54 }
 0x630   : > { %3574 = vst.msk [vmem:[#allocation2 + $0xe0] sm:$0xff] %vm544_vm0, %v3565_v39  ;;  %v6977_v60 = vpack.c.bf16 %v3889_v51, %v3888_v42  ;;  %v6736_v20 = vpop.f32.mrb[122].mxu1 }
 0x631   : > { %v3891_v18 = vmul.f32 %v7242_v26, %v6736_v20  ;;  %v3879_v25 = vpop.f32.mrb[123].mxu1 }
 0x632   : > { %v3890_v49 = vmul.f32 %v7243_v4, %v3879_v25  ;;  %6978 = vmatprep.subr.bf16.mxu0 %v6977_v60 }
 0x633   : > { %6980 = vmatpush3.bf16.msra.mxu0 %v6977_v60 }
 0x634   : > { %v6981_v33 = vpack.c.bf16 %v3891_v18, %v3890_v49  ;;  %v6763_v9 = vpop.f32.mrb[124].mxu1  ;;  %v7009_v49 = vld [vmem:[%s9902_s12 + $0x18] sm:$0xff]  }
 0x635   : > { %v4244_v6 = vadd.f32 %v6763_v9, %v8679_v38  ;;  %v4235_v44 = vpop.f32.mrb[125].mxu1 }
 0x636   : > { %v4236_v27 = vadd.f32 %v8679_v38, %v4235_v44  ;;  %6982 = vmatprep.subr.bf16.mxu0 %v6981_v33  ;;  %v6764_v58 = vpop.f32.mrb[126].mxu1 }
 0x637   : > { %v4364_v28 = vmax.f32 %v4244_v6, 0.0  ;;  %v4247_v19 = vadd.f32 %v6764_v58, %v8679_v38  ;;  %6984 = vmatpush3.bf16.msra.mxu0 %v6981_v33  ;;  %v4238_v0 = vpop.f32.mrb[127].mxu1  ;;  %v8769_v33 = vld [vmem:[%s9900_s10 + $0x8] ss:$0 sm:$0xff] }
 0x638   : > { %v4362_v15 = vmax.f32 %v4236_v27, 0.0  ;;  %v4239_v35 = vadd.f32 %v8679_v38, %v4238_v0  ;;  %6793 = vmatprep.subr.bf16.mxu0 %v7006_v23 }
 0x639   : > { %v4396_v7 = vmin.f32 %v4364_v28, 6.0  ;;  %v4365_v11 = vmax.f32 %v4247_v19, 0.0 }
 0x63a   : > { %v4394_v57 = vmin.f32 %v4362_v15, 6.0  ;;  %v4363_v53 = vmax.f32 %v4239_v35, 0.0  ;;  %6746 = vmatmul.mubr.msk.f32.vlgmr.msra.gmra.mrb[108].mxu0 %vm544_vm0, %v8531_v32  ;;  %v4991_v32 = vld [vmem:[#allocation6 + $0xa] sm:$0xff] }
 0x63b   : > { %4472 = vst [vmem:[#allocation6 + $0x31] sm:$0xff] %v4396_v7  ;;  %v4397_v2 = vmin.f32 %v4365_v11, 6.0  ;;  %6748 = vmatprep.mubr.msk.f32.mxu0 %vm544_vm0, %v8534_v5  ;;  %6794 = vmatpush3.bf16.msra.mxu0 %v7006_v23  ;;  %v8719_v5 = vld [vmem:[%s9900_s10 + $0x9] ss:$0 sm:$0xff]  ;;  %v8740_v39 = vmul.f32 %v8708_v13, %v4396_v7  ;;  %v8746_v42 = vmul.f32 %v8734_v30, %v4991_v32 }
 0x63c   : > { %4470 = vst [vmem:[#allocation6 + $0x19] sm:$0xff] %v4394_v57  ;;  %v4395_v41 = vmin.f32 %v4363_v53, 6.0  ;;  %v6767_v36 = vpop.f32.mrb[128].mxu1  ;;  %6795 = vmatprep.subr.bf16.mxu0 %v7007_v10  ;;  %v8755_v18 = vmul.f32 %v8701_v55, %v4396_v7  ;;  %v8772_v9 = vmul.f32 %v8701_v55, %v4394_v57  ;;  %v8775_v23 = vmul.f32 %v8708_v13, %v4394_v57  ;;  %v8808_v57 = vld [vmem:[%s9900_s10 + $0x6] ss:$0 sm:$0xff] }
 0x63d   : > { %4473 = vst [vmem:[#allocation6 + $0x39] sm:$0xff] %v4397_v2  ;;  %v4260_v17 = vadd.f32 %v6767_v36, %v8679_v38  ;;  %v4251_v59 = vpop.f32.mrb[129].mxu1  ;;  %v8780_v27 = vmul.f32 %v8708_v13, %v4397_v2  ;;  %v8783_v58 = vmul.f32 %v8719_v5, %v4397_v2  ;;  %v8793_v35 = vmul.f32 %v8701_v55, %v4397_v2 }
 0x63e   : > { %4471 = vst [vmem:[#allocation6 + $0x21] sm:$0xff] %v4395_v41  ;;  %v4252_v51 = vadd.f32 %v8679_v38, %v4251_v59  ;;  %6749 = vmatmul.mubr.msk.f32.gmra.mrb[110].mxu0 %vm544_vm0, %v8539_v50  ;;  %v6768_v37 = vpop.f32.mrb[130].mxu1  ;;  %v8752_v50 = vmul.f32 %v8719_v5, %v4396_v7  ;;  %v8790_v15 = vmul.f32 %v8701_v55, %v4395_v41 }
 0x63f   : > { %v4368_v60 = vmax.f32 %v4260_v17, 0.0  ;;  %v4263_v20 = vadd.f32 %v6768_v37, %v8679_v38  ;;  %6751 = vmatprep.mubr.msk.f32.mxu0 %vm544_vm0, %v8542_v21  ;;  %v4254_v26 = vpop.f32.mrb[131].mxu1  ;;  %6796 = vmatpush3.bf16.msra.mxu0 %v7007_v10  ;;  %v8764_v21 = vld [vmem:[%s9900_s10 + $0x4] ss:$0 sm:$0xff]  ;;  %v8803_v56 = vmul.f32 %v8708_v13, %v4395_v41 }
 0x640   : > { %v4366_v25 = vmax.f32 %v4252_v51, 0.0  ;;  %v4255_v4 = vadd.f32 %v8679_v38, %v4254_v26  ;;  %6797 = vmatprep.subr.bf16.mxu0 %v7008_v40 }
 0x641   : > { %v8777_v6 = vmin.f32 %v4368_v60, 6.0  ;;  %v4369_v44 = vmax.f32 %v4263_v20, 0.0 }
 0x642   : > { %v8785_v28 = vmin.f32 %v4366_v25, 6.0  ;;  %v4367_v19 = vmax.f32 %v4255_v4, 0.0  ;;  %6752 = vmatmul.mubr.msk.f32.gmra.mrb[112].mxu0 %vm544_vm0, %v8547_v47  ;;  %v4506_v0 = vld [vmem:[#allocation6 + $0x30] sm:$0xff] }
 0x643   : > { %4476 = vst [vmem:[#allocation6 + $0x61] sm:$0xff] %v8777_v6  ;;  %v8796_v10 = vmin.f32 %v4369_v44, 6.0  ;;  %6754 = vmatprep.mubr.msk.f32.mxu0 %vm544_vm0, %v8550_v43  ;;  %6798 = vmatpush3.bf16.msra.mxu0 %v7008_v40  ;;  %v4504_v7 = vld [vmem:[#allocation6 + $0x18] sm:$0xff]  ;;  %v4615_v11 = vmul.f32 %v8764_v21, %v4506_v0  ;;  %v4683_v47 = vmul.f32 %v8769_v33, %v4506_v0  ;;  %v7010_v43 = vld [vmem:[%s9902_s12 + $0x20] sm:$0xff]  }
 0x644   : > { %4474 = vst [vmem:[#allocation6 + $0x49] sm:$0xff] %v8785_v28  ;;  %v8811_v53 = vmin.f32 %v4367_v19, 6.0  ;;  %v6771_v8 = vpop.f32.mrb[132].mxu1  ;;  %6799 = vmatprep.subr.bf16.mxu0 %v7009_v49  ;;  %v8816_v61 = vld [vmem:[#allocation6 + $0x38] sm:$0xff]  ;;  %v4545_v2 = vmul.f32 %v8694_v14, %v4504_v7  ;;  %v4613_v54 = vmul.f32 %v8764_v21, %v4504_v7  ;;  %v8823_v41 = vmul.f32 %v8694_v14, %v4506_v0 }
 0x645   : > { %v8820_v32 = vld [vmem:[#allocation6 + $0x32] sm:$0xff]  ;;  %4477 = vst [vmem:[#allocation6 + $0x69] sm:$0xff] %v8796_v10  ;;  %v4276_v36 = vadd.f32 %v6771_v8, %v8679_v38  ;;  %v4267_v40 = vpop.f32.mrb[133].mxu1  ;;  %v4505_v17 = vld [vmem:[#allocation6 + $0x20] sm:$0xff]  ;;  %v4616_v59 = vmul.f32 %v8764_v21, %v8816_v61  ;;  %v4684_v51 = vmul.f32 %v8769_v33, %v8816_v61  ;;  %v8833_v37 = vmul.f32 %v8719_v5, %v8785_v28 }
 0x646   : > { %4475 = vst [vmem:[#allocation6 + $0x51] sm:$0xff] %v8811_v53  ;;  %v4268_v60 = vadd.f32 %v8679_v38, %v4267_v40  ;;  %6755 = vmatmul.mubr.msk.f32.gmra.mrb[114].mxu0 %vm544_vm0, %v8555_v62  ;;  %v6772_v20 = vpop.f32.mrb[134].mxu1  ;;  %v4546_v26 = vmul.f32 %v8694_v14, %v4505_v17  ;;  %v4614_v25 = vmul.f32 %v8764_v21, %v4505_v17  ;;  %v4992_v8 = vld [vmem:[#allocation6 + $0x1a] sm:$0xff]  ;;  %v7011_v17 = vld [vmem:[%s9902_s12 + $0x28] sm:$0xff]  }
 0x647   : > { %v4645_v4 = vadd.f32 %v4613_v54, %v8714_v12  ;;  %v4372_v44 = vmax.f32 %v4276_v36, 0.0  ;;  %v4279_v19 = vadd.f32 %v6772_v20, %v8679_v38  ;;  %v4270_v0 = vpop.f32.mrb[135].mxu1  ;;  %6800 = vmatpush3.bf16.msra.mxu0 %v7009_v49  ;;  %v4647_v7 = vadd.f32 %v4615_v11, %v4545_v2  ;;  %v4993_v49 = vld [vmem:[#allocation6 + $0x22] sm:$0xff]  ;;  %v8860_v16 = vld [vmem:[#allocation6 + $0x3a] sm:$0xff] }
 0x648   : > { %v8845_v40 = vmul.f32 %v8808_v57, %v8820_v32  ;;  %v4370_v52 = vmax.f32 %v4268_v60, 0.0  ;;  %v4271_v62 = vadd.f32 %v8679_v38, %v4270_v0  ;;  %6801 = vmatprep.subr.bf16.mxu0 %v7010_v43  ;;  %v4646_v12 = vadd.f32 %v4614_v25, %v8723_v45  ;;  %v8868_v45 = vld [vmem:[%s9900_s10 + $0xa] ss:$0 sm:$0xff] }
 0x649   : > { %v8854_v54 = vmul.f32 %v8719_v5, %v8811_v53  ;;  %v8856_v11 = vmin.f32 %v4372_v44, 6.0  ;;  %v4373_v2 = vmax.f32 %v4279_v19, 0.0  ;;  %v4648_v36 = vadd.f32 %v4616_v59, %v4546_v26  ;;  %v7012_v44 = vld [vmem:[%s9902_s12 + $0x30] sm:$0xff]  }
 0x64a   : > { %v4715_v20 = vadd.f32 %v4683_v47, %v4645_v4  ;;  %v8858_v60 = vmin.f32 %v4370_v52, 6.0  ;;  %v4371_v0 = vmax.f32 %v4271_v62, 0.0  ;;  %v4716_v48 = vadd.f32 %v4684_v51, %v4646_v12 }
 0x64b   : > { %10013 = vst [vmem:[#allocation17_spill] sm:$0xff] %v8856_v11  ;;  %v8863_v46 = vmul.f32 %v8734_v30, %v4992_v8  ;;  %4480 = vst [vmem:[#allocation6 + $0x91] sm:$0xff] %v8856_v11  ;;  %v8871_v25 = vmin.f32 %v4373_v2, 6.0  ;;  %6802 = vmatpush3.bf16.msra.mxu0 %v7010_v43  ;;  %v8873_v47 = vld [vmem:[#allocation6 + $0x48] sm:$0xff]  ;;  %v8877_v59 = vmul.f32 %v8734_v30, %v4993_v49 }
 0x64c   : > { %v4820_v52 = vadd.f32 %v8726_v34, %v4715_v20  ;;  %v5100_v51 = vmul.f32 %v8808_v57, %v4992_v8  ;;  %4478 = vst [vmem:[#allocation6 + $0x79] sm:$0xff] %v8858_v60  ;;  %v8881_v26 = vmin.f32 %v4371_v0, 6.0  ;;  %v6775_v4 = vpop.f32.mrb[136].mxu1  ;;  %6803 = vmatprep.subr.bf16.mxu0 %v7011_v17  ;;  %v4685_v43 = vmul.f32 %v8769_v33, %v8873_v47 }
 0x64d   : > { %10014 = vst [vmem:[#allocation14_spill] sm:$0xff] %v8871_v25  ;;  %v4821_v34 = vadd.f32 %v8729_v29, %v4716_v48  ;;  %v5101_v19 = vmul.f32 %v8808_v57, %v4993_v49  ;;  %4481 = vst [vmem:[#allocation6 + $0x99] sm:$0xff] %v8871_v25  ;;  %v4292_v8 = vadd.f32 %v6775_v4, %v8679_v38  ;;  %v4283_v62 = vpop.f32.mrb[137].mxu1  ;;  %v8892_v12 = vld [vmem:[#allocation6 + $0x50] sm:$0xff] }
 0x64e   : > { %v4889_v2 = vadd.f32 %v8775_v23, %v4820_v52  ;;  %v8897_v20 = vmul.f32 %v8808_v57, %v8860_v16  ;;  %v5169_v0 = vmul.f32 %v8868_v45, %v8820_v32  ;;  %4479 = vst [vmem:[#allocation6 + $0x81] sm:$0xff] %v8881_v26  ;;  %v4284_v48 = vadd.f32 %v8679_v38, %v4283_v62  ;;  %v6776_v29 = vpop.f32.mrb[138].mxu1 }
 0x64f   : > { %v4686_v49 = vmul.f32 %v8769_v33, %v8892_v12  ;;  %v4717_v4 = vadd.f32 %v4685_v43, %v4647_v7  ;;  %v4890_v31 = vadd.f32 %v8803_v56, %v4821_v34  ;;  %v4376_v24 = vmax.f32 %v4292_v8, 0.0  ;;  %v4286_v52 = vpop.f32.mrb[139].mxu1  ;;  %6804 = vmatpush3.bf16.msra.mxu0 %v7011_v17  ;;  %v7013_v56 = vld [vmem:[%s9902_s12 + $0x38] sm:$0xff]   ;;  %v8915_v7 = vld [vmem:[#allocation6 + $0x4a] sm:$0xff] }
 0x650   : > { %v4295_v23 = vadd.f32 %v6776_v29, %v8679_v38  ;;  %v4958_v22 = vadd.f32 %v8752_v50, %v4889_v2  ;;  %v5170_v3 = vmul.f32 %v8868_v45, %v8860_v16  ;;  %v4374_v63 = vmax.f32 %v4284_v48, 0.0  ;;  %6805 = vmatprep.subr.bf16.mxu0 %v7012_v44 }
 0x651   : > { %v4287_v62 = vadd.f32 %v8679_v38, %v4286_v52  ;;  %v4718_v25 = vadd.f32 %v4686_v49, %v4648_v36  ;;  %v4822_v11 = vadd.f32 %v8772_v9, %v4717_v4  ;;  %v8917_v43 = vmin.f32 %v4376_v24, 6.0 }
 0x652   : > { %v4377_v17 = vmax.f32 %v4295_v23, 0.0  ;;  %v4959_v50 = vadd.f32 %v8783_v58, %v4890_v31  ;;  %v5063_v34 = vadd.f32 %v8743_v1, %v4958_v22  ;;  %v8921_v8 = vmin.f32 %v4374_v63, 6.0  ;;  %v8931_v58 = vld [vmem:[#allocation6 + $0x60] sm:$0xff]  ;;  %v8933_v63 = vld [vmem:[#allocation6 + $0x68] sm:$0xff] }
 0x653   : > { %v4375_v38 = vmax.f32 %v4287_v62, 0.0  ;;  %v4823_v36 = vadd.f32 %v8790_v15, %v4718_v25  ;;  %v4891_v9 = vadd.f32 %v8740_v39, %v4822_v11  ;;  %4484 = vst [vmem:[#allocation6 + $0xc1] sm:$0xff] %v8917_v43  ;;  %6806 = vmatpush3.bf16.msra.mxu0 %v7012_v44  ;;  %v5171_v31 = vmul.f32 %v8868_v45, %v8915_v7 }
 0x654   : > { %v8926_v2 = vmin.f32 %v4377_v17, 6.0  ;;  %v5064_v24 = vadd.f32 %v8746_v42, %v4959_v50  ;;  %v5132_v48 = vadd.f32 %v5100_v51, %v5063_v34  ;;  %4482 = vst [vmem:[#allocation6 + $0xa9] sm:$0xff] %v8921_v8  ;;  %v8943_v42 = vld [vmem:[%s9901_s11] ss:$0 sm:$0xff]  ;;  %6807 = vmatprep.subr.bf16.mxu0 %v7013_v56  ;;  %v4548_v15 = vmul.f32 %v8694_v14, %v8816_v61  ;;  %v8948_v51 = vld [vmem:[#allocation6 + $0x52] sm:$0xff] }
 0x655   : > { %v8936_v22 = vmin.f32 %v4375_v38, 6.0  ;;  %v4892_v39 = vadd.f32 %v8780_v27, %v4823_v36  ;;  %v4960_v1 = vadd.f32 %v8833_v37, %v4891_v9  ;;  %v4617_v27 = vmul.f32 %v8764_v21, %v8873_v47 }
 0x656   : > { %4485 = vst [vmem:[#allocation6 + $0xc9] sm:$0xff] %v8926_v2  ;;  %v5133_v11 = vadd.f32 %v5101_v19, %v5064_v24  ;;  %v5201_v25 = vadd.f32 %v5169_v0, %v5132_v48  ;;  %v4618_v37 = vmul.f32 %v8764_v21, %v8892_v12  ;;  %v4687_v61 = vmul.f32 %v8769_v33, %v8931_v58 }
 0x657   : > { %4483 = vst [vmem:[#allocation6 + $0xb1] sm:$0xff] %v8936_v22  ;;  %v4961_v44 = vadd.f32 %v8854_v54, %v4892_v39  ;;  %v5065_v29 = vadd.f32 %v8863_v46, %v4960_v1  ;;  %v4688_v19 = vmul.f32 %v8769_v33, %v8933_v63  ;;  %6808 = vmatpush3.bf16.msra.mxu0 %v7013_v56 }
 0x658   : > { %v5202_v0 = vadd.f32 %v5170_v3, %v5133_v11  ;;  %v5240_v49 = vadd.f32 %v8943_v42, %v5201_v25  ;;  %v4649_v4 = vadd.f32 %v4617_v27, %v8823_v41  ;;  %v4650_v23 = vadd.f32 %v4618_v37, %v4548_v15  ;;  %v8984_v27 = vld [vmem:[#allocation6 + $0x6a] sm:$0xff] }
 0x659   : > { %v5066_v52 = vadd.f32 %v8877_v59, %v4961_v44  ;;  %v5134_v62 = vadd.f32 %v8845_v40, %v5065_v29  ;;  %v5172_v46 = vmul.f32 %v8868_v45, %v8948_v51  ;;  %v4861_v54 = vmul.f32 %v8708_v13, %v8785_v28 }
 0x65a   : > { %v5241_v17 = vadd.f32 %v8943_v42, %v5202_v0  ;;  %v5272_v50 = vmax.f32 %v5240_v49, 0.0  ;;  %v4719_v3 = vadd.f32 %v4687_v61, %v4649_v4  ;;  %v4720_v34 = vadd.f32 %v4688_v19, %v4650_v23  ;;  %v8995_v49 = vld [vmem:[#allocation6 + $0x78] sm:$0xff]  ;;  %v8997_v4 = vld [vmem:[#allocation6 + $0x80] sm:$0xff] }
 0x65b   : > { %v5135_v56 = vadd.f32 %v8897_v20, %v5066_v52  ;;  %v5203_v38 = vadd.f32 %v5171_v31, %v5134_v62  ;;  %v4862_v41 = vmul.f32 %v8708_v13, %v8811_v53  ;;  %v4930_v40 = vmul.f32 %v8719_v5, %v8777_v6  ;;  %v8980_v20 = vld [vmem:[#allocation6 + $0x62] sm:$0xff] }
 0x65c   : > { %v5273_v59 = vmax.f32 %v5241_v17, 0.0  ;;  %v4824_v36 = vadd.f32 %v8755_v18, %v4719_v3  ;;  %v4825_v9 = vadd.f32 %v8793_v35, %v4720_v34  ;;  %v4931_v24 = vmul.f32 %v8719_v5, %v8796_v10 }
 0x65d   : > { %v5304_v48 = vmin.f32 %v5272_v50, 6.0  ;;  %v5204_v39 = vadd.f32 %v5172_v46, %v5135_v56  ;;  %v5242_v1 = vadd.f32 %v8943_v42, %v5203_v38  ;;  %v5035_v31 = vmul.f32 %v8734_v30, %v8820_v32 }
 0x65e   : > { %v5305_v15 = vmin.f32 %v5273_v59, 6.0  ;;  %v4893_v11 = vadd.f32 %v4861_v54, %v4824_v36  ;;  %v4894_v25 = vadd.f32 %v4862_v41, %v4825_v9  ;;  %v5036_v18 = vmul.f32 %v8734_v30, %v8860_v16 }
 0x65f   : > { %v5243_v35 = vadd.f32 %v8943_v42, %v5204_v39  ;;  %v5274_v37 = vmax.f32 %v5242_v1, 0.0  ;;  %v5104_v44 = vmul.f32 %v8808_v57, %v8915_v7  ;;  %v5105_v29 = vmul.f32 %v8808_v57, %v8948_v51 }
 0x660   : > { %v5336_v61 = vpack.c.bf16 %v5305_v15, %v5304_v48  ;;  %v4962_v19 = vadd.f32 %v4930_v40, %v4893_v11  ;;  %v4963_v32 = vadd.f32 %v4931_v24, %v4894_v25  ;;  %v5173_v0 = vmul.f32 %v8868_v45, %v8980_v20  ;;  %v9019_v15 = vld [vmem:[#allocation6 + $0x7a] sm:$0xff] }
 0x661   : > { %v5275_v16 = vmax.f32 %v5243_v35, 0.0  ;;  %v5174_v23 = vmul.f32 %v8868_v45, %v8984_v27  ;;  %v4549_v52 = vmul.f32 %v8694_v14, %v8873_v47  ;;  %v4550_v62 = vmul.f32 %v8694_v14, %v8892_v12 }
 0x662   : > { %6809 = vmatprep.mubr.bf16.mxu0 %v5336_v61  ;;  %v5067_v46 = vadd.f32 %v5035_v31, %v4962_v19  ;;  %v5068_v54 = vadd.f32 %v5036_v18, %v4963_v32  ;;  %v4619_v17 = vmul.f32 %v8764_v21, %v8931_v58  ;;  %v4620_v50 = vmul.f32 %v8764_v21, %v8933_v63 }
 0x663   : > { %v5306_v3 = vmin.f32 %v5274_v37, 6.0  ;;  %v5307_v34 = vmin.f32 %v5275_v16, 6.0  ;;  %v4689_v56 = vmul.f32 %v8769_v33, %v8995_v49  ;;  %v4690_v47 = vmul.f32 %v8769_v33, %v8997_v4 }
 0x664   : > { %v5136_v38 = vadd.f32 %v5104_v44, %v5067_v46  ;;  %v5137_v41 = vadd.f32 %v5105_v29, %v5068_v54  ;;  %v4651_v12 = vadd.f32 %v4619_v17, %v4549_v52  ;;  %v4652_v40 = vadd.f32 %v4620_v50, %v4550_v62  ;;  %v9039_v52 = vld [vmem:[#allocation6 + $0x90] sm:$0xff]  ;;  %v9041_v62 = vld [vmem:[#allocation6 + $0x98] sm:$0xff]  ;;  %v9043_v46 = vld [vmem:[#allocation6 + $0x82] sm:$0xff] }
 0x665   : > { %v5337_v59 = vpack.c.bf16 %v5307_v34, %v5306_v3  ;;  %v4794_v36 = vmul.f32 %v8701_v55, %v8785_v28  ;;  %v4795_v9 = vmul.f32 %v8701_v55, %v8811_v53  ;;  %v4863_v24 = vmul.f32 %v8708_v13, %v8777_v6 }
 0x666   : > { %v5205_v48 = vadd.f32 %v5173_v0, %v5136_v38  ;;  %v5206_v39 = vadd.f32 %v5174_v23, %v5137_v41  ;;  %v4721_v1 = vadd.f32 %v4689_v56, %v4651_v12  ;;  %v4722_v31 = vadd.f32 %v4690_v47, %v4652_v40 }
 0x667   : > { %6810 = vmatmul.mubr.bf16.vlgmr.msra.gmra.mrb[116].mxu0 %v5337_v59  ;;  %v4864_v11 = vmul.f32 %v8708_v13, %v8796_v10  ;;  %v4932_v25 = vmul.f32 %v8719_v5, %v8858_v60  ;;  %v4933_v28 = vmul.f32 %v8719_v5, %v8881_v26  ;;  %v5037_v53 = vmul.f32 %v8734_v30, %v8915_v7 }
 0x668   : > { %v5244_v18 = vadd.f32 %v8943_v42, %v5205_v48  ;;  %v5245_v35 = vadd.f32 %v8943_v42, %v5206_v39  ;;  %v4826_v37 = vadd.f32 %v4794_v36, %v4721_v1  ;;  %v4827_v44 = vadd.f32 %v4795_v9, %v4722_v31 }
 0x669   : > { %v5038_v29 = vmul.f32 %v8734_v30, %v8948_v51  ;;  %v5106_v61 = vmul.f32 %v8808_v57, %v8980_v20  ;;  %v5107_v19 = vmul.f32 %v8808_v57, %v8984_v27  ;;  %v5175_v32 = vmul.f32 %v8868_v45, %v9019_v15 }
 0x66a   : > { %v5276_v0 = vmax.f32 %v5244_v18, 0.0  ;;  %v5277_v7 = vmax.f32 %v5245_v35, 0.0  ;;  %v4895_v16 = vadd.f32 %v4863_v24, %v4826_v37  ;;  %v4896_v23 = vadd.f32 %v4864_v11, %v4827_v44  ;;  %v10015_v18 = vld [vmem:[#allocation17_spill] sm:$0xff]  ;;  %v10016_v37 = vld [vmem:[#allocation14_spill] sm:$0xff]  ;;  %v9071_v44 = vld [vmem:[#allocation6 + $0x92] sm:$0xff] }
 0x66b   : > { %v4551_v51 = vmul.f32 %v8694_v14, %v8931_v58  ;;  %v4552_v54 = vmul.f32 %v8694_v14, %v8933_v63  ;;  %v4621_v17 = vmul.f32 %v8764_v21, %v8995_v49  ;;  %v4622_v50 = vmul.f32 %v8764_v21, %v8997_v4 }
 0x66c   : > { %v5308_v3 = vmin.f32 %v5276_v0, 6.0  ;;  %v5309_v34 = vmin.f32 %v5277_v7, 6.0  ;;  %v4964_v56 = vadd.f32 %v4932_v25, %v4895_v16  ;;  %v4965_v47 = vadd.f32 %v4933_v28, %v4896_v23 }
 0x66d   : > { %v4653_v38 = vadd.f32 %v4621_v17, %v4551_v51  ;;  %v4654_v41 = vadd.f32 %v4622_v50, %v4552_v54  ;;  %v4691_v12 = vmul.f32 %v8769_v33, %v9039_v52  ;;  %v4692_v58 = vmul.f32 %v8769_v33, %v9041_v62  ;;  %v9081_v51 = vld [vmem:[#allocation6 + $0xa8] sm:$0xff]  ;;  %v9087_v17 = vld [vmem:[#allocation6 + $0xb0] sm:$0xff] }
 0x66e   : > { %v5338_v40 = vpack.c.bf16 %v5309_v34, %v5308_v3  ;;  %v5069_v63 = vadd.f32 %v5037_v53, %v4964_v56  ;;  %v5070_v59 = vadd.f32 %v5038_v29, %v4965_v47  ;;  %v5176_v36 = vmul.f32 %v8868_v45, %v9043_v46  ;;  %v9091_v34 = vld [vmem:[#allocation6 + $0x9a] sm:$0xff] }
 0x66f   : > { %v4723_v9 = vadd.f32 %v4691_v12, %v4653_v38  ;;  %v4724_v24 = vadd.f32 %v4692_v58, %v4654_v41  ;;  %v4796_v48 = vmul.f32 %v8701_v55, %v8777_v6  ;;  %v4797_v39 = vmul.f32 %v8701_v55, %v8796_v10 }
 0x670   : > { %6813 = vmatprep.mubr.bf16.mxu0 %v5338_v40  ;;  %v5138_v1 = vadd.f32 %v5106_v61, %v5069_v63  ;;  %v5139_v31 = vadd.f32 %v5107_v19, %v5070_v59  ;;  %v4865_v11 = vmul.f32 %v8708_v13, %v8858_v60  ;;  %v4866_v25 = vmul.f32 %v8708_v13, %v8881_v26 }
 0x671   : > { %v4828_v28 = vadd.f32 %v4796_v48, %v4723_v9  ;;  %v4829_v53 = vadd.f32 %v4797_v39, %v4724_v24  ;;  %v4934_v35 = vmul.f32 %v8719_v5, %v10015_v18  ;;  %v4935_v6 = vmul.f32 %v8719_v5, %v10016_v37 }
 0x672   : > { %v5207_v10 = vadd.f32 %v5175_v32, %v5138_v1  ;;  %v5208_v29 = vadd.f32 %v5176_v36, %v5139_v31  ;;  %v5039_v61 = vmul.f32 %v8734_v30, %v8980_v20  ;;  %v5040_v19 = vmul.f32 %v8734_v30, %v8984_v27 }
 0x673   : > { %v4897_v0 = vadd.f32 %v4865_v11, %v4828_v28  ;;  %v4898_v7 = vadd.f32 %v4866_v25, %v4829_v53  ;;  %v5108_v16 = vmul.f32 %v8808_v57, %v9019_v15  ;;  %v5109_v23 = vmul.f32 %v8808_v57, %v9043_v46 }
 0x674   : > { %v5246_v54 = vadd.f32 %v8943_v42, %v5207_v10  ;;  %v5247_v32 = vadd.f32 %v8943_v42, %v5208_v29  ;;  %v5177_v20 = vmul.f32 %v8868_v45, %v9071_v44  ;;  %v4553_v27 = vmul.f32 %v8694_v14, %v8995_v49 }
 0x675   : > { %v4966_v50 = vadd.f32 %v4934_v35, %v4897_v0  ;;  %v4967_v3 = vadd.f32 %v4935_v6, %v4898_v7  ;;  %v4554_v56 = vmul.f32 %v8694_v14, %v8997_v4  ;;  %v4623_v47 = vmul.f32 %v8764_v21, %v9039_v52 }
 0x676   : > { %v5278_v38 = vmax.f32 %v5246_v54, 0.0  ;;  %v5279_v41 = vmax.f32 %v5247_v32, 0.0  ;;  %v4624_v12 = vmul.f32 %v8764_v21, %v9041_v62  ;;  %v4693_v58 = vmul.f32 %v8769_v33, %v9081_v51 }
 0x677   : > { %v5071_v40 = vadd.f32 %v5039_v61, %v4966_v50  ;;  %v5072_v49 = vadd.f32 %v5040_v19, %v4967_v3  ;;  %v4655_v63 = vadd.f32 %v4623_v47, %v4553_v27  ;;  %v4694_v59 = vmul.f32 %v8769_v33, %v9087_v17  ;;  %v9113_v61 = vld [vmem:[#allocation6 + $0xaa] sm:$0xff]  ;;  %v9131_v3 = vld [vmem:[#allocation6 + $0xc0] sm:$0xff] }
 0x678   : > { %v5310_v36 = vmin.f32 %v5278_v38, 6.0  ;;  %v5311_v9 = vmin.f32 %v5279_v41, 6.0  ;;  %v5178_v4 = vmul.f32 %v8868_v45, %v9091_v34  ;;  %v4656_v24 = vadd.f32 %v4624_v12, %v4554_v56  ;;  %v9133_v38 = vld [vmem:[#allocation6 + $0xc8] sm:$0xff]  ;;  %v9137_v12 = vld [vmem:[#allocation6 + $0xb2] sm:$0xff] }
 0x679   : > { %v5140_v48 = vadd.f32 %v5108_v16, %v5071_v40  ;;  %v5141_v39 = vadd.f32 %v5109_v23, %v5072_v49  ;;  %v4725_v1 = vadd.f32 %v4693_v58, %v4655_v63  ;;  %v4798_v31 = vmul.f32 %v8701_v55, %v8858_v60 }
 0x67a   : > { %v5339_v11 = vpack.c.bf16 %v5311_v9, %v5310_v36  ;;  %v4726_v25 = vadd.f32 %v4694_v59, %v4656_v24  ;;  %v4799_v28 = vmul.f32 %v8701_v55, %v8881_v26  ;;  %v4867_v53 = vmul.f32 %v8708_v13, %v10015_v18 }
 0x67b   : > { %v5209_v35 = vadd.f32 %v5177_v20, %v5140_v48  ;;  %v5210_v6 = vadd.f32 %v5178_v4, %v5141_v39  ;;  %v4830_v10 = vadd.f32 %v4798_v31, %v4725_v1  ;;  %v4868_v29 = vmul.f32 %v8708_v13, %v10016_v37 }
 0x67c   : > { %6814 = vmatmul.mubr.bf16.gmra.mrb[120].mxu0 %v5339_v11  ;;  %v4831_v19 = vadd.f32 %v4799_v28, %v4726_v25  ;;  %v4936_v60 = vmul.f32 %v8719_v5, %v8921_v8  ;;  %v4937_v0 = vmul.f32 %v8719_v5, %v8936_v22  ;;  %v5041_v26 = vmul.f32 %v8734_v30, %v9019_v15 }
 0x67d   : > { %v5248_v7 = vadd.f32 %v8943_v42, %v5209_v35  ;;  %v5249_v16 = vadd.f32 %v8943_v42, %v5210_v6  ;;  %v4899_v23 = vadd.f32 %v4867_v53, %v4830_v10  ;;  %v5042_v54 = vmul.f32 %v8734_v30, %v9043_v46 }
 0x67e   : > { %v4900_v32 = vadd.f32 %v4868_v29, %v4831_v19  ;;  %v5110_v20 = vmul.f32 %v8808_v57, %v9071_v44  ;;  %v5111_v27 = vmul.f32 %v8808_v57, %v9091_v34  ;;  %v5179_v50 = vmul.f32 %v8868_v45, %v9113_v61 }
 0x67f   : > { %v5280_v15 = vmax.f32 %v5248_v7, 0.0  ;;  %v5281_v56 = vmax.f32 %v5249_v16, 0.0  ;;  %v4968_v47 = vadd.f32 %v4936_v60, %v4899_v23  ;;  %v4555_v46 = vmul.f32 %v8694_v14, %v9039_v52 }
 0x680   : > { %v4969_v41 = vadd.f32 %v4937_v0, %v4900_v32  ;;  %v4556_v58 = vmul.f32 %v8694_v14, %v9041_v62  ;;  %v4625_v40 = vmul.f32 %v8764_v21, %v9081_v51  ;;  %v4626_v49 = vmul.f32 %v8764_v21, %v9087_v17 }
 0x681   : > { %v5312_v63 = vmin.f32 %v5280_v15, 6.0  ;;  %v5313_v59 = vmin.f32 %v5281_v56, 6.0  ;;  %v5073_v36 = vadd.f32 %v5041_v26, %v4968_v47  ;;  %v4695_v9 = vmul.f32 %v8769_v33, %v9131_v3 }
 0x682   : > { %v5074_v4 = vadd.f32 %v5042_v54, %v4969_v41  ;;  %v4657_v52 = vadd.f32 %v4625_v40, %v4555_v46  ;;  %v4658_v24 = vadd.f32 %v4626_v49, %v4556_v58  ;;  %v4696_v48 = vmul.f32 %v8769_v33, %v9133_v38 }
 0x683   : > { %v5340_v39 = vpack.c.bf16 %v5313_v59, %v5312_v63  ;;  %v5142_v62 = vadd.f32 %v5110_v20, %v5073_v36  ;;  %v5180_v1 = vmul.f32 %v8868_v45, %v9137_v12  ;;  %v4800_v31 = vmul.f32 %v8701_v55, %v10015_v18 }
 0x684   : > { %v5143_v11 = vadd.f32 %v5111_v27, %v5074_v4  ;;  %v4727_v25 = vadd.f32 %v4695_v9, %v4657_v52  ;;  %v4728_v28 = vadd.f32 %v4696_v48, %v4658_v24  ;;  %v4801_v53 = vmul.f32 %v8701_v55, %v10016_v37  ;;  %v9173_v27 = vld [vmem:[#allocation6 + $0xc2] sm:$0xff] }
 0x685   : > { %6817 = vmatprep.mubr.bf16.mxu0 %v5340_v39  ;;  %v5211_v35 = vadd.f32 %v5179_v50, %v5142_v62  ;;  %v4869_v6 = vmul.f32 %v8708_v13, %v8921_v8  ;;  %v4870_v19 = vmul.f32 %v8708_v13, %v8936_v22  ;;  %v4938_v18 = vmul.f32 %v8719_v5, %v8917_v43  ;;  %v10017_v39 = vld [vmem:[#allocation33_spill] sm:$0xff] }
 0x686   : > { %v5212_v33 = vadd.f32 %v5180_v1, %v5143_v11  ;;  %v4832_v10 = vadd.f32 %v4800_v31, %v4727_v25  ;;  %v4833_v29 = vadd.f32 %v4801_v53, %v4728_v28  ;;  %v4939_v0 = vmul.f32 %v8719_v5, %v8926_v2  ;;  %v10018_v11 = vld [vmem:[#allocation9_spill] sm:$0xff]  ;;  %v10019_v25 = vld [vmem:[#allocation10_spill] sm:$0xff] }
 0x687   : > { %v5250_v60 = vadd.f32 %v8943_v42, %v5211_v35  ;;  %v5043_v7 = vmul.f32 %v8734_v30, %v9071_v44  ;;  %v5044_v23 = vmul.f32 %v8734_v30, %v9091_v34  ;;  %v4557_v13 = vmul.f32 %v8694_v14, %v9081_v51  ;;  %v9177_v44 = vld [vmem:[#allocation6 + $0xca] sm:$0xff]  ;;  %v10020_v35 = vld [vmem:[#allocation13_spill] sm:$0xff] }
 0x688   : > { %v5251_v55 = vadd.f32 %v8943_v42, %v5212_v33  ;;  %v4901_v37 = vadd.f32 %v4869_v6, %v4832_v10  ;;  %v4902_v26 = vadd.f32 %v4870_v19, %v4833_v29  ;;  %v4558_v54 = vmul.f32 %v8694_v14, %v9087_v17  ;;  %v10022_v29 = vld [vmem:[#allocation18_spill] sm:$0xff] }
 0x689   : > { %v5282_v16 = vmax.f32 %v5250_v60, 0.0  ;;  %v4627_v50 = vmul.f32 %v8764_v21, %v9131_v3  ;;  %v5112_v30 = vmul.f32 %v8808_v57, %v9113_v61  ;;  %v5113_v51 = vmul.f32 %v8808_v57, %v9137_v12  ;;  %v10023_v60 = vld [vmem:[#allocation15_spill] sm:$0xff] }
 0x68a   : > { %v5283_v32 = vmax.f32 %v5251_v55, 0.0  ;;  %v4970_v20 = vadd.f32 %v4938_v18, %v4901_v37  ;;  %v4971_v5 = vadd.f32 %v4939_v0, %v4902_v26  ;;  %v4628_v14 = vmul.f32 %v8764_v21, %v9133_v38  ;;  %v10024_v55 = vld [vmem:[#allocation16_spill] sm:$0xff] }
 0x68b   : > { %v5314_v15 = vmin.f32 %v5282_v16, 6.0  ;;  %v9185_v47 = vadd.f32 %v4627_v50, %v4557_v13  ;;  %v5181_v46 = vmul.f32 %v8868_v45, %v9173_v27  ;;  %v5182_v63 = vmul.f32 %v8868_v45, %v9177_v44 }
 0x68c   : > { %v5315_v17 = vmin.f32 %v5283_v32, 6.0  ;;  %v5075_v34 = vadd.f32 %v5043_v7, %v4970_v20  ;;  %v5076_v56 = vadd.f32 %v5044_v23, %v4971_v5  ;;  %v9189_v41 = vadd.f32 %v4628_v14, %v4558_v54  ;;  %v10025_v7 = vld [vmem:[#allocation12_spill] sm:$0xff] }
 0x68d   : > { %v3907_v62 = vrot.slane %v10017_v39, 4  ;;  %v3726_v45 = vadd.f32 64.0, %v10018_v11  ;;  %v3721_v28 = vadd.f32 64.0, %v10019_v25  ;;  %v3736_v6 = vadd.f32 64.0, %v10020_v35  ;;  %v5922_v32 = vld [vmem:[%s7401_s26 + $0x98] sm:$0xff] }
 0x68e   : > { %v5341_v58 = vpack.c.bf16 %v5315_v17, %v5314_v15  ;;  %v5144_v40 = vadd.f32 %v5112_v30, %v5075_v34  ;;  %v5145_v49 = vadd.f32 %v5113_v51, %v5076_v56  ;;  %v3746_v19 = vadd.f32 64.0, %v10022_v29  ;;  %v5921_v15 = vld [vmem:[%s7401_s26 + $0x88] sm:$0xff] }
 0x68f   : > { %v3908_v1 = vadd.f32 %v3907_v62, %v10017_v39  ;;  %7190 = vrcp.f32 %v3726_v45  ;;  %v3741_v18 = vadd.f32 64.0, %v10023_v60  ;;  %v3756_v37 = vadd.f32 64.0, %v10024_v55  ;;  %v5927_v60 = vld [vmem:[%s7401_s26 + $0xe8] sm:$0xff] }
 0x690   : > { %6818 = vmatmul.mubr.bf16.gmra.mrb[124].mxu0 %v5341_v58  ;;  %v5213_v57 = vadd.f32 %v5181_v46, %v5144_v40  ;;  %v5214_v59 = vadd.f32 %v5182_v63, %v5145_v49  ;;  %7192 = vrcp.f32 %v3721_v28  ;;  %v3751_v16 = vadd.f32 64.0, %v10025_v7  ;;  %v5924_v58 = vld [vmem:[%s7401_s26 + $0xb8] sm:$0xff]  ;;  %v4100_v7 = vld [vmem:[#allocation2 + $0x90] sm:$0xff] }
 0x691   : > { %v3909_v31 = vrot.slane %v3908_v1, 2  ;;  %7194 = vrcp.f32 %v3736_v6 }
 0x692   : > { %v5252_v21 = vadd.f32 %v8943_v42, %v5213_v57  ;;  %v5253_v36 = vadd.f32 %v8943_v42, %v5214_v59  ;;  %v10021_v42 = vld [vmem:[#allocation11_spill] sm:$0xff]  ;;  %v5923_v57 = vld [vmem:[%s7401_s26 + $0xa8] sm:$0xff] }
 0x693   : > { %v3910_v53 = vadd.f32 %v3909_v31, %v3908_v1  ;;  %v3731_v33 = vadd.f32 64.0, %v10021_v42  ;;  %v5925_v31 = vld [vmem:[%s7401_s26 + $0xc8] sm:$0xff]  ;;  %v5928_v42 = vld [vmem:[%s7401_s26 + $0xf8] sm:$0xff] }
 0x694   : > { %v5284_v9 = vmax.f32 %v5252_v21, 0.0  ;;  %v5285_v4 = vmax.f32 %v5253_v36, 0.0 }
 0x695   : > { %v3911_v10 = vrot.slane %v3910_v53, 1  ;;  %7196 = vrcp.f32 %v3731_v33 }
 0x696   : > { %v5316_v52 = vmin.f32 %v5284_v9, 6.0  ;;  %v5317_v24 = vmin.f32 %v5285_v4, 6.0  ;;  %7198 = vrcp.f32 %v3746_v19 }
 0x697   : > { %v3912_v0 = vadd.f32 %v3911_v10, %v3910_v53  ;;  %7200 = vrcp.f32 %v3741_v18  ;;  %v4098_v18 = vld [vmem:[#allocation2 + $0x80] sm:$0xff] }
 0x698   : > { %v5342_v48 = vpack.c.bf16 %v5317_v24, %v5316_v52  ;;  %7202 = vrcp.f32 %v3756_v37 }
 0x699   : > { %v7191_v54 = vpop.eup %7190  ;;  %7204 = vrcp.f32 %v3751_v16 }
 0x69a   : > { %6821 = vmatprep.mubr.bf16.mxu0 %v5342_v48  ;;  %v7193_v5 = vpop.eup %7192  ;;  %v5926_v48 = vld [vmem:[%s7401_s26 + $0xd8] sm:$0xff] }
 0x69b   : > { %v7195_v56 = vpop.eup %7194 }
 0x69f   : > { %v7197_v49 = vpop.eup %7196 }
 0x6a0   : > { %v7199_v52 = vpop.eup %7198 }
 0x6a1   : > { %v7201_v62 = vpop.eup %7200 }
 0x6a2   : > { %v7203_v35 = vpop.eup %7202 }
 0x6a3   : > { %v7205_v29 = vpop.eup %7204 }
 0x70d   : > { %v6747_v26 = vpop.f32.mrb[108].mxu0 }
 0x70e   : > { %v4009_v23 = vadd.f32 %v6747_v26, %v3912_v0  ;;  %v4003_v13 = vpop.f32.mrb[109].mxu0 }
 0x70f   : > { %v4004_v20 = vadd.f32 %v4003_v13, %v3912_v0 }
 0x710   : > { %v4051_v50 = vmul.f32 %v7191_v54, %v4009_v23 }
 0x711   : > { %v4050_v30 = vmul.f32 %v7193_v5, %v4004_v20  ;;  %v6750_v51 = vpop.f32.mrb[110].mxu0 }
 0x712   : > { %v4067_v14 = vadd.f32 %v5922_v32, %v4051_v50  ;;  %v4019_v17 = vadd.f32 %v6750_v51, %v3912_v0  ;;  %v4013_v34 = vpop.f32.mrb[111].mxu0  ;;  %v4104_v50 = vld [vmem:[#allocation2 + $0xb0] sm:$0xff] }
 0x713   : > { %v4066_v46 = vadd.f32 %v5921_v15, %v4050_v30  ;;  %v4014_v40 = vadd.f32 %v4013_v34, %v3912_v0  ;;  %v4106_v30 = vld [vmem:[#allocation2 + $0xc0] sm:$0xff]  ;;  %v4108_v34 = vld [vmem:[#allocation2 + $0xd0] sm:$0xff] }
 0x714   : > { %4075 = vst.msk [vmem:[#allocation2 + $0x98] sm:$0xff] %vm544_vm0, %v4067_v14  ;;  %v4053_v63 = vmul.f32 %v7195_v56, %v4019_v17 }
 0x715   : > { %4074 = vst.msk [vmem:[#allocation2 + $0x88] sm:$0xff] %vm544_vm0, %v4066_v46  ;;  %v4052_v59 = vmul.f32 %v7197_v49, %v4014_v40  ;;  %v6753_v21 = vpop.f32.mrb[112].mxu0  ;;  %v4110_v46 = vld [vmem:[#allocation2 + $0xe0] sm:$0xff]  ;;  %v4112_v49 = vld [vmem:[#allocation2 + $0xf0] sm:$0xff] }
 0x716   : > { %v4069_v36 = vadd.f32 %v5924_v58, %v4053_v63  ;;  %v4029_v9 = vadd.f32 %v6753_v21, %v3912_v0  ;;  %v4023_v4 = vpop.f32.mrb[113].mxu0 }
 0x717   : > { %v4068_v24 = vadd.f32 %v5923_v57, %v4052_v59  ;;  %v4024_v39 = vadd.f32 %v4023_v4, %v3912_v0  ;;  %v5964_v57 = vld [vmem:[%s9903_s13] ss:$0 sm:$0xff] }
 0x718   : > { %4077 = vst.msk [vmem:[#allocation2 + $0xb8] sm:$0xff] %vm544_vm0, %v4069_v36  ;;  %v4055_v1 = vmul.f32 %v7199_v52, %v4029_v9  ;;  %v7244_v52 = vld [vmem:[#allocation2 + $0x10] sm:$0xff] }
 0x719   : > { %4076 = vst.msk [vmem:[#allocation2 + $0xa8] sm:$0xff] %vm544_vm0, %v4068_v24  ;;  %v4054_v11 = vmul.f32 %v7201_v62, %v4024_v39  ;;  %v6756_v45 = vpop.f32.mrb[114].mxu0  ;;  %v7245_v62 = vld [vmem:[#allocation2] sm:$0xff] }
 0x71a   : > { %v4071_v25 = vadd.f32 %v5926_v48, %v4055_v1  ;;  %v4039_v28 = vadd.f32 %v6756_v45, %v3912_v0  ;;  %v4033_v53 = vpop.f32.mrb[115].mxu0 }
 0x71b   : > { %v4070_v6 = vadd.f32 %v5925_v31, %v4054_v11  ;;  %v4034_v33 = vadd.f32 %v4033_v53, %v3912_v0  ;;  %v4101_v10 = vld [vmem:[#allocation2 + $0x98] sm:$0xff]  ;;  %v4102_v0 = vld [vmem:[#allocation2 + $0xa0] sm:$0xff] }
 0x71c   : > { %4079 = vst.msk [vmem:[#allocation2 + $0xd8] sm:$0xff] %vm544_vm0, %v4071_v25  ;;  %v4057_v19 = vmul.f32 %v7203_v35, %v4039_v28  ;;  %v4099_v55 = vld [vmem:[#allocation2 + $0x88] sm:$0xff]  ;;  %v4123_v23 = vpack.c.bf16 %v4101_v10, %v4100_v7  ;;  %v7246_v11 = vld [vmem:[#allocation2 + $0x18] sm:$0xff]  ;;  %v7248_v10 = vld [vmem:[#allocation2 + $0x30] sm:$0xff] }
 0x71d   : > { %4078 = vst.msk [vmem:[#allocation2 + $0xc8] sm:$0xff] %vm544_vm0, %v4070_v6  ;;  %v4056_v37 = vmul.f32 %v7205_v29, %v4034_v33  ;;  %v4122_v26 = vpack.c.bf16 %v4099_v55, %v4098_v18  ;;  %v7247_v25 = vld [vmem:[#allocation2 + $0x8] sm:$0xff]  ;;  %v7249_v18 = vld [vmem:[#allocation2 + $0x20] sm:$0xff] }
 0x71e   : > { %v4073_v16 = vadd.f32 %v5928_v42, %v4057_v19 }
 0x71f   : > { %v4072_v13 = vadd.f32 %v5927_v60, %v4056_v37  ;;  %6777 = vmatprep.mubr.msk.bf16.mxu1 %vm544_vm0, %v4122_v26  ;;  %v4105_v20 = vld [vmem:[#allocation2 + $0xb8] sm:$0xff] }
 0x720   : > { %4081 = vst.msk [vmem:[#allocation2 + $0xf8] sm:$0xff] %vm544_vm0, %v4073_v16  ;;  %6778 = vmatmul.mubr.msk.bf16.gmra.mrb[140].mxu1 %vm544_vm0, %v4123_v23  ;;  %v4103_v54 = vld [vmem:[#allocation2 + $0xa8] sm:$0xff]  ;;  %v4125_v15 = vpack.c.bf16 %v4105_v20, %v4104_v50  ;;  %v7250_v26 = vld [vmem:[#allocation2 + $0x38] sm:$0xff] }
 0x721   : > { %4080 = vst.msk [vmem:[#allocation2 + $0xe8] sm:$0xff] %vm544_vm0, %v4072_v13  ;;  %v4124_v32 = vpack.c.bf16 %v4103_v54, %v4102_v0  ;;  %v7251_v16 = vld [vmem:[#allocation2 + $0x28] sm:$0xff] }
 0x723   : > { %6781 = vmatprep.mubr.msk.bf16.mxu1 %vm544_vm0, %v4124_v32  ;;  %v4109_v14 = vld [vmem:[#allocation2 + $0xd8] sm:$0xff] }
 0x724   : > { %v4107_v5 = vld [vmem:[#allocation2 + $0xc8] sm:$0xff]  ;;  %v4127_v56 = vpack.c.bf16 %v4109_v14, %v4108_v34  ;;  %v7254_v34 = vld [vmem:[#allocation2 + $0x58] sm:$0xff] }
 0x725   : > { %v4126_v51 = vpack.c.bf16 %v4107_v5, %v4106_v30  ;;  %v7252_v5 = vld [vmem:[#allocation2 + $0x50] sm:$0xff] }
 0x727   : > { %v4113_v40 = vld [vmem:[#allocation2 + $0xf8] sm:$0xff] }
 0x728   : > { %6782 = vmatmul.mubr.msk.bf16.gmra.mrb[144].mxu1 %vm544_vm0, %v4125_v15  ;;  %v4111_v17 = vld [vmem:[#allocation2 + $0xe8] sm:$0xff]  ;;  %v4129_v63 = vpack.c.bf16 %v4113_v40, %v4112_v49  ;;  %v9266_v49 = vld [vmem:[%s9899_s9] ss:$0 sm:$0xff] }
 0x729   : > { %6785 = vmatprep.mubr.msk.bf16.mxu1 %vm544_vm0, %v4126_v51  ;;  %v4128_v58 = vpack.c.bf16 %v4111_v17, %v4110_v46  ;;  %v7253_v51 = vld [vmem:[#allocation2 + $0x40] sm:$0xff]  ;;  %v7255_v46 = vld [vmem:[#allocation2 + $0x48] sm:$0xff] }
 0x730   : > { %6786 = vmatmul.mubr.msk.bf16.gmra.mrb[148].mxu1 %vm544_vm0, %v4127_v56 }
 0x731   : > { %6789 = vmatprep.mubr.msk.bf16.mxu1 %vm544_vm0, %v4128_v58 }
 0x738   : > { %6790 = vmatmul.mubr.msk.bf16.gmra.mrb[152].mxu1 %vm544_vm0, %v4129_v63 }
 0x73a   : > { %v6811_v59 = vpop.f32.mrb[116].mxu0 }
 0x73b   : > { %v5466_v21 = vadd.f32 %v6811_v59, %v5964_v57  ;;  %v5457_v36 = vpop.f32.mrb[117].mxu0 }
 0x73c   : > { %v5458_v9 = vadd.f32 %v5964_v57, %v5457_v36  ;;  %v6812_v4 = vpop.f32.mrb[118].mxu0 }
 0x73d   : > { %v5586_v24 = vadd.f32 %v7244_v52, %v5466_v21  ;;  %v5469_v48 = vadd.f32 %v6812_v4, %v5964_v57  ;;  %v5460_v39 = vpop.f32.mrb[119].mxu0 }
 0x73e   : > { %v5584_v1 = vadd.f32 %v7245_v62, %v5458_v9  ;;  %v5461_v31 = vadd.f32 %v5964_v57, %v5460_v39  ;;  %v9275_v62 = vld [vmem:[%s9900_s10 + $0x1] ss:$0 sm:$0xff] }
 0x73f   : > { %5618 = vst.msk [vmem:[%s9237_s20 + $0x10] sm:$0xff] %vm544_vm0, %v5586_v24  ;;  %v5587_v45 = vadd.f32 %v7246_v11, %v5469_v48 }
 0x740   : > { %5616 = vst.msk [vmem:[%s9237_s20] sm:$0xff] %vm544_vm0, %v5584_v1  ;;  %v5585_v28 = vadd.f32 %v7247_v25, %v5461_v31  ;;  %v9279_v1 = vmul.f32 %v9275_v62, %v8921_v8  ;;  %v9283_v31 = vmul.f32 %v9275_v62, %v8936_v22  ;;  %v9288_v25 = vld [vmem:[%s9900_s10 + $0x5] ss:$0 sm:$0xff]  ;;  %v9301_v22 = vld [vmem:[%s9900_s10 + $0x2] ss:$0 sm:$0xff] }
 0x741   : > { %5619 = vst.msk [vmem:[%s9237_s20 + $0x18] sm:$0xff] %vm544_vm0, %v5587_v45  ;;  %10026 = vst [vmem:[#allocation19_spill] sm:$0xff] %v9288_v25 }
 0x742   : > { %5617 = vst.msk [vmem:[%s9237_s20 + $0x8] sm:$0xff] %vm544_vm0, %v5585_v28  ;;  %v9292_v28 = vmul.f32 %v9288_v25, %v8917_v43  ;;  %10027 = vst [vmem:[#allocation22_spill] sm:$0xff] %v9301_v22 }
 0x74f   : > { %v6815_v53 = vpop.f32.mrb[120].mxu0 }
 0x750   : > { %v5482_v35 = vadd.f32 %v6815_v53, %v5964_v57  ;;  %v5473_v6 = vpop.f32.mrb[121].mxu0  ;;  %v9296_v53 = vmul.f32 %v9288_v25, %v8926_v2 }
 0x751   : > { %v5474_v42 = vadd.f32 %v5964_v57, %v5473_v6  ;;  %v6816_v33 = vpop.f32.mrb[122].mxu0  ;;  %v9309_v6 = vmul.f32 %v9301_v22, %v9137_v12  ;;  %v9329_v12 = vld [vmem:[%s9900_s10] ss:$0 sm:$0xff] }
 0x752   : > { %v5590_v29 = vadd.f32 %v7248_v10, %v5482_v35  ;;  %v5485_v19 = vadd.f32 %v6816_v33, %v5964_v57  ;;  %v5476_v60 = vpop.f32.mrb[123].mxu0  ;;  %v9305_v35 = vmul.f32 %v9301_v22, %v9113_v61 }
 0x753   : > { %v5588_v55 = vadd.f32 %v7249_v18, %v5474_v42  ;;  %v5477_v37 = vadd.f32 %v5964_v57, %v5476_v60  ;;  %v9314_v42 = vld [vmem:[%s9900_s10 + $0x6] ss:$0 sm:$0xff]  ;;  %v9337_v60 = vmul.f32 %v9329_v12, %v9133_v38 }
 0x754   : > { %5622 = vst.msk [vmem:[%s9237_s20 + $0x30] sm:$0xff] %vm544_vm0, %v5590_v29  ;;  %v5591_v7 = vadd.f32 %v7250_v26, %v5485_v19  ;;  %v9318_v33 = vmul.f32 %v9314_v42, %v9173_v27  ;;  %v9324_v61 = vmul.f32 %v9314_v42, %v9177_v44  ;;  %v9333_v19 = vmul.f32 %v9329_v12, %v9131_v3 }
 0x755   : > { %5620 = vst.msk [vmem:[%s9237_s20 + $0x20] sm:$0xff] %vm544_vm0, %v5588_v55  ;;  %v5589_v23 = vadd.f32 %v7251_v16, %v5477_v37  ;;  %v9342_v37 = vmul.f32 %v9275_v62, %v8917_v43  ;;  %v9346_v26 = vmul.f32 %v9275_v62, %v8926_v2  ;;  %v9350_v3 = vmul.f32 %v9301_v22, %v9173_v27  ;;  %v9357_v16 = vld [vmem:[%s9900_s10 + $0x9] ss:$0 sm:$0xff] }
 0x756   : > { %5623 = vst.msk [vmem:[%s9237_s20 + $0x38] sm:$0xff] %vm544_vm0, %v5591_v7  ;;  %v9364_v2 = vmul.f32 %v9301_v22, %v9177_v44 }
 0x757   : > { %5621 = vst.msk [vmem:[%s9237_s20 + $0x28] sm:$0xff] %vm544_vm0, %v5589_v23 }
 0x763   : > { %v6819_v13 = vpop.f32.mrb[124].mxu0 }
 0x764   : > { %v5498_v0 = vadd.f32 %v6819_v13, %v5964_v57  ;;  %v5489_v54 = vpop.f32.mrb[125].mxu0 }
 0x765   : > { %v5490_v32 = vadd.f32 %v5964_v57, %v5489_v54  ;;  %v6820_v20 = vpop.f32.mrb[126].mxu0 }
 0x766   : > { %v5594_v50 = vadd.f32 %v7252_v5, %v5498_v0  ;;  %v5501_v15 = vadd.f32 %v6820_v20, %v5964_v57  ;;  %v5492_v30 = vpop.f32.mrb[127].mxu0 }
 0x767   : > { %v5592_v14 = vadd.f32 %v7253_v51, %v5490_v32  ;;  %v5493_v17 = vadd.f32 %v5964_v57, %v5492_v30 }
 0x768   : > { %5626 = vst.msk [vmem:[%s9237_s20 + $0x50] sm:$0xff] %vm544_vm0, %v5594_v50  ;;  %v5595_v56 = vadd.f32 %v7254_v34, %v5501_v15 }
 0x769   : > { %5624 = vst.msk [vmem:[%s9237_s20 + $0x40] sm:$0xff] %vm544_vm0, %v5592_v14  ;;  %v5593_v58 = vadd.f32 %v7255_v46, %v5493_v17 }
 0x76a   : > { %5627 = vst.msk [vmem:[%s9237_s20 + $0x58] sm:$0xff] %vm544_vm0, %v5595_v56 }
 0x76b   : > { %5625 = vst.msk [vmem:[%s9237_s20 + $0x48] sm:$0xff] %vm544_vm0, %v5593_v58 }
 0x7f3   : > { %v6779_v40 = vpop.f32.mrb[140].mxu1 }
 0x7f4   : > { %v4308_v63 = vadd.f32 %v9266_v49, %v6779_v40  ;;  %v4299_v57 = vpop.f32.mrb[141].mxu1 }
 0x7f5   : > { %v4300_v59 = vadd.f32 %v9266_v49, %v4299_v57  ;;  %v6780_v21 = vpop.f32.mrb[142].mxu1  ;;  %v9408_v57 = vld [vmem:[%s9900_s10 + $0x8] ss:$0 sm:$0xff] }
 0x7f6   : > { %v4380_v36 = vmax.f32 %v4308_v63, 0.0  ;;  %v4311_v9 = vadd.f32 %v9266_v49, %v6780_v21  ;;  %v4302_v4 = vpop.f32.mrb[143].mxu1 }
 0x7f7   : > { %v4378_v52 = vmax.f32 %v4300_v59, 0.0  ;;  %v4303_v24 = vadd.f32 %v9266_v49, %v4302_v4 }
 0x7f8   : > { %v4412_v48 = vmin.f32 %v4380_v36, 6.0  ;;  %v4381_v39 = vmax.f32 %v4311_v9, 0.0  ;;  %v9419_v36 = vld [vmem:[%s9900_s10 + $0x4] ss:$0 sm:$0xff] }
 0x7f9   : > { %v4410_v11 = vmin.f32 %v4378_v52, 6.0  ;;  %v4379_v45 = vmax.f32 %v4303_v24, 0.0 }
 0x7fa   : > { %4488 = vst [vmem:[#allocation6 + $0xf1] sm:$0xff] %v4412_v48  ;;  %v4413_v8 = vmin.f32 %v4381_v39, 6.0  ;;  %v9360_v43 = vmul.f32 %v9357_v16, %v4412_v48  ;;  %v9367_v27 = vmul.f32 %v9288_v25, %v4412_v48  ;;  %v9374_v32 = vmul.f32 %v9275_v62, %v4412_v48 }
 0x7fb   : > { %4486 = vst [vmem:[#allocation6 + $0xd9] sm:$0xff] %v4410_v11  ;;  %v9320_v10 = vmin.f32 %v4379_v45, 6.0  ;;  %v6783_v29 = vpop.f32.mrb[144].mxu1  ;;  %v9371_v54 = vmul.f32 %v9357_v16, %v4410_v11  ;;  %v9378_v50 = vmul.f32 %v9288_v25, %v4410_v11  ;;  %v9381_v44 = vmul.f32 %v9275_v62, %v4410_v11 }
 0x7fc   : > { %4489 = vst [vmem:[#allocation6 + $0xf9] sm:$0xff] %v4413_v8  ;;  %v4324_v18 = vadd.f32 %v9266_v49, %v6783_v29  ;;  %v4315_v55 = vpop.f32.mrb[145].mxu1  ;;  %10028 = vst [vmem:[#allocation20_spill] sm:$0xff] %v9367_v27  ;;  %v9386_v51 = vmul.f32 %v9357_v16, %v4413_v8  ;;  %v9389_v14 = vmul.f32 %v9288_v25, %v4413_v8 }
 0x7fd   : > { %4487 = vst [vmem:[#allocation6 + $0xe1] sm:$0xff] %v9320_v10  ;;  %v4316_v38 = vadd.f32 %v9266_v49, %v4315_v55  ;;  %v6784_v7 = vpop.f32.mrb[146].mxu1  ;;  %10029 = vst [vmem:[#allocation23_spill] sm:$0xff] %v9374_v32  ;;  %v9395_v56 = vmul.f32 %v9357_v16, %v9320_v10  ;;  %v9400_v58 = vmul.f32 %v9275_v62, %v4413_v8 }
 0x7fe   : > { %v4384_v23 = vmax.f32 %v4324_v18, 0.0  ;;  %v4327_v13 = vadd.f32 %v9266_v49, %v6784_v7  ;;  %v4318_v0 = vpop.f32.mrb[147].mxu1  ;;  %10031 = vst [vmem:[#allocation26_spill] sm:$0xff] %v9389_v14  ;;  %v9414_v21 = vmul.f32 %v9288_v25, %v9320_v10 }
 0x7ff   : > { %v4382_v20 = vmax.f32 %v4316_v38, 0.0  ;;  %v4319_v5 = vadd.f32 %v9266_v49, %v4318_v0  ;;  %10032 = vst [vmem:[#allocation25_spill] sm:$0xff] %v9400_v58 }
 0x800   : > { %v9383_v15 = vmin.f32 %v4384_v23, 6.0  ;;  %v4385_v30 = vmax.f32 %v4327_v13, 0.0  ;;  %v9450_v13 = vld [vmem:[%s9900_s10 + $0xa] ss:$0 sm:$0xff] }
 0x801   : > { %v9391_v17 = vmin.f32 %v4382_v20, 6.0  ;;  %v4383_v34 = vmax.f32 %v4319_v5, 0.0  ;;  %v9397_v46 = vld [vmem:[#allocation6 + $0xf0] sm:$0xff]  ;;  %10036 = vst [vmem:[#allocation27_spill] sm:$0xff] %v9450_v13 }
 0x802   : > { %10030 = vst [vmem:[#allocation21_spill] sm:$0xff] %v9383_v15  ;;  %4492 = vst [vmem:[#allocation6 + $0x121] sm:$0xff] %v9383_v15  ;;  %v9403_v40 = vmin.f32 %v4385_v30, 6.0  ;;  %v4520_v63 = vld [vmem:[#allocation6 + $0xd8] sm:$0xff]  ;;  %v4699_v59 = vmul.f32 %v9408_v57, %v9397_v46  ;;  %v9423_v9 = vmul.f32 %v9419_v36, %v9397_v46 }
 0x803   : > { %4490 = vst [vmem:[#allocation6 + $0x109] sm:$0xff] %v9391_v17  ;;  %v9426_v4 = vmin.f32 %v4383_v34, 6.0  ;;  %v6787_v52 = vpop.f32.mrb[148].mxu1  ;;  %v4697_v24 = vmul.f32 %v9408_v57, %v4520_v63  ;;  %v9429_v48 = vld [vmem:[#allocation6 + $0xf8] sm:$0xff]  ;;  %v4629_v39 = vmul.f32 %v9419_v36, %v4520_v63  ;;  %v9437_v8 = vmul.f32 %v9329_v12, %v4520_v63 }
 0x804   : > { %10033 = vst [vmem:[#allocation30_spill] sm:$0xff] %v9403_v40  ;;  %v9432_v11 = vld [vmem:[#allocation6 + $0xf2] sm:$0xff]  ;;  %v9434_v45 = vld [vmem:[#allocation6 + $0xfa] sm:$0xff]  ;;  %4493 = vst [vmem:[#allocation6 + $0x129] sm:$0xff] %v9403_v40  ;;  %v4340_v29 = vadd.f32 %v9266_v49, %v6787_v52  ;;  %v4331_v18 = vpop.f32.mrb[149].mxu1  ;;  %v4700_v23 = vmul.f32 %v9408_v57, %v9429_v48 }
 0x805   : > { %10034 = vst [vmem:[#allocation28_spill] sm:$0xff] %v9432_v11  ;;  %10035 = vst [vmem:[#allocation29_spill] sm:$0xff] %v9434_v45  ;;  %v4521_v55 = vld [vmem:[#allocation6 + $0xe0] sm:$0xff]  ;;  %v9454_v0 = vmul.f32 %v9450_v13, %v9432_v11  ;;  %v9458_v20 = vmul.f32 %v9450_v13, %v9434_v45  ;;  %v4332_v5 = vadd.f32 %v9266_v49, %v4331_v18  ;;  %v6788_v30 = vpop.f32.mrb[150].mxu1 }
 0x806   : > { %v9441_v38 = vld [vmem:[#allocation6 + $0xda] sm:$0xff]  ;;  %v9443_v7 = vld [vmem:[#allocation6 + $0xe2] sm:$0xff]  ;;  %4491 = vst [vmem:[#allocation6 + $0x111] sm:$0xff] %v9426_v4  ;;  %v4698_v34 = vmul.f32 %v9408_v57, %v4521_v55  ;;  %v4729_v63 = vadd.f32 %v4697_v24, %v9185_v47  ;;  %v4388_v58 = vmax.f32 %v4340_v29, 0.0  ;;  %v4343_v40 = vadd.f32 %v9266_v49, %v6788_v30  ;;  %v4334_v32 = vpop.f32.mrb[151].mxu1 }
 0x807   : > { %v5183_v52 = vmul.f32 %v9450_v13, %v9441_v38  ;;  %v9469_v15 = vmul.f32 %v9450_v13, %v9443_v7  ;;  %v4630_v25 = vmul.f32 %v9419_v36, %v4521_v55  ;;  %v4386_v45 = vmax.f32 %v4332_v5, 0.0 }
 0x808   : > { %v4335_v18 = vadd.f32 %v9266_v49, %v4334_v32  ;;  %v4730_v14 = vadd.f32 %v4698_v34, %v9189_v41  ;;  %v4834_v47 = vadd.f32 %v9279_v1, %v4729_v63  ;;  %v9475_v24 = vmin.f32 %v4388_v58, 6.0 }
 0x809   : > { %v4389_v27 = vmax.f32 %v4343_v40, 0.0  ;;  %v4661_v29 = vadd.f32 %v4629_v39, %v9333_v19  ;;  %v4662_v30 = vadd.f32 %v4630_v25, %v9337_v60  ;;  %v9479_v11 = vmin.f32 %v4386_v45, 6.0 }
 0x80a   : > { %v4387_v13 = vmax.f32 %v4335_v18, 0.0  ;;  %v4835_v22 = vadd.f32 %v9283_v31, %v4730_v14  ;;  %v4903_v5 = vadd.f32 %v9292_v28, %v4834_v47  ;;  %4496 = vst [vmem:[#allocation6 + $0x151] sm:$0xff] %v9475_v24  ;;  %v5116_v58 = vmul.f32 %v9314_v42, %v9441_v38 }
 0x80b   : > { %v9484_v32 = vmin.f32 %v4389_v27, 6.0  ;;  %v4731_v41 = vadd.f32 %v4699_v59, %v4661_v29  ;;  %v4732_v1 = vadd.f32 %v4700_v23, %v4662_v30  ;;  %4494 = vst [vmem:[#allocation6 + $0x139] sm:$0xff] %v9479_v11  ;;  %v6791_v25 = vpop.f32.mrb[152].mxu1  ;;  %v5117_v28 = vmul.f32 %v9314_v42, %v9443_v7 }
 0x80c   : > { %v9489_v19 = vmin.f32 %v4387_v13, 6.0  ;;  %v4904_v60 = vadd.f32 %v9296_v53, %v4835_v22  ;;  %v4972_v31 = vadd.f32 %v9371_v54, %v4903_v5  ;;  %v4356_v27 = vadd.f32 %v9266_v49, %v6791_v25  ;;  %v4347_v14 = vpop.f32.mrb[153].mxu1  ;;  %v9519_v25 = vld [vmem:[#allocation6 + $0x108] sm:$0xff] }
 0x80d   : > { %4497 = vst [vmem:[#allocation6 + $0x159] sm:$0xff] %v9484_v32  ;;  %v4836_v40 = vadd.f32 %v9342_v37, %v4731_v41  ;;  %v4837_v59 = vadd.f32 %v9346_v26, %v4732_v1  ;;  %v4562_v39 = vmul.f32 %v9329_v12, %v4521_v55  ;;  %v4348_v53 = vadd.f32 %v9266_v49, %v4347_v14  ;;  %v6792_v22 = vpop.f32.mrb[154].mxu1 }
 0x80e   : > { %4495 = vst [vmem:[#allocation6 + $0x141] sm:$0xff] %v9489_v19  ;;  %v4973_v54 = vadd.f32 %v9395_v56, %v4904_v60  ;;  %v5077_v45 = vadd.f32 %v9305_v35, %v4972_v31  ;;  %v4632_v23 = vmul.f32 %v9419_v36, %v9429_v48  ;;  %v4392_v13 = vmax.f32 %v4356_v27, 0.0  ;;  %v4350_v37 = vpop.f32.mrb[155].mxu1 }
 0x80f   : > { %v4359_v34 = vadd.f32 %v9266_v49, %v6792_v22  ;;  %v4905_v26 = vadd.f32 %v9378_v50, %v4836_v40  ;;  %v4906_v55 = vadd.f32 %v9414_v21, %v4837_v59  ;;  %v4390_v63 = vmax.f32 %v4348_v53, 0.0 }
 0x810   : > { %v4351_v18 = vadd.f32 %v9266_v49, %v4350_v37  ;;  %v5078_v47 = vadd.f32 %v9309_v6, %v4973_v54  ;;  %v5146_v56 = vadd.f32 %v9318_v33, %v5077_v45  ;;  %v9512_v29 = vmin.f32 %v4392_v13, 6.0  ;;  %v9521_v49 = vld [vmem:[#allocation6 + $0x110] sm:$0xff]  ;;  %v10037_v37 = vld [vmem:[#allocation22_spill] sm:$0xff] }
 0x811   : > { %v4393_v35 = vmax.f32 %v4359_v34, 0.0  ;;  %v4974_v30 = vadd.f32 %v9360_v43, %v4905_v26  ;;  %v4975_v5 = vadd.f32 %v9386_v51, %v4906_v55  ;;  %v9516_v41 = vmin.f32 %v4390_v63, 6.0  ;;  %v10038_v63 = vld [vmem:[#allocation28_spill] sm:$0xff] }
 0x812   : > { %v4391_v1 = vmax.f32 %v4351_v18, 0.0  ;;  %v5147_v50 = vadd.f32 %v9324_v61, %v5078_v47  ;;  %v5215_v21 = vadd.f32 %v5183_v52, %v5146_v56  ;;  %4500 = vst [vmem:[#allocation6 + $0x181] sm:$0xff] %v9512_v29  ;;  %v4663_v51 = vadd.f32 %v9423_v9, %v9437_v8  ;;  %v9537_v52 = vld [vmem:[%s9901_s11] ss:$0 sm:$0xff] }
 0x813   : > { %v9524_v6 = vmin.f32 %v4393_v35, 6.0  ;;  %v5079_v33 = vadd.f32 %v9350_v3, %v4974_v30  ;;  %v5080_v43 = vadd.f32 %v9364_v2, %v4975_v5  ;;  %4498 = vst [vmem:[#allocation6 + $0x169] sm:$0xff] %v9516_v41  ;;  %v4664_v27 = vadd.f32 %v4632_v23, %v4562_v39  ;;  %v10039_v35 = vld [vmem:[#allocation20_spill] sm:$0xff]  ;;  %v10040_v5 = vld [vmem:[#allocation26_spill] sm:$0xff] }
 0x814   : > { %v9531_v60 = vmin.f32 %v4391_v1, 6.0  ;;  %v5216_v61 = vadd.f32 %v9469_v15, %v5147_v50  ;;  %v5254_v31 = vadd.f32 %v9537_v52, %v5215_v21  ;;  %v4701_v9 = vmul.f32 %v9408_v57, %v9519_v25  ;;  %v9572_v21 = vld [vmem:[#allocation6 + $0x112] sm:$0xff] }
 0x815   : > { %4501 = vst [vmem:[#allocation6 + $0x189] sm:$0xff] %v9524_v6  ;;  %v5148_v3 = vadd.f32 %v5116_v58, %v5079_v33  ;;  %v5149_v2 = vadd.f32 %v5117_v28, %v5080_v43  ;;  %v4702_v8 = vmul.f32 %v9408_v57, %v9521_v49  ;;  %v4807_v40 = vmul.f32 %v9275_v62, %v9320_v10  ;;  %v10041_v33 = vld [vmem:[#allocation29_spill] sm:$0xff]  ;;  %v10042_v43 = vld [vmem:[#allocation27_spill] sm:$0xff] }
 0x816   : > { %4499 = vst [vmem:[#allocation6 + $0x171] sm:$0xff] %v9531_v60  ;;  %v5255_v15 = vadd.f32 %v9537_v52, %v5216_v61  ;;  %v5286_v14 = vmax.f32 %v5254_v31, 0.0  ;;  %v4563_v59 = vmul.f32 %v9329_v12, %v9397_v46  ;;  %v4733_v39 = vadd.f32 %v4701_v9, %v4663_v51 }
 0x817   : > { %v5217_v58 = vadd.f32 %v9454_v0, %v5148_v3  ;;  %v5218_v28 = vadd.f32 %v9458_v20, %v5149_v2  ;;  %v4734_v53 = vadd.f32 %v4702_v8, %v4664_v27  ;;  %v4944_v45 = vmul.f32 %v9357_v16, %v9391_v17  ;;  %v9560_v0 = vld [vmem:[#allocation6 + $0x10a] sm:$0xff] }
 0x818   : > { %v5287_v22 = vmax.f32 %v5255_v15, 0.0  ;;  %v5318_v54 = vmin.f32 %v5286_v14, 6.0  ;;  %v4945_v23 = vmul.f32 %v9357_v16, %v9426_v4  ;;  %v4838_v46 = vadd.f32 %v9381_v44, %v4733_v39  ;;  %v9570_v44 = vld [vmem:[#allocation6 + $0x120] sm:$0xff]  ;;  %v9580_v2 = vld [vmem:[#allocation6 + $0x128] sm:$0xff] }
 0x819   : > { %v5256_v13 = vadd.f32 %v9537_v52, %v5217_v58  ;;  %v5257_v10 = vadd.f32 %v9537_v52, %v5218_v28  ;;  %v4839_v34 = vadd.f32 %v4807_v40, %v4734_v53  ;;  %v5049_v26 = vmul.f32 %v10037_v37, %v9441_v38 }
 0x81a   : > { %v5319_v20 = vmin.f32 %v5287_v22, 6.0  ;;  %v5050_v55 = vmul.f32 %v10037_v37, %v9443_v7  ;;  %v5118_v18 = vmul.f32 %v9314_v42, %v10038_v63  ;;  %v4907_v30 = vadd.f32 %v10039_v35, %v4838_v46 }
 0x81b   : > { %v5288_v47 = vmax.f32 %v5256_v13, 0.0  ;;  %v5289_v56 = vmax.f32 %v5257_v10, 0.0  ;;  %v4908_v1 = vadd.f32 %v10040_v5, %v4839_v34  ;;  %v5119_v38 = vmul.f32 %v9314_v42, %v10041_v33  ;;  %v10044_v10 = vld [vmem:[#allocation21_spill] sm:$0xff] }
 0x81c   : > { %v5343_v50 = vpack.c.bf16 %v5319_v20, %v5318_v54  ;;  %v5187_v7 = vmul.f32 %v10042_v43, %v9560_v0  ;;  %v4633_v51 = vmul.f32 %v9419_v36, %v9519_v25  ;;  %v4976_v27 = vadd.f32 %v4944_v45, %v4907_v30  ;;  %v10045_v20 = vld [vmem:[#allocation23_spill] sm:$0xff] }
 0x81d   : > { %v5320_v61 = vmin.f32 %v5288_v47, 6.0  ;;  %v5321_v31 = vmin.f32 %v5289_v56, 6.0  ;;  %v4977_v3 = vadd.f32 %v4945_v23, %v4908_v1  ;;  %v4564_v9 = vmul.f32 %v9329_v12, %v9429_v48  ;;  %v10043_v48 = vld [vmem:[#allocation19_spill] sm:$0xff]  ;;  %v9607_v1 = vld [vmem:[#allocation6 + $0x138] sm:$0xff] }
 0x81e   : > { %6822 = vmatmul.mubr.bf16.gmra.mrb[128].mxu0 %v5343_v50  ;;  %v4634_v8 = vmul.f32 %v9419_v36, %v9521_v49  ;;  %v4665_v15 = vadd.f32 %v4633_v51, %v4563_v59  ;;  %v4703_v14 = vmul.f32 %v9408_v57, %v9570_v44  ;;  %v5081_v58 = vadd.f32 %v5049_v26, %v4976_v27  ;;  %v10047_v50 = vld [vmem:[#allocation25_spill] sm:$0xff] }
 0x81f   : > { %v5344_v40 = vpack.c.bf16 %v5321_v31, %v5320_v61  ;;  %v5082_v28 = vadd.f32 %v5050_v55, %v4977_v3  ;;  %v5188_v39 = vmul.f32 %v10042_v43, %v9572_v21  ;;  %v4704_v22 = vmul.f32 %v9408_v57, %v9580_v2  ;;  %v10046_v55 = vld [vmem:[#allocation30_spill] sm:$0xff]  ;;  %v9612_v31 = vld [vmem:[#allocation6 + $0x140] sm:$0xff] }
 0x820   : > { %v4666_v53 = vadd.f32 %v4634_v8, %v4564_v9  ;;  %v4735_v54 = vadd.f32 %v4703_v14, %v4665_v15  ;;  %v4877_v45 = vmul.f32 %v10043_v48, %v9391_v17  ;;  %v5150_v23 = vadd.f32 %v5118_v18, %v5081_v58  ;;  %v9618_v27 = vld [vmem:[#allocation6 + $0x122] sm:$0xff] }
 0x821   : > { %6825 = vmatprep.mubr.bf16.mxu0 %v5344_v40  ;;  %v5151_v59 = vadd.f32 %v5119_v38, %v5082_v28  ;;  %v4878_v13 = vmul.f32 %v10043_v48, %v9426_v4  ;;  %v4946_v46 = vmul.f32 %v9357_v16, %v10044_v10  ;;  %v4947_v47 = vmul.f32 %v9357_v16, %v10046_v55 }
 0x822   : > { %v4736_v34 = vadd.f32 %v4704_v22, %v4666_v53  ;;  %v4840_v26 = vadd.f32 %v10045_v20, %v4735_v54  ;;  %v5051_v56 = vmul.f32 %v10037_v37, %v10038_v63  ;;  %v5219_v35 = vadd.f32 %v5187_v7, %v5150_v23  ;;  %v9630_v22 = vld [vmem:[#allocation6 + $0x12a] sm:$0xff] }
 0x823   : > { %v5220_v30 = vadd.f32 %v5188_v39, %v5151_v59  ;;  %v5052_v18 = vmul.f32 %v10037_v37, %v10041_v33  ;;  %v5120_v5 = vmul.f32 %v9314_v42, %v9560_v0  ;;  %v5121_v61 = vmul.f32 %v9314_v42, %v9572_v21 }
 0x824   : > { %v4841_v38 = vadd.f32 %v10047_v50, %v4736_v34  ;;  %v4909_v51 = vadd.f32 %v4877_v45, %v4840_v26  ;;  %v4565_v63 = vmul.f32 %v9329_v12, %v9519_v25  ;;  %v5258_v7 = vadd.f32 %v9537_v52, %v5219_v35 }
 0x825   : > { %v5259_v33 = vadd.f32 %v9537_v52, %v5220_v30  ;;  %v4566_v3 = vmul.f32 %v9329_v12, %v9521_v49  ;;  %v4635_v9 = vmul.f32 %v9419_v36, %v9570_v44  ;;  %v4636_v14 = vmul.f32 %v9419_v36, %v9580_v2 }
 0x826   : > { %v4910_v8 = vadd.f32 %v4878_v13, %v4841_v38  ;;  %v4978_v15 = vadd.f32 %v4946_v46, %v4909_v51  ;;  %v4705_v25 = vmul.f32 %v9408_v57, %v9607_v1  ;;  %v5290_v40 = vmax.f32 %v5258_v7, 0.0 }
 0x827   : > { %v5291_v58 = vmax.f32 %v5259_v33, 0.0  ;;  %v4667_v28 = vadd.f32 %v4635_v9, %v4565_v63  ;;  %v4706_v39 = vmul.f32 %v9408_v57, %v9612_v31  ;;  %v5189_v54 = vmul.f32 %v10042_v43, %v9618_v27 }
 0x828   : > { %v4979_v53 = vadd.f32 %v4947_v47, %v4910_v8  ;;  %v5083_v49 = vadd.f32 %v5051_v56, %v4978_v15  ;;  %v4668_v45 = vadd.f32 %v4636_v14, %v4566_v3  ;;  %v5322_v23 = vmin.f32 %v5290_v40, 6.0  ;;  %v9655_v14 = vld [vmem:[#allocation6 + $0x142] sm:$0xff] }
 0x829   : > { %v5323_v59 = vmin.f32 %v5291_v58, 6.0  ;;  %v4737_v13 = vadd.f32 %v4705_v25, %v4667_v28  ;;  %v4810_v46 = vmul.f32 %v9275_v62, %v9391_v17  ;;  %v4811_v35 = vmul.f32 %v9275_v62, %v9426_v4 }
 0x82a   : > { %v5084_v34 = vadd.f32 %v5052_v18, %v4979_v53  ;;  %v5152_v20 = vadd.f32 %v5120_v5, %v5083_v49  ;;  %v4738_v26 = vadd.f32 %v4706_v39, %v4668_v45  ;;  %v5190_v56 = vmul.f32 %v10042_v43, %v9630_v22  ;;  %v9644_v18 = vld [vmem:[#allocation6 + $0x13a] sm:$0xff] }
 0x82b   : > { %v5345_v47 = vpack.c.bf16 %v5323_v59, %v5322_v23  ;;  %v4842_v30 = vadd.f32 %v4810_v46, %v4737_v13  ;;  %v4879_v50 = vmul.f32 %v10043_v48, %v10044_v10  ;;  %v4880_v17 = vmul.f32 %v10043_v48, %v10046_v55  ;;  %v9666_v49 = vld [vmem:[#allocation6 + $0x158] sm:$0xff] }
 0x82c   : > { %v5153_v38 = vadd.f32 %v5121_v61, %v5084_v34  ;;  %v5221_v51 = vadd.f32 %v5189_v54, %v5152_v20  ;;  %v4843_v63 = vadd.f32 %v4811_v35, %v4738_v26  ;;  %v4948_v4 = vmul.f32 %v9357_v16, %v9479_v11 }
 0x82d   : > { %6826 = vmatmul.mubr.bf16.gmra.mrb[132].mxu0 %v5345_v47  ;;  %v4911_v5 = vadd.f32 %v4879_v50, %v4842_v30  ;;  %v4949_v7 = vmul.f32 %v9357_v16, %v9489_v19  ;;  %v5053_v33 = vmul.f32 %v10037_v37, %v9560_v0  ;;  %v5054_v8 = vmul.f32 %v10037_v37, %v9572_v21  ;;  %v9663_v0 = vld [vmem:[#allocation6 + $0x150] sm:$0xff] }
 0x82e   : > { %v5222_v3 = vadd.f32 %v5190_v56, %v5153_v38  ;;  %v5260_v61 = vadd.f32 %v9537_v52, %v5221_v51  ;;  %v4912_v9 = vadd.f32 %v4880_v17, %v4843_v63  ;;  %v5122_v25 = vmul.f32 %v9314_v42, %v9618_v27 }
 0x82f   : > { %v4980_v15 = vadd.f32 %v4948_v4, %v4911_v5  ;;  %v5123_v40 = vmul.f32 %v9314_v42, %v9630_v22  ;;  %v5191_v58 = vmul.f32 %v10042_v43, %v9644_v18  ;;  %v4567_v21 = vmul.f32 %v9329_v12, %v9570_v44 }
 0x830   : > { %v5261_v28 = vadd.f32 %v9537_v52, %v5222_v3  ;;  %v5292_v39 = vmax.f32 %v5260_v61, 0.0  ;;  %v4981_v53 = vadd.f32 %v4949_v7, %v4912_v9  ;;  %v4568_v45 = vmul.f32 %v9329_v12, %v9580_v2 }
 0x831   : > { %v5085_v54 = vadd.f32 %v5053_v33, %v4980_v15  ;;  %v4637_v23 = vmul.f32 %v9419_v36, %v9607_v1  ;;  %v4638_v59 = vmul.f32 %v9419_v36, %v9612_v31  ;;  %v5192_v34 = vmul.f32 %v10042_v43, %v9655_v14 }
 0x832   : > { %v5293_v13 = vmax.f32 %v5261_v28, 0.0  ;;  %v5086_v46 = vadd.f32 %v5054_v8, %v4981_v53  ;;  %v4707_v20 = vmul.f32 %v9408_v57, %v9663_v0  ;;  %v4708_v2 = vmul.f32 %v9408_v57, %v9666_v49  ;;  %v9702_v53 = vld [vmem:[#allocation6 + $0x168] sm:$0xff] }
 0x833   : > { %v5154_v26 = vadd.f32 %v5122_v25, %v5085_v54  ;;  %v4669_v44 = vadd.f32 %v4637_v23, %v4567_v21  ;;  %v4670_v35 = vadd.f32 %v4638_v59, %v4568_v45  ;;  %v5324_v47 = vmin.f32 %v5292_v39, 6.0  ;;  %v9704_v21 = vld [vmem:[#allocation6 + $0x170] sm:$0xff] }
 0x834   : > { %v5325_v56 = vmin.f32 %v5293_v13, 6.0  ;;  %v5155_v30 = vadd.f32 %v5123_v40, %v5086_v46  ;;  %v4812_v50 = vmul.f32 %v9275_v62, %v10044_v10  ;;  %v4813_v17 = vmul.f32 %v9275_v62, %v10046_v55  ;;  %v9706_v45 = vld [vmem:[#allocation6 + $0x152] sm:$0xff] }
 0x835   : > { %v5223_v38 = vadd.f32 %v5191_v58, %v5154_v26  ;;  %v4739_v51 = vadd.f32 %v4707_v20, %v4669_v44  ;;  %v4740_v63 = vadd.f32 %v4708_v2, %v4670_v35  ;;  %v4881_v7 = vmul.f32 %v10043_v48, %v9479_v11 }
 0x836   : > { %v5346_v5 = vpack.c.bf16 %v5325_v56, %v5324_v47  ;;  %v5224_v4 = vadd.f32 %v5192_v34, %v5155_v30  ;;  %v4882_v33 = vmul.f32 %v10043_v48, %v9489_v19  ;;  %v4950_v10 = vmul.f32 %v9357_v16, %v9475_v24  ;;  %v9714_v34 = vld [vmem:[#allocation6 + $0x15a] sm:$0xff] }
 0x837   : > { %v5262_v3 = vadd.f32 %v9537_v52, %v5223_v38  ;;  %v4844_v61 = vadd.f32 %v4812_v50, %v4739_v51  ;;  %v4845_v9 = vadd.f32 %v4813_v17, %v4740_v63  ;;  %v4951_v55 = vmul.f32 %v9357_v16, %v9484_v32 }
 0x838   : > { %6829 = vmatprep.mubr.bf16.mxu0 %v5346_v5  ;;  %v5263_v8 = vadd.f32 %v9537_v52, %v5224_v4  ;;  %v5055_v15 = vmul.f32 %v10037_v37, %v9618_v27  ;;  %v5056_v25 = vmul.f32 %v10037_v37, %v9630_v22  ;;  %v5124_v39 = vmul.f32 %v9314_v42, %v9644_v18 }
 0x839   : > { %v5294_v40 = vmax.f32 %v5262_v3, 0.0  ;;  %v4913_v58 = vadd.f32 %v4881_v7, %v4844_v61  ;;  %v4914_v28 = vadd.f32 %v4882_v33, %v4845_v9  ;;  %v5125_v23 = vmul.f32 %v9314_v42, %v9655_v14 }
 0x83a   : > { %v5295_v54 = vmax.f32 %v5263_v8, 0.0  ;;  %v4569_v27 = vmul.f32 %v9329_v12, %v9607_v1  ;;  %v4570_v22 = vmul.f32 %v9329_v12, %v9612_v31  ;;  %v4639_v20 = vmul.f32 %v9419_v36, %v9663_v0 }
 0x83b   : > { %v5326_v59 = vmin.f32 %v5294_v40, 6.0  ;;  %v4982_v13 = vadd.f32 %v4950_v10, %v4913_v58  ;;  %v4983_v46 = vadd.f32 %v4951_v55, %v4914_v28  ;;  %v4640_v44 = vmul.f32 %v9419_v36, %v9666_v49 }
 0x83c   : > { %v5327_v26 = vmin.f32 %v5295_v54, 6.0  ;;  %v4709_v35 = vmul.f32 %v9408_v57, %v9702_v53  ;;  %v4710_v1 = vmul.f32 %v9408_v57, %v9704_v21  ;;  %v5193_v47 = vmul.f32 %v10042_v43, %v9706_v45  ;;  %v4534_v54 = vld [vmem:[#allocation6 + $0x180] sm:$0xff] }
 0x83d   : > { %v5087_v2 = vadd.f32 %v5055_v15, %v4982_v13  ;;  %v5088_v31 = vadd.f32 %v5056_v25, %v4983_v46  ;;  %v4671_v56 = vadd.f32 %v4639_v20, %v4569_v27  ;;  %v5194_v50 = vmul.f32 %v10042_v43, %v9714_v34  ;;  %v9756_v20 = vld [vmem:[#allocation6 + $0x16a] sm:$0xff] }
 0x83e   : > { %v5347_v30 = vpack.c.bf16 %v5327_v26, %v5326_v59  ;;  %v4672_v38 = vadd.f32 %v4640_v44, %v4570_v22  ;;  %v4814_v51 = vmul.f32 %v9275_v62, %v9479_v11  ;;  %v4815_v4 = vmul.f32 %v9275_v62, %v9489_v19 }
 0x83f   : > { %v5156_v63 = vadd.f32 %v5124_v39, %v5087_v2  ;;  %v5157_v17 = vadd.f32 %v5125_v23, %v5088_v31  ;;  %v4741_v5 = vadd.f32 %v4709_v35, %v4671_v56  ;;  %v4883_v33 = vmul.f32 %v10043_v48, %v9475_v24  ;;  %v4535_v23 = vld [vmem:[#allocation6 + $0x188] sm:$0xff] }
 0x840   : > { %6830 = vmatmul.mubr.bf16.gmra.mrb[136].mxu0 %v5347_v30  ;;  %v4742_v7 = vadd.f32 %v4710_v1, %v4672_v38  ;;  %v4884_v3 = vmul.f32 %v10043_v48, %v9484_v32  ;;  %v4952_v61 = vmul.f32 %v9357_v16, %v9516_v41  ;;  %v4953_v8 = vmul.f32 %v9357_v16, %v9531_v60 }
 0x841   : > { %v5225_v9 = vadd.f32 %v5193_v47, %v5156_v63  ;;  %v5226_v10 = vadd.f32 %v5194_v50, %v5157_v17  ;;  %v4846_v11 = vadd.f32 %v4814_v51, %v4741_v5  ;;  %v5057_v19 = vmul.f32 %v10037_v37, %v9644_v18  ;;  %v4536_v63 = vld [vmem:[#allocation6 + $0x198] sm:$0xff] }
 0x842   : > { %v4847_v55 = vadd.f32 %v4815_v4, %v4742_v7  ;;  %v5058_v15 = vmul.f32 %v10037_v37, %v9655_v14  ;;  %v5126_v25 = vmul.f32 %v9314_v42, %v9706_v45  ;;  %v5127_v39 = vmul.f32 %v9314_v42, %v9714_v34 }
 0x843   : > { %v5264_v40 = vadd.f32 %v9537_v52, %v5225_v9  ;;  %v5265_v58 = vadd.f32 %v9537_v52, %v5226_v10  ;;  %v4915_v28 = vadd.f32 %v4883_v33, %v4846_v11  ;;  %v4571_v18 = vmul.f32 %v9329_v12, %v9663_v0 }
 0x844   : > { %v4916_v27 = vadd.f32 %v4884_v3, %v4847_v55  ;;  %v4572_v14 = vmul.f32 %v9329_v12, %v9666_v49  ;;  %v4641_v22 = vmul.f32 %v9419_v36, %v9702_v53  ;;  %v4642_v26 = vmul.f32 %v9419_v36, %v9704_v21  ;;  %v9762_v49 = vld [vmem:[#allocation6 + $0x172] sm:$0xff] }
 0x845   : > { %v5296_v59 = vmax.f32 %v5264_v40, 0.0  ;;  %v5297_v13 = vmax.f32 %v5265_v58, 0.0  ;;  %v4984_v46 = vadd.f32 %v4952_v61, %v4915_v28  ;;  %v4711_v1 = vmul.f32 %v9408_v57, %v4534_v54 }
 0x846   : > { %v4985_v44 = vadd.f32 %v4953_v8, %v4916_v27  ;;  %v4673_v35 = vadd.f32 %v4641_v22, %v4571_v18  ;;  %v4712_v0 = vmul.f32 %v9408_v57, %v4535_v23  ;;  %v4674_v56 = vadd.f32 %v4642_v26, %v4572_v14  ;;  %v5022_v14 = vld [vmem:[#allocation6 + $0x182] sm:$0xff] }
 0x847   : > { %v5328_v2 = vmin.f32 %v5296_v59, 6.0  ;;  %v5329_v31 = vmin.f32 %v5297_v13, 6.0  ;;  %v5089_v47 = vadd.f32 %v5057_v19, %v4984_v46  ;;  %v5195_v50 = vmul.f32 %v10042_v43, %v9756_v20 }
 0x848   : > { %v5090_v30 = vadd.f32 %v5058_v15, %v4985_v44  ;;  %v4743_v38 = vadd.f32 %v4711_v1, %v4673_v35  ;;  %v4816_v51 = vmul.f32 %v9275_v62, %v9475_v24  ;;  %v4744_v4 = vadd.f32 %v4712_v0, %v4674_v56  ;;  %v7267_v15 = vld [vmem:[#allocation6 + $0x8] sm:$0xff] }
 0x849   : > { %v5348_v17 = vpack.c.bf16 %v5329_v31, %v5328_v2  ;;  %v5158_v5 = vadd.f32 %v5126_v25, %v5089_v47  ;;  %v4817_v7 = vmul.f32 %v9275_v62, %v9484_v32  ;;  %v5196_v3 = vmul.f32 %v10042_v43, %v9762_v49  ;;  %v5023_v35 = vld [vmem:[#allocation6 + $0x18a] sm:$0xff] }
 0x84a   : > { %v5159_v33 = vadd.f32 %v5127_v39, %v5090_v30  ;;  %v4848_v61 = vadd.f32 %v4816_v51, %v4743_v38  ;;  %v4885_v9 = vmul.f32 %v10043_v48, %v9516_v41  ;;  %v4886_v24 = vmul.f32 %v10043_v48, %v9531_v60  ;;  %v4782_v51 = vld [vmem:[#allocation6 + $0x1a1] sm:$0xff] }
 0x84b   : > { %6833 = vmatprep.mubr.bf16.mxu0 %v5348_v17  ;;  %v5227_v10 = vadd.f32 %v5195_v50, %v5158_v5  ;;  %v4849_v11 = vadd.f32 %v4817_v7, %v4744_v4  ;;  %v4713_v8 = vmul.f32 %v9408_v57, %v4536_v63  ;;  %v4954_v32 = vmul.f32 %v9357_v16, %v9512_v29 }
 0x84c   : > { %v5228_v55 = vadd.f32 %v5196_v3, %v5159_v33  ;;  %v4917_v19 = vadd.f32 %v4885_v9, %v4848_v61  ;;  %v4714_v25 = vmul.f32 %v7267_v15, %v9408_v57  ;;  %v4955_v28 = vmul.f32 %v9357_v16, %v9524_v6 }
 0x84d   : > { %v5266_v40 = vadd.f32 %v9537_v52, %v5227_v10  ;;  %v4918_v58 = vadd.f32 %v4886_v24, %v4849_v11  ;;  %v5059_v39 = vmul.f32 %v10037_v37, %v9706_v45  ;;  %v5060_v22 = vmul.f32 %v10037_v37, %v9714_v34 }
 0x84e   : > { %v5267_v27 = vadd.f32 %v9537_v52, %v5228_v55  ;;  %v4986_v18 = vadd.f32 %v4954_v32, %v4917_v19  ;;  %v4573_v59 = vmul.f32 %v9329_v12, %v9702_v53  ;;  %v4574_v46 = vmul.f32 %v9329_v12, %v9704_v21 }
 0x84f   : > { %v5298_v57 = vmax.f32 %v5266_v40, 0.0  ;;  %v4987_v13 = vadd.f32 %v4955_v28, %v4918_v58  ;;  %v4643_v26 = vmul.f32 %v9419_v36, %v4534_v54  ;;  %v5128_v1 = vmul.f32 %v9314_v42, %v9756_v20  ;;  %v4781_v54 = vld [vmem:[#allocation6 + $0x199] sm:$0xff] }
 0x850   : > { %v5299_v44 = vmax.f32 %v5267_v27, 0.0  ;;  %v5091_v45 = vadd.f32 %v5059_v39, %v4986_v18  ;;  %v4644_v0 = vmul.f32 %v9419_v36, %v4535_v23  ;;  %v5129_v34 = vmul.f32 %v9314_v42, %v9762_v49 }
 0x851   : > { %v5092_v2 = vadd.f32 %v5060_v22, %v4987_v13  ;;  %v5197_v53 = vmul.f32 %v10042_v43, %v5022_v14  ;;  %v4675_v31 = vadd.f32 %v4643_v26, %v4573_v59  ;;  %v5330_v47 = vmin.f32 %v5298_v57, 6.0 }
 0x852   : > { %v5331_v56 = vmin.f32 %v5299_v44, 6.0  ;;  %v5160_v12 = vadd.f32 %v5128_v1, %v5091_v45  ;;  %v4676_v21 = vadd.f32 %v4644_v0, %v4574_v46  ;;  %v5198_v50 = vmul.f32 %v10042_v43, %v5023_v35  ;;  %v7269_v0 = vld [vmem:[#allocation2 + $0x70] sm:$0xff] }
 0x853   : > { %v5161_v30 = vadd.f32 %v5129_v34, %v5092_v2  ;;  %v4745_v38 = vadd.f32 %v4713_v8, %v4675_v31  ;;  %v4818_v36 = vmul.f32 %v9275_v62, %v9516_v41  ;;  %v4819_v5 = vmul.f32 %v9275_v62, %v9531_v60  ;;  %v5024_v62 = vld [vmem:[#allocation6 + $0x19a] sm:$0xff] }
 0x854   : > { %v5349_v23 = vpack.c.bf16 %v5331_v56, %v5330_v47  ;;  %v5229_v63 = vadd.f32 %v5197_v53, %v5160_v12  ;;  %v4746_v17 = vadd.f32 %v4714_v25, %v4676_v21  ;;  %v4887_v33 = vmul.f32 %v10043_v48, %v9512_v29  ;;  %v5025_v29 = vld [vmem:[#allocation6 + $0x1a2] sm:$0xff]  ;;  %v7271_v12 = vld [vmem:[#allocation2 + $0x78] sm:$0xff] }
 0x855   : > { %v5230_v4 = vadd.f32 %v5198_v50, %v5161_v30  ;;  %v4850_v7 = vadd.f32 %v4818_v36, %v4745_v38  ;;  %v4956_v3 = vmul.f32 %v9357_v16, %v4781_v54  ;;  %v4888_v41 = vmul.f32 %v10043_v48, %v9524_v6  ;;  %v7270_v31 = vld [vmem:[#allocation2 + $0x60] sm:$0xff]  ;;  %v7272_v54 = vld [vmem:[#allocation2 + $0x68] sm:$0xff] }
 0x856   : > { %6834 = vmatmul.mubr.bf16.gmra.mrb[140].mxu0 %v5349_v23  ;;  %v5268_v61 = vadd.f32 %v9537_v52, %v5229_v63  ;;  %v4851_v9 = vadd.f32 %v4819_v5, %v4746_v17  ;;  %v4957_v10 = vmul.f32 %v9357_v16, %v4782_v51  ;;  %v5061_v32 = vmul.f32 %v10037_v37, %v9756_v20  ;;  %v7273_v63 = vld [vmem:[#allocation2 + $0x90] sm:$0xff] }
 0x857   : > { %v5269_v11 = vadd.f32 %v9537_v52, %v5230_v4  ;;  %v4919_v24 = vadd.f32 %v4887_v33, %v4850_v7  ;;  %v5062_v25 = vmul.f32 %v10037_v37, %v9762_v49  ;;  %v5199_v6 = vmul.f32 %v10042_v43, %v5024_v62  ;;  %v7274_v7 = vld [vmem:[#allocation2 + $0x80] sm:$0xff] }
 0x858   : > { %v5300_v60 = vmax.f32 %v5268_v61, 0.0  ;;  %v4920_v8 = vadd.f32 %v4888_v41, %v4851_v9  ;;  %v5130_v58 = vmul.f32 %v9314_v42, %v5022_v14  ;;  %v5131_v39 = vmul.f32 %v9314_v42, %v5023_v35  ;;  %v7275_v61 = vld [vmem:[#allocation2 + $0x98] sm:$0xff]  ;;  %v7276_v41 = vld [vmem:[#allocation2 + $0x88] sm:$0xff] }
 0x859   : > { %v5301_v55 = vmax.f32 %v5269_v11, 0.0  ;;  %v4988_v19 = vadd.f32 %v4956_v3, %v4919_v24  ;;  %v5200_v27 = vmul.f32 %v10042_v43, %v5025_v29  ;;  %v9825_v43 = vld [vmem:[%s9903_s13] ss:$0 sm:$0xff] }
 0x85a   : > { %v4989_v15 = vadd.f32 %v4957_v10, %v4920_v8  ;;  %v5332_v48 = vmin.f32 %v5300_v60, 6.0 }
 0x85b   : > { %v5333_v16 = vmin.f32 %v5301_v55, 6.0  ;;  %v5093_v40 = vadd.f32 %v5061_v32, %v4988_v19  ;;  %v7277_v55 = vld [vmem:[#allocation2 + $0xb0] sm:$0xff] }
 0x85c   : > { %v5094_v28 = vadd.f32 %v5062_v25, %v4989_v15  ;;  %v7278_v15 = vld [vmem:[#allocation2 + $0xa0] sm:$0xff] }
 0x85d   : > { %v5350_v18 = vpack.c.bf16 %v5333_v16, %v5332_v48  ;;  %v5162_v22 = vadd.f32 %v5130_v58, %v5093_v40  ;;  %v7279_v48 = vld [vmem:[#allocation2 + $0xb8] sm:$0xff]  ;;  %v7280_v40 = vld [vmem:[#allocation2 + $0xa8] sm:$0xff] }
 0x85e   : > { %v5163_v59 = vadd.f32 %v5131_v39, %v5094_v28 }
 0x85f   : > { %6837 = vmatprep.mubr.bf16.mxu0 %v5350_v18  ;;  %v5231_v20 = vadd.f32 %v5199_v6, %v5162_v22 }
 0x860   : > { %v5232_v57 = vadd.f32 %v5200_v27, %v5163_v59  ;;  %v7281_v59 = vld [vmem:[#allocation2 + $0xd0] sm:$0xff] }
 0x861   : > { %v5270_v37 = vadd.f32 %v9537_v52, %v5231_v20 }
 0x862   : > { %v5271_v49 = vadd.f32 %v9537_v52, %v5232_v57 }
 0x863   : > { %v5302_v13 = vmax.f32 %v5270_v37, 0.0 }
 0x864   : > { %v5303_v46 = vmax.f32 %v5271_v49, 0.0  ;;  %v7282_v49 = vld [vmem:[#allocation2 + $0xc0] sm:$0xff] }
 0x865   : > { %v5334_v26 = vmin.f32 %v5302_v13, 6.0 }
 0x866   : > { %v5335_v44 = vmin.f32 %v5303_v46, 6.0 }
 0x868   : > { %v5351_v14 = vpack.c.bf16 %v5335_v44, %v5334_v26  ;;  %v7283_v26 = vld [vmem:[#allocation2 + $0xd8] sm:$0xff] }
 0x86a   : > { %6838 = vmatmul.mubr.bf16.gmra.mrb[144].mxu0 %v5351_v14  ;;  %v7284_v14 = vld [vmem:[#allocation2 + $0xc8] sm:$0xff] }
 0x8f1   : > { %v6823_v42 = vpop.f32.mrb[128].mxu0 }
 0x8f2   : > { %v5514_v35 = vadd.f32 %v9825_v43, %v6823_v42  ;;  %v5505_v45 = vpop.f32.mrb[129].mxu0 }
 0x8f3   : > { %v5506_v52 = vadd.f32 %v9825_v43, %v5505_v45  ;;  %v6824_v1 = vpop.f32.mrb[130].mxu0 }
 0x8f4   : > { %v5598_v2 = vadd.f32 %v7269_v0, %v5514_v35  ;;  %v5517_v34 = vadd.f32 %v9825_v43, %v6824_v1  ;;  %v5508_v53 = vpop.f32.mrb[131].mxu0 }
 0x8f5   : > { %v5596_v47 = vadd.f32 %v7270_v31, %v5506_v52  ;;  %v5509_v56 = vadd.f32 %v9825_v43, %v5508_v53 }
 0x8f6   : > { %5630 = vst.msk [vmem:[%s9237_s20 + $0x70] sm:$0xff] %vm544_vm0, %v5598_v2  ;;  %v5599_v21 = vadd.f32 %v7271_v12, %v5517_v34  ;;  %v7285_v2 = vld [vmem:[#allocation2 + $0xf0] sm:$0xff] }
 0x8f7   : > { %5628 = vst.msk [vmem:[%s9237_s20 + $0x60] sm:$0xff] %vm544_vm0, %v5596_v47  ;;  %v5597_v30 = vadd.f32 %v7272_v54, %v5509_v56  ;;  %v7286_v47 = vld [vmem:[#allocation2 + $0xe0] sm:$0xff] }
 0x8f8   : > { %5631 = vst.msk [vmem:[%s9237_s20 + $0x78] sm:$0xff] %vm544_vm0, %v5599_v21  ;;  %v7287_v21 = vld [vmem:[#allocation2 + $0xf8] sm:$0xff] }
 0x8f9   : > { %5629 = vst.msk [vmem:[%s9237_s20 + $0x68] sm:$0xff] %vm544_vm0, %v5597_v30  ;;  %v7288_v30 = vld [vmem:[#allocation2 + $0xe8] sm:$0xff] }
 0x900   : > { %v6827_v50 = vpop.f32.mrb[132].mxu0 }
 0x901   : > { %v5530_v38 = vadd.f32 %v9825_v43, %v6827_v50  ;;  %v5521_v51 = vpop.f32.mrb[133].mxu0 }
 0x902   : > { %v5522_v36 = vadd.f32 %v9825_v43, %v5521_v51  ;;  %v6828_v23 = vpop.f32.mrb[134].mxu0 }
 0x903   : > { %v5602_v17 = vadd.f32 %v7273_v63, %v5530_v38  ;;  %v5533_v5 = vadd.f32 %v9825_v43, %v6828_v23  ;;  %v5524_v4 = vpop.f32.mrb[135].mxu0 }
 0x904   : > { %v5600_v33 = vadd.f32 %v7274_v7, %v5522_v36  ;;  %v5525_v3 = vadd.f32 %v9825_v43, %v5524_v4 }
 0x905   : > { %5634 = vst.msk [vmem:[%s9237_s20 + $0x90] sm:$0xff] %vm544_vm0, %v5602_v17  ;;  %v5603_v9 = vadd.f32 %v7275_v61, %v5533_v5 }
 0x906   : > { %5632 = vst.msk [vmem:[%s9237_s20 + $0x80] sm:$0xff] %vm544_vm0, %v5600_v33  ;;  %v5601_v10 = vadd.f32 %v7276_v41, %v5525_v3 }
 0x907   : > { %5635 = vst.msk [vmem:[%s9237_s20 + $0x98] sm:$0xff] %vm544_vm0, %v5603_v9 }
 0x908   : > { %5633 = vst.msk [vmem:[%s9237_s20 + $0x88] sm:$0xff] %vm544_vm0, %v5601_v10 }
 0x913   : > { %v6831_v11 = vpop.f32.mrb[136].mxu0 }
 0x914   : > { %v5546_v24 = vadd.f32 %v9825_v43, %v6831_v11  ;;  %v5537_v62 = vpop.f32.mrb[137].mxu0 }
 0x915   : > { %v5538_v60 = vadd.f32 %v9825_v43, %v5537_v62  ;;  %v6832_v8 = vpop.f32.mrb[138].mxu0 }
 0x916   : > { %v5606_v19 = vadd.f32 %v7277_v55, %v5546_v24  ;;  %v5549_v29 = vadd.f32 %v9825_v43, %v6832_v8  ;;  %v5540_v32 = vpop.f32.mrb[139].mxu0 }
 0x917   : > { %v5604_v25 = vadd.f32 %v7278_v15, %v5538_v60  ;;  %v5541_v6 = vadd.f32 %v9825_v43, %v5540_v32 }
 0x918   : > { %5638 = vst.msk [vmem:[%s9237_s20 + $0xb0] sm:$0xff] %vm544_vm0, %v5606_v19  ;;  %v5607_v16 = vadd.f32 %v7279_v48, %v5549_v29 }
 0x919   : > { %5636 = vst.msk [vmem:[%s9237_s20 + $0xa0] sm:$0xff] %vm544_vm0, %v5604_v25  ;;  %v5605_v58 = vadd.f32 %v7280_v40, %v5541_v6 }
 0x91a   : > { %5639 = vst.msk [vmem:[%s9237_s20 + $0xb8] sm:$0xff] %vm544_vm0, %v5607_v16 }
 0x91b   : > { %5637 = vst.msk [vmem:[%s9237_s20 + $0xa8] sm:$0xff] %vm544_vm0, %v5605_v58 }
 0x929   : > { %v6835_v28 = vpop.f32.mrb[140].mxu0 }
 0x92a   : > { %v5562_v39 = vadd.f32 %v9825_v43, %v6835_v28  ;;  %v5553_v27 = vpop.f32.mrb[141].mxu0 }
 0x92b   : > { %v5554_v18 = vadd.f32 %v9825_v43, %v5553_v27  ;;  %v6836_v22 = vpop.f32.mrb[142].mxu0 }
 0x92c   : > { %v5610_v20 = vadd.f32 %v7281_v59, %v5562_v39  ;;  %v5565_v57 = vadd.f32 %v9825_v43, %v6836_v22  ;;  %v5556_v37 = vpop.f32.mrb[143].mxu0 }
 0x92d   : > { %v5608_v13 = vadd.f32 %v7282_v49, %v5554_v18  ;;  %v5557_v46 = vadd.f32 %v9825_v43, %v5556_v37 }
 0x92e   : > { %5642 = vst.msk [vmem:[%s9237_s20 + $0xd0] sm:$0xff] %vm544_vm0, %v5610_v20  ;;  %v5611_v44 = vadd.f32 %v7283_v26, %v5565_v57 }
 0x92f   : > { %5640 = vst.msk [vmem:[%s9237_s20 + $0xc0] sm:$0xff] %vm544_vm0, %v5608_v13  ;;  %v5609_v42 = vadd.f32 %v7284_v14, %v5557_v46 }
 0x930   : > { %5643 = vst.msk [vmem:[%s9237_s20 + $0xd8] sm:$0xff] %vm544_vm0, %v5611_v44 }
 0x931   : > { %5641 = vst.msk [vmem:[%s9237_s20 + $0xc8] sm:$0xff] %vm544_vm0, %v5609_v42 }
 0x93d   : > { %v6839_v35 = vpop.f32.mrb[144].mxu0 }
 0x93e   : > { %v5578_v45 = vadd.f32 %v9825_v43, %v6839_v35  ;;  %v5569_v52 = vpop.f32.mrb[145].mxu0 }
 0x93f   : > { %v5570_v1 = vadd.f32 %v9825_v43, %v5569_v52  ;;  %v6840_v0 = vpop.f32.mrb[146].mxu0 }
 0x940   : > { %v5614_v34 = vadd.f32 %v7285_v2, %v5578_v45  ;;  %v5581_v53 = vadd.f32 %v9825_v43, %v6840_v0  ;;  %v5572_v31 = vpop.f32.mrb[147].mxu0 }
 0x941   : > { %v5612_v56 = vadd.f32 %v7286_v47, %v5570_v1  ;;  %v5573_v12 = vadd.f32 %v9825_v43, %v5572_v31 }
 0x942   : > { %5646 = vst.msk [vmem:[%s9237_s20 + $0xf0] sm:$0xff] %vm544_vm0, %v5614_v34  ;;  %v5615_v54 = vadd.f32 %v7287_v21, %v5581_v53 }
 0x943   : > { %5644 = vst.msk [vmem:[%s9237_s20 + $0xe0] sm:$0xff] %vm544_vm0, %v5612_v56  ;;  %v5613_v50 = vadd.f32 %v7288_v30, %v5573_v12 }
 0x944   : > { %5647 = vst.msk [vmem:[%s9237_s20 + $0xf8] sm:$0xff] %vm544_vm0, %v5615_v54 }
 0x945   : > { %5645 = vst.msk [vmem:[%s9237_s20 + $0xe8] sm:$0xff] %vm544_vm0, %v5613_v50 }
 0x946 PF: > { %s24_s29 = sadd.s32 1, %s7295_s29  }
 0x947   : > { %p21_p4 = scmp.ge.s32.totalorder %s24_s29, 4  }
 0x949   :  { %23 = sbr.rel (!%p21_p4) target bundleno = 1 (0x1), region = 115 }

</bundles_post_ra>
